<compile_context>
chip_gen: v6e
topology: v6e:2x2x1
jax: 0.10.0
libtpu: 0.0.40
codegen_flags: <defaults>
</compile_context>

<pallas_src>
import functools

import jax
import jax.numpy as jnp
from jax.experimental import pallas as pl
from jax.experimental.pallas import tpu as pltpu


def _layernorm(z, gamma, beta, eps=1e-5):
    mu = jnp.mean(z, axis=-1, keepdims=True)
    var = jnp.mean((z - mu) ** 2, axis=-1, keepdims=True)
    return (z - mu) * jax.lax.rsqrt(var + eps) * gamma + beta


def block_kernel(
    x_ref, mask_ref,
    g1_ref, b1_ref,
    wqkv_ref,
    wp_ref, bp_ref,
    g2_ref, b2_ref,
    w1_ref, bb1_ref,
    w2_ref, bb2_ref,
    o_ref,
    *, n_head, head_size,
):
    C = n_head * head_size

    # x block: (R, C) rows == several batch elements stacked along rows.
    x = x_ref[...].astype(jnp.float32)

    # ---- ln1 (f32) ----
    h = _layernorm(x, g1_ref[...], b1_ref[...])
    hb = h.astype(jnp.bfloat16)

    # ---- fused Q/K/V projection: (R,C) @ (C,3C), bf16 in / f32 acc ----
    qkv = jnp.dot(hb, wqkv_ref[...], preferred_element_type=jnp.float32)
    scale = head_size ** -0.5
    qb = (qkv[:, 0 * C:1 * C] * scale).astype(jnp.bfloat16)
    kb = qkv[:, 1 * C:2 * C].astype(jnp.bfloat16)
    vb = qkv[:, 2 * C:3 * C].astype(jnp.bfloat16)

    mask = mask_ref[...]          # (R, R) additive: 0 (allowed) / -1e30 (masked)
    wp = wp_ref[...]              # (C, C) bf16, loaded once

    att = jnp.zeros(x.shape, jnp.float32)
    # Per-head score / attention-value matmuls keep M = R (>=128) rows.
    # The output projection is distributed over heads:
    #   concat_h(o_h) @ Wp == sum_h o_h @ Wp[h*D:(h+1)*D, :]
    for hd in range(n_head):
        lo = hd * head_size
        hi = lo + head_size
        q_h = qb[:, lo:hi]
        k_h = kb[:, lo:hi]
        v_h = vb[:, lo:hi]
        # s = q_h @ k_h.T  (NT dot_general, no explicit transpose)
        s = jax.lax.dot_general(
            q_h, k_h, (((1,), (1,)), ((), ())),
            preferred_element_type=jnp.float32)
        s = s + mask
        # stable softmax, reciprocal on the EUP
        m = jnp.max(s, axis=-1, keepdims=True)
        p = jnp.exp(s - m)
        l = jnp.sum(p, axis=-1, keepdims=True)
        p = p * pl.reciprocal(l, approx=True)
        # dropout on attention weights: identity (eval)
        o_h = jnp.dot(p.astype(jnp.bfloat16), v_h,
                      preferred_element_type=jnp.float32)       # (R, D)
        att += jnp.dot(o_h.astype(jnp.bfloat16), wp[lo:hi, :],
                       preferred_element_type=jnp.float32)      # (R, C)

    att = att + bp_ref[...]       # output projection bias (+ dropout identity)
    x1 = x + att                  # residual 1

    # ---- ln2 + feed-forward ----
    h2 = _layernorm(x1, g2_ref[...], b2_ref[...]).astype(jnp.bfloat16)
    ff = jnp.dot(h2, w1_ref[...], preferred_element_type=jnp.float32) + bb1_ref[...]
    ff = jnp.maximum(ff, 0.0).astype(jnp.bfloat16)              # ReLU
    ff = jnp.dot(ff, w2_ref[...], preferred_element_type=jnp.float32) + bb2_ref[...]
    # dropout identity

    o_ref[...] = (x1 + ff).astype(o_ref.dtype)                  # residual 2


def transformer_block(x, params, *, n_head, target_rows=128):
    B, T, C = x.shape
    head_size = C // n_head

    # Pack enough batch elements per grid step so the matmul M-dimension is
    # >= target_rows whenever the problem allows it.  (For realistic T >= 128
    # this degenerates to one batch element per step with zero waste.)
    if T >= target_rows:
        bt = 1
    else:
        bt = max(1, min(B, target_rows // T))
        while B % bt != 0:
            bt -= 1
    R = bt * T                    # rows per grid step (demo: 8 * 16 = 128)
    num_tiles = B // bt

    x2 = x.reshape(B * T, C)

    # Additive attention mask for one row tile, built once on the host
    # (hoisted out of the kernel).  Rows/cols are (batch-slot, time) flattened:
    # attention is allowed only within the same batch slot and causally in
    # time.  Finite -1e30 (not -inf) so a fully-masked row can never NaN.
    idx = jnp.arange(R)
    slot = idx // T
    t = idx % T
    ok = (slot[:, None] == slot[None, :]) & (t[:, None] >= t[None, :])
    mask_add = jnp.where(ok, 0.0, -1e30).astype(jnp.float32)

    # bf16 weights for the MXU (halves weight DMA + VMEM); LN params and
    # biases stay f32.  Q/K/V weights fused column-wise into one (C, 3C).
    bf16 = jnp.bfloat16
    wqkv = jnp.concatenate(
        [params["wq"], params["wk"], params["wv"]], axis=1).astype(bf16)
    wp = params["wp"].astype(bf16)
    w1 = params["w1"].astype(bf16)
    w2 = params["w2"].astype(bf16)

    kernel = functools.partial(block_kernel, n_head=n_head, head_size=head_size)

    row_spec = pl.BlockSpec((R, C), lambda i: (i, 0))
    c2 = lambda i: (0, 0)

    out2 = pl.pallas_call(
        kernel,
        out_shape=jax.ShapeDtypeStruct((B * T, C), x.dtype),
        grid_spec=pltpu.PrefetchScalarGridSpec(
            num_scalar_prefetch=0,
            grid=(num_tiles,),
            in_specs=[
                row_spec,                                        # x rows
                pl.BlockSpec((R, R), c2),                        # additive mask
                pl.BlockSpec((1, C), c2), pl.BlockSpec((1, C), c2),   # ln1 g/b
                pl.BlockSpec((C, 3 * C), c2),                    # fused Wqkv
                pl.BlockSpec((C, C), c2), pl.BlockSpec((1, C), c2),   # Wproj, bproj
                pl.BlockSpec((1, C), c2), pl.BlockSpec((1, C), c2),   # ln2 g/b
                pl.BlockSpec((C, 4 * C), c2), pl.BlockSpec((1, 4 * C), c2),  # W1, b1
                pl.BlockSpec((4 * C, C), c2), pl.BlockSpec((1, C), c2),      # W2, b2
            ],
            out_specs=pl.BlockSpec((R, C), lambda i: (i, 0)),
        ),
        compiler_params=pltpu.CompilerParams(
            dimension_semantics=("parallel",),
            vmem_limit_bytes=32 * 1024 * 1024,
        ),
    )(
        x2, mask_add,
        params["ln1_g"], params["ln1_b"],
        wqkv,
        wp, params["bp"],
        params["ln2_g"], params["ln2_b"],
        w1, params["b1"],
        w2, params["b2"],
    )
    return out2.reshape(B, T, C)


def init_params(key, n_embed):
    C = n_embed
    keys = jax.random.split(key, 8)
    s = 0.02
    return {
        "ln1_g": jnp.ones((1, C), jnp.float32),
        "ln1_b": jnp.zeros((1, C), jnp.float32),
        # per-head K/Q/V weights packed column-wise: head h uses cols [h*D,(h+1)*D)
        "wk": s * jax.random.normal(keys[0], (C, C), jnp.float32),
        "wq": s * jax.random.normal(keys[1], (C, C), jnp.float32),
        "wv": s * jax.random.normal(keys[2], (C, C), jnp.float32),
        "wp": s * jax.random.normal(keys[3], (C, C), jnp.float32),
        "bp": s * jax.random.normal(keys[4], (1, C), jnp.float32),
        "ln2_g": jnp.ones((1, C), jnp.float32),
        "ln2_b": jnp.zeros((1, C), jnp.float32),
        "w1": s * jax.random.normal(keys[5], (C, 4 * C), jnp.float32),
        "b1": jnp.zeros((1, 4 * C), jnp.float32),
        "w2": s * jax.random.normal(keys[6], (4 * C, C), jnp.float32),
        "b2": jnp.zeros((1, C), jnp.float32),
    }


def block_reference(x, params, *, n_head):
    """Pure-JAX f32 reference matching the PyTorch Block forward (eval)."""
    B, T, C = x.shape
    D = C // n_head

    def ln(z, g, b, eps=1e-5):
        mu = z.mean(-1, keepdims=True)
        var = ((z - mu) ** 2).mean(-1, keepdims=True)
        return (z - mu) * jax.lax.rsqrt(var + eps) * g + b

    h = ln(x, params["ln1_g"], params["ln1_b"])
    q = h @ params["wq"]
    k = h @ params["wk"]
    v = h @ params["wv"]
    qh = q.reshape(B, T, n_head, D).transpose(0, 2, 1, 3)
    kh = k.reshape(B, T, n_head, D).transpose(0, 2, 1, 3)
    vh = v.reshape(B, T, n_head, D).transpose(0, 2, 1, 3)
    s = jnp.einsum("bhqd,bhkd->bhqk", qh, kh) * D ** -0.5
    causal = jnp.tril(jnp.ones((T, T), bool))
    s = jnp.where(causal, s, -jnp.inf)
    p = jax.nn.softmax(s, axis=-1)
    o = jnp.einsum("bhqk,bhkd->bhqd", p, vh).transpose(0, 2, 1, 3).reshape(B, T, C)
    att = o @ params["wp"] + params["bp"]
    x1 = x + att
    h2 = ln(x1, params["ln2_g"], params["ln2_b"])
    ff = jnp.maximum(h2 @ params["w1"] + params["b1"], 0.0) @ params["w2"] + params["b2"]
    return x1 + ff


if __name__ == "__main__":
    # Small but lane-dense shapes: C, 3C and 4C are multiples of 128, and the
    # row tiling packs 8 batch elements per grid step -> M = 128 per matmul,
    # grid of 2 parallel steps.
    B, T, C, n_head = 16, 16, 128, 4     # block_size == T

    key = jax.random.PRNGKey(0)
    kx, kp = jax.random.split(key)
    x = jax.random.normal(kx, (B, T, C), jnp.float32)
    params = init_params(kp, C)

    out = transformer_block(x, params, n_head=n_head)
    jax.block_until_ready(out)
    assert out.shape == (B, T, C)

    # Loose parity check vs f32 reference (kernel uses bf16 matmul operands).
    ref = block_reference(x, params, n_head=n_head)
    assert float(jnp.max(jnp.abs(out - ref))) < 5e-2

    print("KERNEL_OK")
</pallas_src>

<mosaic_0001>
module attributes {stable_mosaic.version = 11 : i64} {
  func.func @block_kernel(%arg0: i32, %arg1: memref<128x128xf32, #tpu.memory_space<vmem>>, %arg2: memref<128x128xf32, #tpu.memory_space<vmem>>, %arg3: memref<1x128xf32, #tpu.memory_space<vmem>>, %arg4: memref<1x128xf32, #tpu.memory_space<vmem>>, %arg5: memref<128x384xbf16, #tpu.memory_space<vmem>>, %arg6: memref<128x128xbf16, #tpu.memory_space<vmem>>, %arg7: memref<1x128xf32, #tpu.memory_space<vmem>>, %arg8: memref<1x128xf32, #tpu.memory_space<vmem>>, %arg9: memref<1x128xf32, #tpu.memory_space<vmem>>, %arg10: memref<128x512xbf16, #tpu.memory_space<vmem>>, %arg11: memref<1x512xf32, #tpu.memory_space<vmem>>, %arg12: memref<512x128xbf16, #tpu.memory_space<vmem>>, %arg13: memref<1x128xf32, #tpu.memory_space<vmem>>, %arg14: memref<128x128xf32, #tpu.memory_space<vmem>>) attributes {dimension_semantics = [#tpu.dimension_semantics<parallel>], iteration_bounds = array<i64: 2>, scalar_prefetch = 0 : i64, scratch_operands = 0 : i64, tpu.core_type = #tpu.core_type<tc>, window_params = [{transform_indices = @transform_0, window_bounds = array<i64: 128, 128>}, {pipeline_mode = #tpu.pipeline_mode<synchronous>, transform_indices = @transform_1, window_bounds = array<i64: 128, 128>}, {pipeline_mode = #tpu.pipeline_mode<synchronous>, transform_indices = @transform_2, window_bounds = array<i64: 1, 128>}, {pipeline_mode = #tpu.pipeline_mode<synchronous>, transform_indices = @transform_3, window_bounds = array<i64: 1, 128>}, {pipeline_mode = #tpu.pipeline_mode<synchronous>, transform_indices = @transform_4, window_bounds = array<i64: 128, 384>}, {pipeline_mode = #tpu.pipeline_mode<synchronous>, transform_indices = @transform_5, window_bounds = array<i64: 128, 128>}, {pipeline_mode = #tpu.pipeline_mode<synchronous>, transform_indices = @transform_6, window_bounds = array<i64: 1, 128>}, {pipeline_mode = #tpu.pipeline_mode<synchronous>, transform_indices = @transform_7, window_bounds = array<i64: 1, 128>}, {pipeline_mode = #tpu.pipeline_mode<synchronous>, transform_indices = @transform_8, window_bounds = array<i64: 1, 128>}, {pipeline_mode = #tpu.pipeline_mode<synchronous>, transform_indices = @transform_9, window_bounds = array<i64: 128, 512>}, {pipeline_mode = #tpu.pipeline_mode<synchronous>, transform_indices = @transform_10, window_bounds = array<i64: 1, 512>}, {pipeline_mode = #tpu.pipeline_mode<synchronous>, transform_indices = @transform_11, window_bounds = array<i64: 512, 128>}, {pipeline_mode = #tpu.pipeline_mode<synchronous>, transform_indices = @transform_12, window_bounds = array<i64: 1, 128>}, {transform_indices = @transform_13, window_bounds = array<i64: 128, 128>}]} {
    %c0 = arith.constant 0 : index
    %c0_0 = arith.constant 0 : index
    %0 = vector.load %arg1[%c0, %c0_0] : memref<128x128xf32, #tpu.memory_space<vmem>>, vector<128x128xf32>
    %c0_1 = arith.constant 0 : index
    %c0_2 = arith.constant 0 : index
    %1 = vector.load %arg3[%c0_1, %c0_2] : memref<1x128xf32, #tpu.memory_space<vmem>>, vector<1x128xf32>
    %c0_3 = arith.constant 0 : index
    %c0_4 = arith.constant 0 : index
    %2 = vector.load %arg4[%c0_3, %c0_4] : memref<1x128xf32, #tpu.memory_space<vmem>>, vector<1x128xf32>
    %cst = arith.constant dense<0.000000e+00> : vector<128xf32>
    %3 = vector.multi_reduction <add>, %0, %cst [1] : vector<128x128xf32> to vector<128xf32>
    %4 = vector.shape_cast %3 : vector<128xf32> to vector<128x1xf32>
    %cst_5 = arith.constant 1.280000e+02 : f32
    %5 = vector.broadcast %cst_5 : f32 to vector<128x1xf32>
    %6 = arith.divf %4, %5 : vector<128x1xf32>
    %7 = vector.broadcast %6 : vector<128x1xf32> to vector<128x128xf32>
    %8 = arith.subf %0, %7 : vector<128x128xf32>
    %9 = arith.mulf %8, %8 : vector<128x128xf32>
    %cst_6 = arith.constant dense<0.000000e+00> : vector<128xf32>
    %10 = vector.multi_reduction <add>, %9, %cst_6 [1] : vector<128x128xf32> to vector<128xf32>
    %11 = vector.shape_cast %10 : vector<128xf32> to vector<128x1xf32>
    %cst_7 = arith.constant 1.280000e+02 : f32
    %12 = vector.broadcast %cst_7 : f32 to vector<128x1xf32>
    %13 = arith.divf %11, %12 : vector<128x1xf32>
    %14 = vector.broadcast %6 : vector<128x1xf32> to vector<128x128xf32>
    %15 = arith.subf %0, %14 : vector<128x128xf32>
    %cst_8 = arith.constant 9.99999974E-6 : f32
    %16 = vector.broadcast %cst_8 : f32 to vector<128x1xf32>
    %17 = arith.addf %13, %16 : vector<128x1xf32>
    %18 = math.rsqrt %17 : vector<128x1xf32>
    %19 = vector.broadcast %18 : vector<128x1xf32> to vector<128x128xf32>
    %20 = arith.mulf %15, %19 : vector<128x128xf32>
    %21 = vector.broadcast %1 : vector<1x128xf32> to vector<128x128xf32>
    %22 = arith.mulf %20, %21 : vector<128x128xf32>
    %23 = vector.broadcast %2 : vector<1x128xf32> to vector<128x128xf32>
    %24 = arith.addf %22, %23 : vector<128x128xf32>
    %25 = arith.truncf %24 : vector<128x128xf32> to vector<128x128xbf16>
    %c0_9 = arith.constant 0 : index
    %c0_10 = arith.constant 0 : index
    %26 = vector.load %arg5[%c0_9, %c0_10] : memref<128x384xbf16, #tpu.memory_space<vmem>>, vector<128x384xbf16>
    %cst_11 = arith.constant dense<0.000000e+00> : vector<128x384xf32>
    %27 = tpu.matmul %25, %26, %cst_11 {dimension_numbers = #tpu.dot_dimension_numbers<[1], [0], [0], [1], [0, 0, 1, 1], [], []>} : vector<128x128xbf16>, vector<128x384xbf16>, vector<128x384xf32> -> vector<128x384xf32>
    %28 = vector.extract_strided_slice %27 {offsets = [0, 0], sizes = [128, 128], strides = [1, 1]} : vector<128x384xf32> to vector<128x128xf32>
    %cst_12 = arith.constant 0.176776692 : f32
    %29 = vector.broadcast %cst_12 : f32 to vector<128x128xf32>
    %30 = arith.mulf %28, %29 : vector<128x128xf32>
    %31 = arith.truncf %30 : vector<128x128xf32> to vector<128x128xbf16>
    %32 = vector.extract_strided_slice %27 {offsets = [0, 128], sizes = [128, 128], strides = [1, 1]} : vector<128x384xf32> to vector<128x128xf32>
    %33 = arith.truncf %32 : vector<128x128xf32> to vector<128x128xbf16>
    %34 = vector.extract_strided_slice %27 {offsets = [0, 256], sizes = [128, 128], strides = [1, 1]} : vector<128x384xf32> to vector<128x128xf32>
    %35 = arith.truncf %34 : vector<128x128xf32> to vector<128x128xbf16>
    %c0_13 = arith.constant 0 : index
    %c0_14 = arith.constant 0 : index
    %36 = vector.load %arg2[%c0_13, %c0_14] : memref<128x128xf32, #tpu.memory_space<vmem>>, vector<128x128xf32>
    %c0_15 = arith.constant 0 : index
    %c0_16 = arith.constant 0 : index
    %37 = vector.load %arg6[%c0_15, %c0_16] : memref<128x128xbf16, #tpu.memory_space<vmem>>, vector<128x128xbf16>
    %cst_17 = arith.constant 0.000000e+00 : f32
    %38 = vector.broadcast %cst_17 : f32 to vector<128x128xf32>
    %39 = vector.extract_strided_slice %31 {offsets = [0, 0], sizes = [128, 32], strides = [1, 1]} : vector<128x128xbf16> to vector<128x32xbf16>
    %40 = vector.extract_strided_slice %33 {offsets = [0, 0], sizes = [128, 32], strides = [1, 1]} : vector<128x128xbf16> to vector<128x32xbf16>
    %41 = vector.extract_strided_slice %35 {offsets = [0, 0], sizes = [128, 32], strides = [1, 1]} : vector<128x128xbf16> to vector<128x32xbf16>
    %cst_18 = arith.constant dense<0.000000e+00> : vector<128x128xf32>
    %42 = tpu.matmul %39, %40, %cst_18 {dimension_numbers = #tpu.dot_dimension_numbers<[1], [1], [0], [0], [0, 0, 1, 0], [], []>} : vector<128x32xbf16>, vector<128x32xbf16>, vector<128x128xf32> -> vector<128x128xf32>
    %43 = arith.addf %42, %36 : vector<128x128xf32>
    %cst_19 = arith.constant dense<0xFF800000> : vector<128xf32>
    %44 = vector.multi_reduction <maximumf>, %43, %cst_19 [1] : vector<128x128xf32> to vector<128xf32>
    %45 = vector.shape_cast %44 : vector<128xf32> to vector<128x1xf32>
    %46 = vector.broadcast %45 : vector<128x1xf32> to vector<128x128xf32>
    %47 = arith.subf %43, %46 : vector<128x128xf32>
    %48 = math.exp %47 : vector<128x128xf32>
    %cst_20 = arith.constant dense<0.000000e+00> : vector<128xf32>
    %49 = vector.multi_reduction <add>, %48, %cst_20 [1] : vector<128x128xf32> to vector<128xf32>
    %50 = vector.shape_cast %49 : vector<128xf32> to vector<128x1xf32>
    %51 = tpu.reciprocal %50 {approx = true} : vector<128x1xf32> -> vector<128x1xf32>
    %52 = vector.broadcast %51 : vector<128x1xf32> to vector<128x128xf32>
    %53 = arith.mulf %48, %52 : vector<128x128xf32>
    %54 = arith.truncf %53 : vector<128x128xf32> to vector<128x128xbf16>
    %cst_21 = arith.constant dense<0.000000e+00> : vector<128x32xf32>
    %55 = tpu.matmul %54, %41, %cst_21 {dimension_numbers = #tpu.dot_dimension_numbers<[1], [0], [0], [1], [0, 0, 1, 1], [], []>} : vector<128x128xbf16>, vector<128x32xbf16>, vector<128x32xf32> -> vector<128x32xf32>
    %56 = arith.truncf %55 : vector<128x32xf32> to vector<128x32xbf16>
    %57 = vector.extract_strided_slice %37 {offsets = [0, 0], sizes = [32, 128], strides = [1, 1]} : vector<128x128xbf16> to vector<32x128xbf16>
    %cst_22 = arith.constant dense<0.000000e+00> : vector<128x128xf32>
    %58 = tpu.matmul %56, %57, %cst_22 {dimension_numbers = #tpu.dot_dimension_numbers<[1], [0], [0], [1], [0, 0, 1, 1], [], []>} : vector<128x32xbf16>, vector<32x128xbf16>, vector<128x128xf32> -> vector<128x128xf32>
    %59 = arith.addf %38, %58 : vector<128x128xf32>
    %60 = vector.extract_strided_slice %31 {offsets = [0, 32], sizes = [128, 32], strides = [1, 1]} : vector<128x128xbf16> to vector<128x32xbf16>
    %61 = vector.extract_strided_slice %33 {offsets = [0, 32], sizes = [128, 32], strides = [1, 1]} : vector<128x128xbf16> to vector<128x32xbf16>
    %62 = vector.extract_strided_slice %35 {offsets = [0, 32], sizes = [128, 32], strides = [1, 1]} : vector<128x128xbf16> to vector<128x32xbf16>
    %cst_23 = arith.constant dense<0.000000e+00> : vector<128x128xf32>
    %63 = tpu.matmul %60, %61, %cst_23 {dimension_numbers = #tpu.dot_dimension_numbers<[1], [1], [0], [0], [0, 0, 1, 0], [], []>} : vector<128x32xbf16>, vector<128x32xbf16>, vector<128x128xf32> -> vector<128x128xf32>
    %64 = arith.addf %63, %36 : vector<128x128xf32>
    %cst_24 = arith.constant dense<0xFF800000> : vector<128xf32>
    %65 = vector.multi_reduction <maximumf>, %64, %cst_24 [1] : vector<128x128xf32> to vector<128xf32>
    %66 = vector.shape_cast %65 : vector<128xf32> to vector<128x1xf32>
    %67 = vector.broadcast %66 : vector<128x1xf32> to vector<128x128xf32>
    %68 = arith.subf %64, %67 : vector<128x128xf32>
    %69 = math.exp %68 : vector<128x128xf32>
    %cst_25 = arith.constant dense<0.000000e+00> : vector<128xf32>
    %70 = vector.multi_reduction <add>, %69, %cst_25 [1] : vector<128x128xf32> to vector<128xf32>
    %71 = vector.shape_cast %70 : vector<128xf32> to vector<128x1xf32>
    %72 = tpu.reciprocal %71 {approx = true} : vector<128x1xf32> -> vector<128x1xf32>
    %73 = vector.broadcast %72 : vector<128x1xf32> to vector<128x128xf32>
    %74 = arith.mulf %69, %73 : vector<128x128xf32>
    %75 = arith.truncf %74 : vector<128x128xf32> to vector<128x128xbf16>
    %cst_26 = arith.constant dense<0.000000e+00> : vector<128x32xf32>
    %76 = tpu.matmul %75, %62, %cst_26 {dimension_numbers = #tpu.dot_dimension_numbers<[1], [0], [0], [1], [0, 0, 1, 1], [], []>} : vector<128x128xbf16>, vector<128x32xbf16>, vector<128x32xf32> -> vector<128x32xf32>
    %77 = arith.truncf %76 : vector<128x32xf32> to vector<128x32xbf16>
    %78 = vector.extract_strided_slice %37 {offsets = [32, 0], sizes = [32, 128], strides = [1, 1]} : vector<128x128xbf16> to vector<32x128xbf16>
    %cst_27 = arith.constant dense<0.000000e+00> : vector<128x128xf32>
    %79 = tpu.matmul %77, %78, %cst_27 {dimension_numbers = #tpu.dot_dimension_numbers<[1], [0], [0], [1], [0, 0, 1, 1], [], []>} : vector<128x32xbf16>, vector<32x128xbf16>, vector<128x128xf32> -> vector<128x128xf32>
    %80 = arith.addf %59, %79 : vector<128x128xf32>
    %81 = vector.extract_strided_slice %31 {offsets = [0, 64], sizes = [128, 32], strides = [1, 1]} : vector<128x128xbf16> to vector<128x32xbf16>
    %82 = vector.extract_strided_slice %33 {offsets = [0, 64], sizes = [128, 32], strides = [1, 1]} : vector<128x128xbf16> to vector<128x32xbf16>
    %83 = vector.extract_strided_slice %35 {offsets = [0, 64], sizes = [128, 32], strides = [1, 1]} : vector<128x128xbf16> to vector<128x32xbf16>
    %cst_28 = arith.constant dense<0.000000e+00> : vector<128x128xf32>
    %84 = tpu.matmul %81, %82, %cst_28 {dimension_numbers = #tpu.dot_dimension_numbers<[1], [1], [0], [0], [0, 0, 1, 0], [], []>} : vector<128x32xbf16>, vector<128x32xbf16>, vector<128x128xf32> -> vector<128x128xf32>
    %85 = arith.addf %84, %36 : vector<128x128xf32>
    %cst_29 = arith.constant dense<0xFF800000> : vector<128xf32>
    %86 = vector.multi_reduction <maximumf>, %85, %cst_29 [1] : vector<128x128xf32> to vector<128xf32>
    %87 = vector.shape_cast %86 : vector<128xf32> to vector<128x1xf32>
    %88 = vector.broadcast %87 : vector<128x1xf32> to vector<128x128xf32>
    %89 = arith.subf %85, %88 : vector<128x128xf32>
    %90 = math.exp %89 : vector<128x128xf32>
    %cst_30 = arith.constant dense<0.000000e+00> : vector<128xf32>
    %91 = vector.multi_reduction <add>, %90, %cst_30 [1] : vector<128x128xf32> to vector<128xf32>
    %92 = vector.shape_cast %91 : vector<128xf32> to vector<128x1xf32>
    %93 = tpu.reciprocal %92 {approx = true} : vector<128x1xf32> -> vector<128x1xf32>
    %94 = vector.broadcast %93 : vector<128x1xf32> to vector<128x128xf32>
    %95 = arith.mulf %90, %94 : vector<128x128xf32>
    %96 = arith.truncf %95 : vector<128x128xf32> to vector<128x128xbf16>
    %cst_31 = arith.constant dense<0.000000e+00> : vector<128x32xf32>
    %97 = tpu.matmul %96, %83, %cst_31 {dimension_numbers = #tpu.dot_dimension_numbers<[1], [0], [0], [1], [0, 0, 1, 1], [], []>} : vector<128x128xbf16>, vector<128x32xbf16>, vector<128x32xf32> -> vector<128x32xf32>
    %98 = arith.truncf %97 : vector<128x32xf32> to vector<128x32xbf16>
    %99 = vector.extract_strided_slice %37 {offsets = [64, 0], sizes = [32, 128], strides = [1, 1]} : vector<128x128xbf16> to vector<32x128xbf16>
    %cst_32 = arith.constant dense<0.000000e+00> : vector<128x128xf32>
    %100 = tpu.matmul %98, %99, %cst_32 {dimension_numbers = #tpu.dot_dimension_numbers<[1], [0], [0], [1], [0, 0, 1, 1], [], []>} : vector<128x32xbf16>, vector<32x128xbf16>, vector<128x128xf32> -> vector<128x128xf32>
    %101 = arith.addf %80, %100 : vector<128x128xf32>
    %102 = vector.extract_strided_slice %31 {offsets = [0, 96], sizes = [128, 32], strides = [1, 1]} : vector<128x128xbf16> to vector<128x32xbf16>
    %103 = vector.extract_strided_slice %33 {offsets = [0, 96], sizes = [128, 32], strides = [1, 1]} : vector<128x128xbf16> to vector<128x32xbf16>
    %104 = vector.extract_strided_slice %35 {offsets = [0, 96], sizes = [128, 32], strides = [1, 1]} : vector<128x128xbf16> to vector<128x32xbf16>
    %cst_33 = arith.constant dense<0.000000e+00> : vector<128x128xf32>
    %105 = tpu.matmul %102, %103, %cst_33 {dimension_numbers = #tpu.dot_dimension_numbers<[1], [1], [0], [0], [0, 0, 1, 0], [], []>} : vector<128x32xbf16>, vector<128x32xbf16>, vector<128x128xf32> -> vector<128x128xf32>
    %106 = arith.addf %105, %36 : vector<128x128xf32>
    %cst_34 = arith.constant dense<0xFF800000> : vector<128xf32>
    %107 = vector.multi_reduction <maximumf>, %106, %cst_34 [1] : vector<128x128xf32> to vector<128xf32>
    %108 = vector.shape_cast %107 : vector<128xf32> to vector<128x1xf32>
    %109 = vector.broadcast %108 : vector<128x1xf32> to vector<128x128xf32>
    %110 = arith.subf %106, %109 : vector<128x128xf32>
    %111 = math.exp %110 : vector<128x128xf32>
    %cst_35 = arith.constant dense<0.000000e+00> : vector<128xf32>
    %112 = vector.multi_reduction <add>, %111, %cst_35 [1] : vector<128x128xf32> to vector<128xf32>
    %113 = vector.shape_cast %112 : vector<128xf32> to vector<128x1xf32>
    %114 = tpu.reciprocal %113 {approx = true} : vector<128x1xf32> -> vector<128x1xf32>
    %115 = vector.broadcast %114 : vector<128x1xf32> to vector<128x128xf32>
    %116 = arith.mulf %111, %115 : vector<128x128xf32>
    %117 = arith.truncf %116 : vector<128x128xf32> to vector<128x128xbf16>
    %cst_36 = arith.constant dense<0.000000e+00> : vector<128x32xf32>
    %118 = tpu.matmul %117, %104, %cst_36 {dimension_numbers = #tpu.dot_dimension_numbers<[1], [0], [0], [1], [0, 0, 1, 1], [], []>} : vector<128x128xbf16>, vector<128x32xbf16>, vector<128x32xf32> -> vector<128x32xf32>
    %119 = arith.truncf %118 : vector<128x32xf32> to vector<128x32xbf16>
    %120 = vector.extract_strided_slice %37 {offsets = [96, 0], sizes = [32, 128], strides = [1, 1]} : vector<128x128xbf16> to vector<32x128xbf16>
    %cst_37 = arith.constant dense<0.000000e+00> : vector<128x128xf32>
    %121 = tpu.matmul %119, %120, %cst_37 {dimension_numbers = #tpu.dot_dimension_numbers<[1], [0], [0], [1], [0, 0, 1, 1], [], []>} : vector<128x32xbf16>, vector<32x128xbf16>, vector<128x128xf32> -> vector<128x128xf32>
    %122 = arith.addf %101, %121 : vector<128x128xf32>
    %c0_38 = arith.constant 0 : index
    %c0_39 = arith.constant 0 : index
    %123 = vector.load %arg7[%c0_38, %c0_39] : memref<1x128xf32, #tpu.memory_space<vmem>>, vector<1x128xf32>
    %124 = vector.broadcast %123 : vector<1x128xf32> to vector<128x128xf32>
    %125 = arith.addf %122, %124 : vector<128x128xf32>
    %126 = arith.addf %0, %125 : vector<128x128xf32>
    %c0_40 = arith.constant 0 : index
    %c0_41 = arith.constant 0 : index
    %127 = vector.load %arg8[%c0_40, %c0_41] : memref<1x128xf32, #tpu.memory_space<vmem>>, vector<1x128xf32>
    %c0_42 = arith.constant 0 : index
    %c0_43 = arith.constant 0 : index
    %128 = vector.load %arg9[%c0_42, %c0_43] : memref<1x128xf32, #tpu.memory_space<vmem>>, vector<1x128xf32>
    %cst_44 = arith.constant dense<0.000000e+00> : vector<128xf32>
    %129 = vector.multi_reduction <add>, %126, %cst_44 [1] : vector<128x128xf32> to vector<128xf32>
    %130 = vector.shape_cast %129 : vector<128xf32> to vector<128x1xf32>
    %cst_45 = arith.constant 1.280000e+02 : f32
    %131 = vector.broadcast %cst_45 : f32 to vector<128x1xf32>
    %132 = arith.divf %130, %131 : vector<128x1xf32>
    %133 = vector.broadcast %132 : vector<128x1xf32> to vector<128x128xf32>
    %134 = arith.subf %126, %133 : vector<128x128xf32>
    %135 = arith.mulf %134, %134 : vector<128x128xf32>
    %cst_46 = arith.constant dense<0.000000e+00> : vector<128xf32>
    %136 = vector.multi_reduction <add>, %135, %cst_46 [1] : vector<128x128xf32> to vector<128xf32>
    %137 = vector.shape_cast %136 : vector<128xf32> to vector<128x1xf32>
    %cst_47 = arith.constant 1.280000e+02 : f32
    %138 = vector.broadcast %cst_47 : f32 to vector<128x1xf32>
    %139 = arith.divf %137, %138 : vector<128x1xf32>
    %140 = vector.broadcast %132 : vector<128x1xf32> to vector<128x128xf32>
    %141 = arith.subf %126, %140 : vector<128x128xf32>
    %cst_48 = arith.constant 9.99999974E-6 : f32
    %142 = vector.broadcast %cst_48 : f32 to vector<128x1xf32>
    %143 = arith.addf %139, %142 : vector<128x1xf32>
    %144 = math.rsqrt %143 : vector<128x1xf32>
    %145 = vector.broadcast %144 : vector<128x1xf32> to vector<128x128xf32>
    %146 = arith.mulf %141, %145 : vector<128x128xf32>
    %147 = vector.broadcast %127 : vector<1x128xf32> to vector<128x128xf32>
    %148 = arith.mulf %146, %147 : vector<128x128xf32>
    %149 = vector.broadcast %128 : vector<1x128xf32> to vector<128x128xf32>
    %150 = arith.addf %148, %149 : vector<128x128xf32>
    %151 = arith.truncf %150 : vector<128x128xf32> to vector<128x128xbf16>
    %c0_49 = arith.constant 0 : index
    %c0_50 = arith.constant 0 : index
    %152 = vector.load %arg10[%c0_49, %c0_50] : memref<128x512xbf16, #tpu.memory_space<vmem>>, vector<128x512xbf16>
    %cst_51 = arith.constant dense<0.000000e+00> : vector<128x512xf32>
    %153 = tpu.matmul %151, %152, %cst_51 {dimension_numbers = #tpu.dot_dimension_numbers<[1], [0], [0], [1], [0, 0, 1, 1], [], []>} : vector<128x128xbf16>, vector<128x512xbf16>, vector<128x512xf32> -> vector<128x512xf32>
    %c0_52 = arith.constant 0 : index
    %c0_53 = arith.constant 0 : index
    %154 = vector.load %arg11[%c0_52, %c0_53] : memref<1x512xf32, #tpu.memory_space<vmem>>, vector<1x512xf32>
    %155 = vector.broadcast %154 : vector<1x512xf32> to vector<128x512xf32>
    %156 = arith.addf %153, %155 : vector<128x512xf32>
    %cst_54 = arith.constant 0.000000e+00 : f32
    %157 = vector.broadcast %cst_54 : f32 to vector<128x512xf32>
    %158 = arith.maximumf %156, %157 : vector<128x512xf32>
    %159 = arith.truncf %158 : vector<128x512xf32> to vector<128x512xbf16>
    %c0_55 = arith.constant 0 : index
    %c0_56 = arith.constant 0 : index
    %160 = vector.load %arg12[%c0_55, %c0_56] : memref<512x128xbf16, #tpu.memory_space<vmem>>, vector<512x128xbf16>
    %cst_57 = arith.constant dense<0.000000e+00> : vector<128x128xf32>
    %161 = tpu.matmul %159, %160, %cst_57 {dimension_numbers = #tpu.dot_dimension_numbers<[1], [0], [0], [1], [0, 0, 1, 1], [], []>} : vector<128x512xbf16>, vector<512x128xbf16>, vector<128x128xf32> -> vector<128x128xf32>
    %c0_58 = arith.constant 0 : index
    %c0_59 = arith.constant 0 : index
    %162 = vector.load %arg13[%c0_58, %c0_59] : memref<1x128xf32, #tpu.memory_space<vmem>>, vector<1x128xf32>
    %163 = vector.broadcast %162 : vector<1x128xf32> to vector<128x128xf32>
    %164 = arith.addf %161, %163 : vector<128x128xf32>
    %165 = arith.addf %126, %164 : vector<128x128xf32>
    %c0_60 = arith.constant 0 : index
    %c0_61 = arith.constant 0 : index
    %166 = vector.load %arg14[%c0_60, %c0_61] : memref<128x128xf32, #tpu.memory_space<vmem>>, vector<128x128xf32>
    tpu.vector_store %arg14[%c0_60, %c0_61], %165 {strides = array<i32>} : memref<128x128xf32, #tpu.memory_space<vmem>>, vector<128x128xf32>,
    return
  }
  func.func @transform_0(%arg0: i32) -> (i32, i32) {
    %c0_i32 = arith.constant 0 : i32
    %c0_i32_0 = arith.constant 0 : i32
    return %arg0, %c0_i32 : i32, i32
  }
  func.func @transform_1(%arg0: i32) -> (i32, i32) {
    %c0_i32 = arith.constant 0 : i32
    %c0_i32_0 = arith.constant 0 : i32
    %c0_i32_1 = arith.constant 0 : i32
    return %c0_i32, %c0_i32_0 : i32, i32
  }
  func.func @transform_2(%arg0: i32) -> (i32, i32) {
    %c0_i32 = arith.constant 0 : i32
    %c0_i32_0 = arith.constant 0 : i32
    %c0_i32_1 = arith.constant 0 : i32
    return %c0_i32, %c0_i32_0 : i32, i32
  }
  func.func @transform_3(%arg0: i32) -> (i32, i32) {
    %c0_i32 = arith.constant 0 : i32
    %c0_i32_0 = arith.constant 0 : i32
    %c0_i32_1 = arith.constant 0 : i32
    return %c0_i32, %c0_i32_0 : i32, i32
  }
  func.func @transform_4(%arg0: i32) -> (i32, i32) {
    %c0_i32 = arith.constant 0 : i32
    %c0_i32_0 = arith.constant 0 : i32
    %c0_i32_1 = arith.constant 0 : i32
    return %c0_i32, %c0_i32_0 : i32, i32
  }
  func.func @transform_5(%arg0: i32) -> (i32, i32) {
    %c0_i32 = arith.constant 0 : i32
    %c0_i32_0 = arith.constant 0 : i32
    %c0_i32_1 = arith.constant 0 : i32
    return %c0_i32, %c0_i32_0 : i32, i32
  }
  func.func @transform_6(%arg0: i32) -> (i32, i32) {
    %c0_i32 = arith.constant 0 : i32
    %c0_i32_0 = arith.constant 0 : i32
    %c0_i32_1 = arith.constant 0 : i32
    return %c0_i32, %c0_i32_0 : i32, i32
  }
  func.func @transform_7(%arg0: i32) -> (i32, i32) {
    %c0_i32 = arith.constant 0 : i32
    %c0_i32_0 = arith.constant 0 : i32
    %c0_i32_1 = arith.constant 0 : i32
    return %c0_i32, %c0_i32_0 : i32, i32
  }
  func.func @transform_8(%arg0: i32) -> (i32, i32) {
    %c0_i32 = arith.constant 0 : i32
    %c0_i32_0 = arith.constant 0 : i32
    %c0_i32_1 = arith.constant 0 : i32
    return %c0_i32, %c0_i32_0 : i32, i32
  }
  func.func @transform_9(%arg0: i32) -> (i32, i32) {
    %c0_i32 = arith.constant 0 : i32
    %c0_i32_0 = arith.constant 0 : i32
    %c0_i32_1 = arith.constant 0 : i32
    return %c0_i32, %c0_i32_0 : i32, i32
  }
  func.func @transform_10(%arg0: i32) -> (i32, i32) {
    %c0_i32 = arith.constant 0 : i32
    %c0_i32_0 = arith.constant 0 : i32
    %c0_i32_1 = arith.constant 0 : i32
    return %c0_i32, %c0_i32_0 : i32, i32
  }
  func.func @transform_11(%arg0: i32) -> (i32, i32) {
    %c0_i32 = arith.constant 0 : i32
    %c0_i32_0 = arith.constant 0 : i32
    %c0_i32_1 = arith.constant 0 : i32
    return %c0_i32, %c0_i32_0 : i32, i32
  }
  func.func @transform_12(%arg0: i32) -> (i32, i32) {
    %c0_i32 = arith.constant 0 : i32
    %c0_i32_0 = arith.constant 0 : i32
    %c0_i32_1 = arith.constant 0 : i32
    return %c0_i32, %c0_i32_0 : i32, i32
  }
  func.func @transform_13(%arg0: i32) -> (i32, i32) {
    %c0_i32 = arith.constant 0 : i32
    %c0_i32_0 = arith.constant 0 : i32
    return %arg0, %c0_i32 : i32, i32
  }
}

</mosaic_0001>

<bundles_post_ra>
// kernel: tpu_custom_call.1
= control target key start
LH: loop header
LB: loop body
LE: loop exit
PB: predicated region body
PF: predicated region fallthrough
CT: control target
= control target key end

     0   :  { %s8919_s0 = inlined_call_operand.hbm [shape: f32[256,128], index: 0, kind: input, shape index: {}]   ;;  %s8920_s1 = inlined_call_operand.hbm [shape: f32[128,128], index: 1, kind: input, shape index: {}]   ;;  %s8921_s2 = inlined_call_operand.vmem [shape: f32[1,128], index: 2, kind: input, shape index: {}]   ;;  %s8922_s3 = inlined_call_operand.vmem [shape: f32[1,128], index: 3, kind: input, shape index: {}]   ;;  %s8923_s4 = inlined_call_operand.hbm [shape: bf16[128,384], index: 4, kind: input, shape index: {}]   ;;  %s8924_s5 = inlined_call_operand.hbm [shape: bf16[128,128], index: 5, kind: input, shape index: {}]   ;;  %s8925_s6 = inlined_call_operand.vmem [shape: f32[1,128], index: 6, kind: input, shape index: {}]   ;;  %s8926_s7 = inlined_call_operand.vmem [shape: f32[1,128], index: 7, kind: input, shape index: {}]   ;;  %s8927_s8 = inlined_call_operand.vmem [shape: f32[1,128], index: 8, kind: input, shape index: {}]   ;;  %s8928_s9 = inlined_call_operand.hbm [shape: bf16[128,512], index: 9, kind: input, shape index: {}]   ;;  %s8929_s10 = inlined_call_operand.vmem [shape: f32[1,512], index: 10, kind: input, shape index: {}]   ;;  %s8930_s11 = inlined_call_operand.hbm [shape: bf16[512,128], index: 11, kind: input, shape index: {}]   ;;  %s8931_s12 = inlined_call_operand.vmem [shape: f32[1,128], index: 12, kind: input, shape index: {}]   ;;  %s8932_s13 = inlined_call_operand.hbm [shape: f32[256,128], index: 13, kind: output, shape index: {}]  }
   0x1   :  { %8966 = sst [smem:[#allocation33_spill]] %s8920_s1 }
   0x2   :  { %8967 = sst [smem:[#allocation34_spill]] %s8923_s4 }
   0x3   :  { %8968 = sst [smem:[#allocation35_spill]] %s8924_s5 }
   0x4   :  { %8969 = sst [smem:[#allocation36_spill]] %s8928_s9 }
   0x5   :  { %8970 = sst [smem:[#allocation37_spill]] %s8930_s11 }
   0x6   :  { %8971 = sst [smem:[#allocation38_spill]] %s8932_s13 }
   0x7   :  { %18 = vsyncpa [#allocation3], 0 }
   0x8   :  { %20 = vsyncpa [#allocation3 + $0x1], 0 }
   0x9   :  { %21 = vsyncpa [#allocation6], 0 }
   0xa   :  { %22 = vsyncpa [#allocation9], 0 }
   0xb   :  { %23 = vsyncpa [#allocation12], 0 }
   0xc   :  { %24 = vsyncpa [#allocation4], 0 }
   0xd   :  { %26 = vsyncpa [#allocation4 + $0x1], 0  ;;  %s6832_s25 = smov 0   ;;  %s6834_s26 = smov 0  }
   0xe   :  { %s6836_s27 = smov 0   ;;  %s6838_s28 = smov 0  }
   0xf LB: > { %s6741_s29 = smov [#allocation5]   ;;  %s6853_s14 = sadd.s32 4294967295, %s6739_s28   ;;  %s6739_s28 = sphi %s6838_s28, %s9056_s28   ;;  %s6735_s27 = sphi %s6836_s27, %s9055_s27   ;;  %s6731_s26 = sphi %s6834_s26, %s9054_s26   ;;  %s6727_s25 = sphi %s6832_s25, %s9053_s25  }
  0x10   : > { %s353_s30 = sshll.u32 %s6741_s29, 4  ;;  %p5019_p0 = scmp.ge.s32.totalorder %s6739_s28, 1  ;;  %s354_s30 = int_to_ptr.vmem [resolvable:$true] %s353_s30 }
  0x11   : > { %p8937_p1 = scmp.eq.s32.totalorder %s6853_s14, 0  ;;  %p341_p2 = scmp.lt.s32.totalorder %s6739_s28, 3 }
  0x12   : > { %s6742_s16 = smov [#allocation8]   ;;  %s6743_s19 = smov [#allocation7]  }
  0x13   : > { %p6858_p3 = pnand %p5019_p0, %p341_p2  ;;  %s385_s17 = sshll.u32 %s6742_s16, 4  ;;  %s6871_s17 = int_to_ptr.vmem [resolvable:$true] %s385_s17 }
  0x14   : > { %s6873_s20 = sshll.u32 %s6743_s19, 4  ;;  %s6516_s22 = scalar_lea.vmem %s354_s30, 2048  ;;  %s373_s20 = int_to_ptr.vmem [resolvable:$true] %s6873_s20 }
  0x15   : > { %s8972_s15 = scalar_select %p6858_p3, 1, 0 }
  0x16   : > { %p5946_p5 = pneg %p6858_p3  ;;  %p6517_p8 = scmp.ne.s32.totalorder %s354_s30, %s6516_s22 }
  0x17   : > { %p6524_p11 = scmp.lt.s32.totalorder %s354_s30, %s354_s30  ;;  %p6525_p12 = scmp.lt.s32.totalorder %s6516_s22, %s6516_s22 }
  0x18   : > { %p6867_p6 = pnand %p5946_p5, %p8937_p1 }
  0x19   : > { %p6526_p13 = por %p6525_p12, %p6524_p11 }
  0x1a   : > { %p6877_p7 = pneg %p6867_p6 }
  0x1c   : > { %p6519_p9 = pnand %p6517_p8, %p6877_p7 }
  0x1e   : > { %p6520_p10 = pneg %p6519_p9 }
  0x20   : > { %p6527_p0 = pnand %p6526_p13, %p6520_p10 }
  0x22   : > { %6530 = shalt.err (!%p6527_p0)
}
  0x23   : > { %s8934_s23 = smov 128   ;;  %s8935_s24 = smov 8  }
  0x24   : > { %s8975_s1 = sld [smem:[#allocation33_spill]]  ;;  %s6542_s19 = scalar_lea.vmem %s6871_s17, 1024 }
  0x25   : > { %p6543_p2 = scmp.ne.s32.totalorder %s6871_s17, %s6542_s19  ;;  %p6550_p9 = scmp.lt.s32.totalorder %s6871_s17, %s6871_s17 }
  0x26   : > { %p6551_p10 = scmp.lt.s32.totalorder %s6542_s19, %s6542_s19 }
  0x27   : > { %p6545_p5 = pnand %p6543_p2, %p6877_p7 }
  0x28   : > { %p6552_p11 = por %p6551_p10, %p6550_p9 }
  0x29   : > { %p6546_p8 = pneg %p6545_p5 }
  0x2a   : > { %5949 = dma.hbm_to_vmem [thread:$0]  (!%p6867_p6), %s8975_s1, 2048, %s354_s30, [#allocation6], %s8934_s23, %s8934_s23, %s8935_s24  }
  0x2b   : > { %p6553_p12 = pnand %p6552_p11, %p6546_p8 }
  0x2d   : > { %6556 = shalt.err (!%p6553_p12)
}
  0x2e   : > { %s8936_s22 = smov 64   ;;  %s6747_s13 = smov 4  }
  0x2f   : > { %s8976_s5 = sld [smem:[#allocation35_spill]]  ;;  %s6568_s16 = scalar_lea.vmem %s373_s20, 3072 }
  0x30   : > { %p6569_p13 = scmp.ne.s32.totalorder %s373_s20, %s6568_s16  ;;  %p6576_p5 = scmp.lt.s32.totalorder %s373_s20, %s373_s20 }
  0x31   : > { %p6577_p8 = scmp.lt.s32.totalorder %s6568_s16, %s6568_s16 }
  0x32   : > { %p6571_p0 = pnand %p6569_p13, %p6877_p7 }
  0x33   : > { %p6578_p9 = por %p6577_p8, %p6576_p5 }
  0x34   : > { %p6572_p2 = pneg %p6571_p0 }
  0x35   : > { %5955 = dma.hbm_to_vmem [thread:$0]  (!%p6867_p6), %s8976_s5, 1024, %s6871_s17, [#allocation9], %s8936_s22, %s8936_s22, %s6747_s13  }
  0x36   : > { %p6579_p10 = pnand %p6578_p9, %p6572_p2 }
  0x38   : > { %6582 = shalt.err (!%p6579_p10)
}
  0x39   : > { %s6748_s19 = smov 192   ;;  %s6749_s23 = smov 12  }
  0x3a   : > { %s8977_s4 = sld [smem:[#allocation34_spill]]  ;;  %s6750_s17 = smov [#allocation10]  }
  0x3b   : > { %s407_s30 = sshll.u32 %s6750_s17, 4  ;;  %s408_s30 = int_to_ptr.vmem [resolvable:$true] %s407_s30 }
  0x3c   : > { %s6594_s29 = scalar_lea.vmem %s408_s30, 4096  ;;  %p6602_p0 = scmp.lt.s32.totalorder %s408_s30, %s408_s30 }
  0x3d   : > { %p6595_p11 = scmp.ne.s32.totalorder %s408_s30, %s6594_s29  ;;  %p6603_p2 = scmp.lt.s32.totalorder %s6594_s29, %s6594_s29 }
  0x3f   : > { %p6597_p12 = pnand %p6595_p11, %p6877_p7  ;;  %p6604_p5 = por %p6603_p2, %p6602_p0 }
  0x40   : > { %5952 = dma.hbm_to_vmem [thread:$0]  (!%p6867_p6), %s8977_s4, 3072, %s373_s20, [#allocation6], %s6748_s19, %s6748_s19, %s6749_s23  }
  0x41   : > { %p6598_p13 = pneg %p6597_p12 }
  0x43   : > { %p6605_p8 = pnand %p6604_p5, %p6598_p13 }
  0x45   : > { %6608 = shalt.err (!%p6605_p8)
}
  0x46   : > { %s6751_s16 = smov 256   ;;  %s6752_s22 = smov 16  }
  0x47   : > { %s8978_s9 = sld [smem:[#allocation36_spill]]  ;;  %s6753_s23 = smov [#allocation11]  }
  0x48   : > { %s423_s24 = sshll.u32 %s6753_s23, 4  ;;  %s424_s24 = int_to_ptr.vmem [resolvable:$true] %s423_s24 }
  0x49   : > { %s6620_s19 = scalar_lea.vmem %s424_s24, 4096  ;;  %p6628_p12 = scmp.lt.s32.totalorder %s424_s24, %s424_s24 }
  0x4a   : > { %p6621_p9 = scmp.ne.s32.totalorder %s424_s24, %s6620_s19  ;;  %p6629_p13 = scmp.lt.s32.totalorder %s6620_s19, %s6620_s19 }
  0x4c   : > { %p6623_p10 = pnand %p6621_p9, %p6877_p7  ;;  %p6630_p0 = por %p6629_p13, %p6628_p12 }
  0x4d   : > { %5958 = dma.hbm_to_vmem [thread:$0]  (!%p6867_p6), %s8978_s9, 4096, %s408_s30, [#allocation9], %s6751_s16, %s6751_s16, %s6752_s22  }
  0x4e   : > { %p6624_p11 = pneg %p6623_p10 }
  0x50   : > { %p6631_p2 = pnand %p6630_p0, %p6624_p11 }
  0x52   : > { %6634 = shalt.err (!%p6631_p2)
}
  0x53   : > { %s8979_s17 = smov 64   ;;  %s8980_s11 = sld [smem:[#allocation37_spill]] }
  0x54   : > { %s5018_s18 = sadd.s32 4294967294, %s6739_s28   ;;  %s6933_s21 = sadd.s32 1, %s6739_s28  }
  0x55   : > { %s39_s30 = sadd.s32 1, %s6735_s27  ;;  %s36_s16 = ssub.s32 %s6739_s28, %s6933_s21 }
  0x56   : > { %p46_p7 = scmp.ne.s32.totalorder %s6735_s27, %s6731_s26  ;;  %p37_p5 = scmp.eq.s32.totalorder %s36_s16, 0 }
  0x57   : > { %p47_p8 = scmp.eq.s32.totalorder %s6739_s28, 0  ;;  %p52_p9 = scmp.ne.s32.totalorder %s6731_s26, %s6727_s25 }
  0x58   : > { %p328_p10 = scmp.eq.s32.totalorder %s6853_s14, 1  ;;  %p334_p13 = scmp.eq.s32.totalorder %s5018_s18, 1 }
  0x59   : > { %5961 = dma.hbm_to_vmem [thread:$0]  (!%p6867_p6), %s8980_s11, 4096, %s424_s24, [#allocation12], %s8979_s17, %s8979_s17, %s6747_s13  }
  0x5a   : > { %s6945_s1 = scalar_select %p37_p5, %s6735_s27, %s39_s30  }
  0x5b   : > { %p48_p11 = por %p47_p8, %p46_p7  ;;  %p6949_p12 = por %p8937_p1, %p52_p9 }
  0x5c   : > { %8981 = sst [smem:[#allocation19_spill]] %s6945_s1  ;;  %p6953_p6 = por %p328_p10, %p46_p7 }
  0x5d   : > { %s8982_s20 = scalar_select %p6949_p12, 1, 0 }
  0x5e   : > { %s8983_s13 = scalar_select %p6953_p6, 1, 0 }
  0x5f   : > { %p5975_p0 = scmp.lt.s32.totalorder %s6739_s28, 2  ;;  %s440_s23 = sand.u32 1, %s6735_s27  }
  0x60   : > { %p6959_p2 = por %p334_p13, %p52_p9  ;;  %s5026_s19 = sshll.u32 %s440_s23, 7 }
  0x61   : > { %s5208_s17 = sshll.u32 %s6739_s28, 11  ;;  %s444_s16 = scalar_lea.vmem [#allocation2], %s5026_s19 }
  0x62   : > { %s8984_s24 = scalar_select %p6959_p2, 1, 0 }
  0x63   : > { %s6967_s30 = scalar_lea.hbm %s8919_s0, %s5208_s17  ;;  %s451_s4 = sshll.u32 %s444_s16, 4  ;;  %s6973_s4 = int_to_ptr.vmem [resolvable:$true] %s451_s4 }
  0x64   : > { %p6969_p7 = pnand %p5975_p0, %p48_p11  ;;  %s6975_s5 = scalar_lea.sflag [#allocation3], %s440_s23 }
  0x65   : > { %s6635_s9 = scalar_lea.hbm %s6967_s30, 2048  ;;  %s6640_s19 = scalar_lea.hbm %s8919_s0, 4096 }
  0x66   : > { %p6636_p5 = scmp.ne.s32.totalorder %s6967_s30, %s6635_s9  ;;  %p6637_p8 = pneg %p6969_p7 }
  0x67   : > { %p6641_p11 = scmp.lt.s32.totalorder %s6967_s30, %s8919_s0  ;;  %p6642_p13 = scmp.lt.s32.totalorder %s6640_s19, %s6635_s9 }
  0x68   : > { %p6638_p9 = pnand %p6637_p8, %p6636_p5 }
  0x69   : > { %p6643_p0 = por %p6642_p13, %p6641_p11 }
  0x6a   : > { %p6639_p10 = pneg %p6638_p9 }
  0x6c   : > { %p6644_p4 = pnand %p6643_p0, %p6639_p10 }
  0x6e   : > { %6647 = shalt.err (!%p6644_p4)
}
  0x6f   : > { %s6648_s23 = scalar_lea.vmem %s6973_s4, 2048  ;;  %s6754_s11 = smov [#allocation2]  }
  0x70   : > { %p6649_p1 = scmp.ne.s32.totalorder %s6973_s4, %s6648_s23  ;;  %s6653_s1 = sshll.u32 %s6754_s11, 4  ;;  %s6654_s1 = int_to_ptr.vmem [resolvable:$false] %s6653_s1 }
  0x71   : > { %s6655_s17 = scalar_lea.vmem %s6654_s1, 4096  ;;  %p6656_p9 = scmp.lt.s32.totalorder %s6973_s4, %s6654_s1 }
  0x72   : > { %p6651_p2 = pnand %p6649_p1, %p6637_p8  ;;  %p6657_p6 = scmp.lt.s32.totalorder %s6655_s17, %s6648_s23 }
  0x74   : > { %p6652_p5 = pneg %p6651_p2  ;;  %p6658_p12 = por %p6657_p6, %p6656_p9 }
  0x76   : > { %p6659_p3 = pnand %p6658_p12, %p6652_p5 }
  0x78   : > { %6662 = shalt.err (!%p6659_p3)
}
  0x79   : > { %s8986_s9 = smov 8   ;;  %s8987_s29 = smov 128  }
  0x7a   : > { %5965 = dma.hbm_to_vmem [thread:$0]  (!%p6969_p7), %s6967_s30, 2048, %s6973_s4, %s6975_s5, %s8987_s29, %s8987_s29, %s8986_s9  }
  0x7b   : > { %p8988_p1 = scmp.ne.s32.totalorder %s8972_s15, 0 }
  0x7d   : > { %463 = sbr.rel (%p8988_p1) target bundleno = 4198 (0x1066), region = 72 }
  0x82   : > { %s7002_s11 = sand.u32 1, %s6731_s26   ;;  %p8989_p3 = scmp.ne.s32.totalorder %s8982_s20, 0 }
  0x83   : > { %s5030_s1 = sshll.u32 %s7002_s11, 7  ;;  %s466_s19 = scalar_lea.sflag [#allocation3], %s7002_s11 }
  0x84   : > { %s7008_s18 = scalar_lea.vmem [#allocation2], %s5030_s1 }
  0x85   : > { %6706 = dma.done.wait (%p8989_p3), %s466_s19, 2048  }
  0x86   : > { %6708 = vsyncadd (%p8989_p3), %s466_s19, 4294965248  ;;  %p8990_p4 = scmp.eq.s32.totalorder %s6853_s14, 0 }
  0x88   : > { %6710 = dma.done.wait (%p8990_p4), [#allocation6], 5120   ;;  %p8991_p12 = pmov %p8990_p4 }
  0x89   : > { %p8992_p6 = pmov %p8990_p4 }
  0x8a   : > { %6712 = vsyncadd (%p8991_p12), [#allocation6], 4294962176 }
  0x8b   : > { %6714 = dma.done.wait (%p8992_p6), [#allocation9], 5120   ;;  %p8993_p2 = pmov %p8990_p4 }
  0x8d   : > { %6716 = vsyncadd (%p8993_p2), [#allocation9], 4294962176  ;;  %p8994_p7 = pmov %p8993_p2 }
  0x8e   : > { %p8995_p8 = pmov %p8993_p2 }
  0x8f   : > { %6718 = dma.done.wait (%p8994_p7), [#allocation12], 4096  }
  0x90   : > { %6720 = vsyncadd (%p8995_p8), [#allocation12], 4294963200  ;;  %v535_v0 = vld [vmem:[%s7008_s18] sm:$0xff]  ;;  %v537_v1 = vld [vmem:[%s7008_s18 + $0x10] sm:$0xff]  ;;  %vm1224_vm0 = vcmask 261120   ;;  %s6756_s30 = smov 96  }
  0x91   : > { %553 = vadd.xlane.f32.xlu0 %v535_v0  ;;  %557 = vadd.xlane.f32.xlu1 %v537_v1  ;;  %v536_v2 = vld [vmem:[%s7008_s18 + $0x8] sm:$0xff]  ;;  %v538_v3 = vld [vmem:[%s7008_s18 + $0x18] sm:$0xff]  ;;  %v539_v4 = vld [vmem:[%s7008_s18 + $0x20] sm:$0xff]  ;;  %s6757_s22 = smov 64   ;;  %s6758_s16 = smov 32  }
  0x92   : > { %v540_v5 = vld [vmem:[%s7008_s18 + $0x28] sm:$0xff]  ;;  %v541_v6 = vld [vmem:[%s7008_s18 + $0x30] sm:$0xff]  ;;  %v542_v7 = vld [vmem:[%s7008_s18 + $0x38] sm:$0xff]  ;;  %s9048_s17 = sld [smem:[#allocation38_spill]]  ;;  %s4884_s29 = scalar_lea.sflag [#allocation4], %s7002_s11 }
  0x93   : > { %v7035_v8 = vld [vmem:[%s7008_s18 + $0x40] sm:$0xff]  ;;  %v7038_v9 = vld [vmem:[%s7008_s18 + $0x48] sm:$0xff]  ;;  %v7041_v10 = vld [vmem:[%s7008_s18 + $0x50] sm:$0xff]  ;;  %p9049_p11 = scmp.ne.s32.totalorder %s8983_s13, 0 }
  0x94   : > { %v7044_v11 = vld [vmem:[%s7008_s18 + $0x58] sm:$0xff]  ;;  %v7049_v12 = vld [vmem:[%s7008_s18 + $0x60] sm:$0xff]  ;;  %v7052_v13 = vld [vmem:[%s7008_s18 + $0x68] sm:$0xff] }
  0x95   : > { %555 = vadd.xlane.f32.xlu0 %v536_v2  ;;  %559 = vadd.xlane.f32.xlu1 %v538_v3  ;;  %v7057_v14 = vld [vmem:[%s7008_s18 + $0x70] sm:$0xff]  ;;  %v7060_v15 = vld [vmem:[%s7008_s18 + $0x78] sm:$0xff] }
  0x96   : > { %v6033_v16 = vld [vmem:[#allocation7 + $0xac] ss:$12 sps:$4 sm:$0xff]   ;;  %v6035_v17 = vld [vmem:[#allocation7 + $0xa8] ss:$12 sps:$4 sm:$0xff]   ;;  %v6038_v54 = vld [vmem:[#allocation7 + $0xb0] ss:$12 sps:$4 sm:$0xff]  }
  0x97   : > { %942 = vmatprep.subr.bf16.mxu0 %v6033_v16  ;;  %v6036_v53 = vld [vmem:[#allocation7 + $0x94] ss:$12 sps:$4 sm:$0xff]   ;;  %v6039_v55 = vld [vmem:[#allocation7 + $0x90] ss:$12 sps:$4 sm:$0xff]   ;;  %5522 = vmatprep.subr.bf16.mxu1 %v6038_v54 }
  0x98   : > { %943 = vmatpush1.bf16.msra.mxu0 %v6035_v17  ;;  %5523 = vmatpush3.bf16.msra.mxu1 %v6038_v54  ;;  %v6044_v17 = vld [vmem:[#allocation7 + $0x64] ss:$12 sps:$4 sm:$0xff]  }
  0x99   : > { %561 = vadd.xlane.f32.xlu0 %v539_v4  ;;  %563 = vadd.xlane.f32.xlu1 %v540_v5 }
  0x9a   : > { %944 = vmatprep.subr.bf16.mxu0 %v6036_v53 }
  0x9c   : > { %945 = vmatpush1.bf16.msra.mxu0 %v6039_v55 }
  0x9d   : > { %565 = vadd.xlane.f32.xlu0 %v541_v6  ;;  %567 = vadd.xlane.f32.xlu1 %v542_v7 }
  0xa1   : > { %569 = vadd.xlane.f32.xlu0 %v7035_v8  ;;  %571 = vadd.xlane.f32.xlu1 %v7038_v9 }
  0xa5   : > { %573 = vadd.xlane.f32.xlu0 %v7041_v10  ;;  %575 = vadd.xlane.f32.xlu1 %v7044_v11 }
  0xa9   : > { %577 = vadd.xlane.f32.xlu0 %v7049_v12  ;;  %579 = vadd.xlane.f32.xlu1 %v7052_v13 }
  0xad   : > { %581 = vadd.xlane.f32.xlu0 %v7057_v14  ;;  %583 = vadd.xlane.f32.xlu1 %v7060_v15 }
 0x11a   : > { %v554_v18 = vpop.xlane.xlu0 %553  ;;  %v558_v19 = vpop.xlane.xlu1 %557 }
 0x11b   : > { %v586_v20 = vmul.f32 0.0078125, %v554_v18  ;;  %v588_v21 = vmul.f32 0.0078125, %v558_v19  ;;  %v6046_v18 = vld [vmem:[#allocation7 + $0x80] ss:$12 sps:$4 sm:$0xff]  }
 0x11d   : > { %v7066_v22 = vsub.f32 %v535_v0, %v586_v20  ;;  %v7068_v23 = vsub.f32 %v537_v1, %v588_v21  ;;  %v6040_v0 = vld [vmem:[#allocation7 + $0x7c] ss:$12 sps:$4 sm:$0xff]   ;;  %v6042_v1 = vld [vmem:[#allocation7 + $0x98] ss:$12 sps:$4 sm:$0xff]   ;;  %v6047_v20 = vld [vmem:[#allocation7 + $0x60] ss:$12 sps:$4 sm:$0xff]  }
 0x11e   : > { %v556_v24 = vpop.xlane.xlu0 %555  ;;  %v560_v25 = vpop.xlane.xlu1 %559  ;;  %946 = vmatprep.subr.bf16.mxu0 %v6040_v0  ;;  %5524 = vmatprep.subr.bf16.mxu1 %v6042_v1 }
 0x11f   : > { %v587_v26 = vmul.f32 0.0078125, %v556_v24  ;;  %v618_v27 = vmul.f32 %v7066_v22, %v7066_v22  ;;  %v589_v28 = vmul.f32 0.0078125, %v560_v25  ;;  %v620_v29 = vmul.f32 %v7068_v23, %v7068_v23  ;;  %5525 = vmatpush3.bf16.msra.mxu1 %v6042_v1 }
 0x120   : > { %5526 = vmatprep.subr.bf16.mxu1 %v6046_v18 }
 0x121   : > { %634 = vadd.xlane.f32.xlu0 %v618_v27  ;;  %v7074_v30 = vsub.f32 %v536_v2, %v587_v26  ;;  %v7076_v31 = vsub.f32 %v538_v3, %v589_v28  ;;  %v6048_v28 = vld [vmem:[#allocation7 + $0x4c] ss:$12 sps:$4 sm:$0xff]  }
 0x122   : > { %v562_v32 = vpop.xlane.xlu0 %561  ;;  %v564_v33 = vpop.xlane.xlu1 %563 }
 0x123   : > { %v590_v34 = vmul.f32 0.0078125, %v562_v32  ;;  %v619_v35 = vmul.f32 %v7074_v30, %v7074_v30  ;;  %v591_v36 = vmul.f32 0.0078125, %v564_v33  ;;  %v621_v37 = vmul.f32 %v7076_v31, %v7076_v31  ;;  %5527 = vmatpush3.bf16.msra.mxu1 %v6046_v18  ;;  %v6051_v33 = vld [vmem:[#allocation7 + $0x48] ss:$12 sps:$4 sm:$0xff]  }
 0x125   : > { %638 = vadd.xlane.f32.xlu0 %v620_v29  ;;  %636 = vadd.xlane.f32.xlu1 %v619_v35  ;;  %v7082_v38 = vsub.f32 %v539_v4, %v590_v34  ;;  %v7084_v39 = vsub.f32 %v540_v5, %v591_v36  ;;  %v6043_v5 = vld [vmem:[#allocation7 + $0x78] ss:$12 sps:$4 sm:$0xff]   ;;  %v6050_v29 = vld [vmem:[#allocation7 + $0x68] ss:$12 sps:$4 sm:$0xff]   ;;  %v6054_v36 = vld [vmem:[#allocation7 + $0x50] ss:$12 sps:$4 sm:$0xff]  }
 0x126   : > { %v566_v40 = vpop.xlane.xlu0 %565  ;;  %v568_v41 = vpop.xlane.xlu1 %567  ;;  %947 = vmatpush1.bf16.msra.mxu0 %v6043_v5  ;;  %5528 = vmatprep.subr.bf16.mxu1 %v6050_v29  ;;  %v6052_v35 = vld [vmem:[#allocation7 + $0x34] ss:$12 sps:$4 sm:$0xff]  }
 0x127   : > { %v592_v42 = vmul.f32 0.0078125, %v566_v40  ;;  %v622_v43 = vmul.f32 %v7082_v38, %v7082_v38  ;;  %v593_v44 = vmul.f32 0.0078125, %v568_v41  ;;  %v623_v45 = vmul.f32 %v7084_v39, %v7084_v39  ;;  %948 = vmatprep.subr.bf16.mxu0 %v6044_v17  ;;  %5529 = vmatpush3.bf16.msra.mxu1 %v6050_v29  ;;  %v6058_v40 = vld [vmem:[#allocation7 + $0x38] ss:$12 sps:$4 sm:$0xff]  }
 0x128   : > { %5530 = vmatprep.subr.bf16.mxu1 %v6054_v36  ;;  %v6059_v41 = vld [vmem:[#allocation7 + $0x18] ss:$12 sps:$4 sm:$0xff]  }
 0x129   : > { %640 = vadd.xlane.f32.xlu1 %v621_v37  ;;  %642 = vadd.xlane.f32.xlu0 %v622_v43  ;;  %v7090_v46 = vsub.f32 %v541_v6, %v592_v42  ;;  %v7092_v47 = vsub.f32 %v542_v7, %v593_v44  ;;  %v6060_v42 = vld [vmem:[#allocation7 + $0x4] ss:$12 sps:$4 sm:$0xff]   ;;  %v6062_v43 = vld [vmem:[#allocation7 + $0x20] ss:$12 sps:$4 sm:$0xff]  }
 0x12a   : > { %v570_v48 = vpop.xlane.xlu0 %569  ;;  %v572_v49 = vpop.xlane.xlu1 %571  ;;  %949 = vmatpush1.bf16.msra.mxu0 %v6047_v20  ;;  %v6063_v44 = vld [vmem:[#allocation7] ss:$12 sps:$4 sm:$0xff]  }
 0x12b   : > { %v594_v50 = vmul.f32 0.0078125, %v570_v48  ;;  %v624_v51 = vmul.f32 %v7090_v46, %v7090_v46  ;;  %v595_v52 = vmul.f32 0.0078125, %v572_v49  ;;  %v625_v56 = vmul.f32 %v7092_v47, %v7092_v47  ;;  %950 = vmatprep.subr.bf16.mxu0 %v6048_v28  ;;  %5531 = vmatpush3.bf16.msra.mxu1 %v6054_v36 }
 0x12c   : > { %5532 = vmatprep.subr.bf16.mxu1 %v6058_v40  ;;  %v8941_v48 = vmov 0  }
 0x12d   : > { %644 = vadd.xlane.f32.xlu1 %v623_v45  ;;  %646 = vadd.xlane.f32.xlu0 %v624_v51  ;;  %v7099_v57 = vsub.f32 %v7035_v8, %v594_v50  ;;  %v7102_v58 = vsub.f32 %v7038_v9, %v595_v52  ;;  %v6064_v45 = vld [vmem:[#allocation7 + $0x8] ss:$12 sps:$4 sm:$0xff]  }
 0x12e   : > { %v574_v59 = vpop.xlane.xlu0 %573  ;;  %v576_v60 = vpop.xlane.xlu1 %575  ;;  %951 = vmatpush1.bf16.msra.mxu0 %v6051_v33  ;;  %974 = vmatprep.mubr.bf16.mxu0 %v8941_v48 }
 0x12f   : > { %v596_v61 = vmul.f32 0.0078125, %v574_v59  ;;  %v626_v62 = vmul.f32 %v7099_v57, %v7099_v57  ;;  %v597_v63 = vmul.f32 0.0078125, %v576_v60  ;;  %v627_v2 = vmul.f32 %v7102_v58, %v7102_v58  ;;  %952 = vmatprep.subr.bf16.mxu0 %v6052_v35  ;;  %5533 = vmatpush3.bf16.msra.mxu1 %v6058_v40 }
 0x130   : > { %5534 = vmatprep.subr.bf16.mxu1 %v6062_v43 }
 0x131   : > { %648 = vadd.xlane.f32.xlu1 %v625_v56  ;;  %650 = vadd.xlane.f32.xlu0 %v626_v62  ;;  %v7109_v3 = vsub.f32 %v7041_v10, %v596_v61  ;;  %v7112_v4 = vsub.f32 %v7044_v11, %v597_v63 }
 0x132   : > { %v578_v6 = vpop.xlane.xlu0 %577  ;;  %v580_v7 = vpop.xlane.xlu1 %579 }
 0x133   : > { %v598_v8 = vmul.f32 0.0078125, %v578_v6  ;;  %v628_v9 = vmul.f32 %v7109_v3, %v7109_v3  ;;  %v599_v16 = vmul.f32 0.0078125, %v580_v7  ;;  %v629_v10 = vmul.f32 %v7112_v4, %v7112_v4  ;;  %5535 = vmatpush3.bf16.msra.mxu1 %v6062_v43 }
 0x134   : > { %5536 = vmatprep.subr.bf16.mxu1 %v6064_v45 }
 0x135   : > { %652 = vadd.xlane.f32.xlu1 %v627_v2  ;;  %654 = vadd.xlane.f32.xlu0 %v628_v9  ;;  %v7119_v11 = vsub.f32 %v7049_v12, %v598_v8  ;;  %v7122_v19 = vsub.f32 %v7052_v13, %v599_v16 }
 0x136   : > { %v582_v21 = vpop.xlane.xlu0 %581  ;;  %v584_v24 = vpop.xlane.xlu1 %583 }
 0x137   : > { %v600_v25 = vmul.f32 0.0078125, %v582_v21  ;;  %v630_v26 = vmul.f32 %v7119_v11, %v7119_v11  ;;  %v601_v27 = vmul.f32 0.0078125, %v584_v24  ;;  %v631_v12 = vmul.f32 %v7122_v19, %v7122_v19  ;;  %5537 = vmatpush3.bf16.msra.mxu1 %v6064_v45 }
 0x139   : > { %656 = vadd.xlane.f32.xlu1 %v629_v10  ;;  %658 = vadd.xlane.f32.xlu0 %v630_v26  ;;  %v7129_v13 = vsub.f32 %v7057_v14, %v600_v25  ;;  %v7132_v32 = vsub.f32 %v7060_v15, %v601_v27  ;;  %v6055_v14 = vld [vmem:[#allocation7 + $0x30] ss:$12 sps:$4 sm:$0xff]   ;;  %v7142_v25 = vld [vmem:[%s8921_s2] ss:$0 sm:$0xff] }
 0x13a   : > { %953 = vmatpush1.bf16.msra.mxu0 %v6055_v14  ;;  %v6056_v15 = vld [vmem:[#allocation7 + $0x1c] ss:$12 sps:$4 sm:$0xff]   ;;  %v7149_v14 = vld [vmem:[%s8922_s3] ss:$0 sm:$0xff] }
 0x13b   : > { %v632_v34 = vmul.f32 %v7129_v13, %v7129_v13  ;;  %v633_v37 = vmul.f32 %v7132_v32, %v7132_v32  ;;  %954 = vmatprep.subr.bf16.mxu0 %v6056_v15 }
 0x13d   : > { %660 = vadd.xlane.f32.xlu1 %v631_v12  ;;  %662 = vadd.xlane.f32.xlu0 %v632_v34 }
 0x13e   : > { %955 = vmatpush1.bf16.msra.mxu0 %v6059_v41 }
 0x13f   : > { %956 = vmatprep.subr.bf16.mxu0 %v6060_v42 }
 0x141   : > { %664 = vadd.xlane.f32.xlu1 %v633_v37 }
 0x142   : > { %957 = vmatpush1.bf16.msra.mxu0 %v6063_v44 }
 0x1aa   : > { %v635_v49 = vpop.xlane.xlu0 %634 }
 0x1ab   : > { %v666_v50 = vmul.f32 0.0078125, %v635_v49 }
 0x1ad   : > { %v682_v51 = vadd.f32 1e-05, %v666_v50 }
 0x1ae   : > { %v637_v52 = vpop.xlane.xlu1 %636  ;;  %v639_v53 = vpop.xlane.xlu0 %638 }
 0x1af   : > { %6153 = vrsqrt.f32 %v682_v51  ;;  %v667_v54 = vmul.f32 0.0078125, %v637_v52  ;;  %v668_v55 = vmul.f32 0.0078125, %v639_v53 }
 0x1b1   : > { %v683_v56 = vadd.f32 1e-05, %v667_v54  ;;  %v684_v59 = vadd.f32 1e-05, %v668_v55 }
 0x1b2   : > { %v641_v60 = vpop.xlane.xlu1 %640  ;;  %v643_v61 = vpop.xlane.xlu0 %642 }
 0x1b3   : > { %6155 = vrsqrt.f32 %v683_v56  ;;  %v669_v62 = vmul.f32 0.0078125, %v641_v60  ;;  %v670_v63 = vmul.f32 0.0078125, %v643_v61 }
 0x1b4   : > { %6157 = vrsqrt.f32 %v684_v59 }
 0x1b5   : > { %v685_v0 = vadd.f32 1e-05, %v669_v62  ;;  %v686_v1 = vadd.f32 1e-05, %v670_v63 }
 0x1b6   : > { %v645_v2 = vpop.xlane.xlu1 %644  ;;  %v647_v5 = vpop.xlane.xlu0 %646 }
 0x1b7   : > { %6159 = vrsqrt.f32 %v685_v0  ;;  %v671_v6 = vmul.f32 0.0078125, %v645_v2  ;;  %v672_v7 = vmul.f32 0.0078125, %v647_v5 }
 0x1b8   : > { %6161 = vrsqrt.f32 %v686_v1 }
 0x1b9   : > { %v687_v8 = vadd.f32 1e-05, %v671_v6  ;;  %v688_v9 = vadd.f32 1e-05, %v672_v7 }
 0x1ba   : > { %v649_v16 = vpop.xlane.xlu1 %648  ;;  %v651_v17 = vpop.xlane.xlu0 %650 }
 0x1bb   : > { %6163 = vrsqrt.f32 %v687_v8  ;;  %v673_v18 = vmul.f32 0.0078125, %v649_v16  ;;  %v674_v10 = vmul.f32 0.0078125, %v651_v17 }
 0x1bc   : > { %v6154_v20 = vpop.eup %6153  ;;  %6165 = vrsqrt.f32 %v688_v9 }
 0x1bd   : > { %v689_v21 = vadd.f32 1e-05, %v673_v18  ;;  %v690_v24 = vadd.f32 1e-05, %v674_v10  ;;  %v714_v26 = vmul.f32 %v6154_v20, %v7066_v22 }
 0x1be   : > { %v653_v27 = vpop.xlane.xlu1 %652  ;;  %v655_v28 = vpop.xlane.xlu0 %654 }
 0x1bf   : > { %6167 = vrsqrt.f32 %v689_v21  ;;  %v675_v29 = vmul.f32 0.0078125, %v653_v27  ;;  %v676_v12 = vmul.f32 0.0078125, %v655_v28  ;;  %v736_v34 = vmul.f32 %v7142_v25, %v714_v26 }
 0x1c0   : > { %v6156_v33 = vpop.eup %6155  ;;  %6169 = vrsqrt.f32 %v690_v24 }
 0x1c1   : > { %v6158_v35 = vpop.eup %6157  ;;  %v691_v36 = vadd.f32 1e-05, %v675_v29  ;;  %v692_v37 = vadd.f32 1e-05, %v676_v12  ;;  %v715_v15 = vmul.f32 %v6156_v33, %v7074_v30  ;;  %v758_v49 = vadd.f32 %v7149_v14, %v736_v34 }
 0x1c2   : > { %v657_v22 = vpop.xlane.xlu1 %656  ;;  %v659_v40 = vpop.xlane.xlu0 %658  ;;  %v716_v41 = vmul.f32 %v6158_v35, %v7068_v23 }
 0x1c3   : > { %6171 = vrsqrt.f32 %v691_v36  ;;  %v677_v42 = vmul.f32 0.0078125, %v657_v22  ;;  %v678_v43 = vmul.f32 0.0078125, %v659_v40  ;;  %v737_v44 = vmul.f32 %v7142_v25, %v715_v15 }
 0x1c4   : > { %v6160_v45 = vpop.eup %6159  ;;  %6173 = vrsqrt.f32 %v692_v37  ;;  %v738_v23 = vmul.f32 %v7142_v25, %v716_v41 }
 0x1c5   : > { %v6162_v50 = vpop.eup %6161  ;;  %v693_v51 = vadd.f32 1e-05, %v677_v42  ;;  %v694_v52 = vadd.f32 1e-05, %v678_v43  ;;  %v759_v53 = vadd.f32 %v7149_v14, %v737_v44  ;;  %v717_v30 = vmul.f32 %v6160_v45, %v7076_v31 }
 0x1c6   : > { %v661_v54 = vpop.xlane.xlu1 %660  ;;  %v663_v55 = vpop.xlane.xlu0 %662  ;;  %v718_v56 = vmul.f32 %v6162_v50, %v7082_v38  ;;  %v760_v38 = vadd.f32 %v7149_v14, %v738_v23 }
 0x1c7   : > { %6175 = vrsqrt.f32 %v693_v51  ;;  %v679_v59 = vmul.f32 0.0078125, %v661_v54  ;;  %v680_v60 = vmul.f32 0.0078125, %v663_v55  ;;  %v774_v61 = vpack.c.bf16 %v759_v53, %v758_v49 }
 0x1c8   : > { %v6164_v62 = vpop.eup %6163  ;;  %6177 = vrsqrt.f32 %v694_v52  ;;  %v739_v63 = vmul.f32 %v7142_v25, %v717_v30  ;;  %v740_v5 = vmul.f32 %v7142_v25, %v718_v56 }
 0x1c9   : > { %v6166_v0 = vpop.eup %6165  ;;  %v695_v1 = vadd.f32 1e-05, %v679_v59  ;;  %v696_v2 = vadd.f32 1e-05, %v680_v60  ;;  %975 = vmatmul.mubr.bf16.vlgmr.msra.gmra.mxu0 %v774_v61  ;;  %5538 = vmatprep.mubr.bf16.mxu1 %v774_v61  ;;  %v719_v31 = vmul.f32 %v6164_v62, %v7084_v39 }
 0x1ca   : > { %v665_v6 = vpop.xlane.xlu1 %664  ;;  %v761_v7 = vadd.f32 %v7149_v14, %v739_v63  ;;  %984 = vmatprep.mubr.bf16.mxu0 %v8941_v48  ;;  %v720_v8 = vmul.f32 %v6166_v0, %v7090_v46  ;;  %v762_v21 = vadd.f32 %v7149_v14, %v740_v5 }
 0x1cb   : > { %6179 = vrsqrt.f32 %v695_v1  ;;  %v681_v9 = vmul.f32 0.0078125, %v665_v6  ;;  %v741_v16 = vmul.f32 %v7142_v25, %v719_v31 }
 0x1cc   : > { %v6168_v17 = vpop.eup %6167  ;;  %6181 = vrsqrt.f32 %v696_v2  ;;  %v775_v18 = vpack.c.bf16 %v761_v7, %v760_v38  ;;  %v742_v39 = vmul.f32 %v7142_v25, %v720_v8 }
 0x1cd   : > { %v6170_v10 = vpop.eup %6169  ;;  %v697_v20 = vadd.f32 1e-05, %v681_v9  ;;  %v763_v24 = vadd.f32 %v7149_v14, %v741_v16  ;;  %v721_v26 = vmul.f32 %v6168_v17, %v7092_v47 }
 0x1ce   : > { %5539 = vmatmul.mubr.bf16.vlgmr.msra.gmra.mxu1 %v775_v18  ;;  %v722_v46 = vmul.f32 %v6170_v10, %v7099_v57  ;;  %v764_v12 = vadd.f32 %v7149_v14, %v742_v39 }
 0x1cf   : > { %6183 = vrsqrt.f32 %v697_v20  ;;  %v776_v27 = vpack.c.bf16 %v763_v24, %v762_v21  ;;  %v743_v28 = vmul.f32 %v7142_v25, %v721_v26 }
 0x1d0   : > { %v6172_v29 = vpop.eup %6171  ;;  %v744_v36 = vmul.f32 %v7142_v25, %v722_v46 }
 0x1d1   : > { %v6174_v33 = vpop.eup %6173  ;;  %985 = vmatmul.mubr.bf16.gmra.mxu0 %v775_v18  ;;  %5542 = vmatprep.mubr.bf16.mxu1 %v776_v27  ;;  %v765_v34 = vadd.f32 %v7149_v14, %v743_v28  ;;  %v723_v35 = vmul.f32 %v6172_v29, %v7102_v58 }
 0x1d2   : > { %994 = vmatprep.mubr.bf16.mxu0 %v8941_v48  ;;  %v724_v47 = vmul.f32 %v6174_v33, %v7109_v3  ;;  %v766_v41 = vadd.f32 %v7149_v14, %v744_v36 }
 0x1d3   : > { %v777_v57 = vpack.c.bf16 %v765_v34, %v764_v12  ;;  %v745_v37 = vmul.f32 %v7142_v25, %v723_v35 }
 0x1d4   : > { %v6176_v15 = vpop.eup %6175  ;;  %v746_v22 = vmul.f32 %v7142_v25, %v724_v47 }
 0x1d5   : > { %v6178_v40 = vpop.eup %6177  ;;  %v767_v42 = vadd.f32 %v7149_v14, %v745_v37  ;;  %v725_v43 = vmul.f32 %v6176_v15, %v7112_v4 }
 0x1d6   : > { %5543 = vmatmul.mubr.bf16.gmra.mxu1 %v777_v57  ;;  %v726_v58 = vmul.f32 %v6178_v40, %v7119_v11  ;;  %v768_v49 = vadd.f32 %v7149_v14, %v746_v22 }
 0x1d7   : > { %v778_v44 = vpack.c.bf16 %v767_v42, %v766_v41  ;;  %v747_v45 = vmul.f32 %v7142_v25, %v725_v43 }
 0x1d8   : > { %v6180_v3 = vpop.eup %6179  ;;  %v748_v53 = vmul.f32 %v7142_v25, %v726_v58 }
 0x1d9   : > { %v6182_v50 = vpop.eup %6181  ;;  %995 = vmatmul.mubr.bf16.gmra.mxu0 %v776_v27  ;;  %5546 = vmatprep.mubr.bf16.mxu1 %v778_v44  ;;  %v769_v51 = vadd.f32 %v7149_v14, %v747_v45  ;;  %v727_v52 = vmul.f32 %v6180_v3, %v7122_v19 }
 0x1da   : > { %1004 = vmatprep.mubr.bf16.mxu0 %v8941_v48  ;;  %v728_v4 = vmul.f32 %v6182_v50, %v7129_v13  ;;  %v770_v55 = vadd.f32 %v7149_v14, %v748_v53 }
 0x1db   : > { %v779_v11 = vpack.c.bf16 %v769_v51, %v768_v49  ;;  %v749_v30 = vmul.f32 %v7142_v25, %v727_v52 }
 0x1dc   : > { %v6184_v54 = vpop.eup %6183  ;;  %v750_v59 = vmul.f32 %v7142_v25, %v728_v4 }
 0x1dd   : > { %v771_v23 = vadd.f32 %v7149_v14, %v749_v30  ;;  %v729_v56 = vmul.f32 %v6184_v54, %v7132_v32 }
 0x1de   : > { %5547 = vmatmul.mubr.bf16.gmra.mxu1 %v779_v11  ;;  %v772_v13 = vadd.f32 %v7149_v14, %v750_v59 }
 0x1df   : > { %v780_v19 = vpack.c.bf16 %v771_v23, %v770_v55  ;;  %v751_v60 = vmul.f32 %v7142_v25, %v729_v56 }
 0x1e1   : > { %1005 = vmatmul.mubr.bf16.gmra.mxu0 %v777_v57  ;;  %5550 = vmatprep.mubr.bf16.mxu1 %v780_v19  ;;  %v773_v61 = vadd.f32 %v7149_v14, %v751_v60 }
 0x1e2   : > { %1014 = vmatprep.mubr.bf16.mxu0 %v8941_v48 }
 0x1e3   : > { %v781_v62 = vpack.c.bf16 %v773_v61, %v772_v13 }
 0x1e6   : > { %5551 = vmatmul.mubr.bf16.gmra.mxu1 %v781_v62 }
 0x1e9   : > { %1015 = vmatmul.mubr.bf16.gmra.mxu0 %v778_v44 }
 0x1ea   : > { %1024 = vmatprep.mubr.bf16.mxu0 %v8941_v48 }
 0x1f1   : > { %1025 = vmatmul.mubr.bf16.gmra.mxu0 %v779_v11 }
 0x1f2   : > { %1034 = vmatprep.mubr.bf16.mxu0 %v8941_v48 }
 0x1f9   : > { %1035 = vmatmul.mubr.bf16.gmra.mxu0 %v780_v19 }
 0x1fa   : > { %1044 = vmatprep.mubr.bf16.mxu0 %v8941_v48 }
 0x201   : > { %1045 = vmatmul.mubr.bf16.gmra.mxu0 %v781_v62 }
 0x289   : > { %v976_v32 = vpop.f32.mrf.mxu0 }
 0x28a   : > { %v1152_v0 = vmul.f32 0.17677669, %v976_v32 }
 0x28b   : > { %v7204_v25 = vpop.f32.mrf.mxu0 }
 0x28d   : > { %v980_v63 = vpop.f32.mrf.mxu0 }
 0x28e   : > { %v1153_v14 = vmul.f32 0.17677669, %v980_v63  ;;  %v7206_v1 = vpop.f32.mrf.mxu1 }
 0x28f   : > { %v7208_v2 = vpop.f32.mrf.mxu0 }
 0x290   : > { %v7210_v31 = vpack.c.bf16 %v1153_v14, %v1152_v0  ;;  %v7212_v5 = vpop.f32.mrf.mxu1 }
 0x291   : > { %v986_v6 = vpop.f32.mrf.mxu0 }
 0x292   : > { %v7214_v38 = vpop.f32.mrf.mxu1  ;;  %5570 = vmatprep.mubr.msk.bf16.mxu0 %vm1224_vm0, %v7210_v31  ;;  %v1154_v16 = vmul.f32 0.17677669, %v986_v6 }
 0x293   : > { %v7218_v7 = vpop.f32.mrf.mxu0 }
 0x294   : > { %v7220_v8 = vpop.f32.mrf.mxu1 }
 0x295   : > { %v990_v9 = vpop.f32.mrf.mxu0 }
 0x296   : > { %v1155_v17 = vmul.f32 0.17677669, %v990_v9  ;;  %v5544_v18 = vpop.f32.mrf.mxu1 }
 0x297   : > { %v7222_v39 = vpop.f32.mrf.mxu0 }
 0x298   : > { %v7224_v10 = vpack.c.bf16 %v1155_v17, %v1154_v16  ;;  %v1105_v20 = vpop.f32.mrf.mxu1 }
 0x299   : > { %v996_v21 = vpop.f32.mrf.mxu0 }
 0x29a   : > { %v5545_v24 = vpop.f32.mrf.mxu1  ;;  %v1156_v28 = vmul.f32 0.17677669, %v996_v21  ;;  %v7273_v21 = vpack.c.bf16 %v7214_v38, %v7206_v1 }
 0x29b   : > { %v7226_v26 = vpop.f32.mrf.mxu0  ;;  %v7259_v62 = vpack.c.bf16 %v5545_v24, %v5544_v18 }
 0x29c   : > { %v1108_v46 = vpop.f32.mrf.mxu1  ;;  %9000 = vst [vmem:[#allocation24_spill] sm:$0xff] %v7273_v21 }
 0x29d   : > { %v1000_v27 = vpop.f32.mrf.mxu0  ;;  %8998 = vst [vmem:[#allocation22_spill] sm:$0xff] %v7259_v62  ;;  %v7263_v0 = vpack.c.bf16 %v1108_v46, %v1105_v20  ;;  %v7281_v46 = vpack.c.bf16 %v7220_v8, %v7212_v5 }
 0x29e   : > { %v1157_v29 = vmul.f32 0.17677669, %v1000_v27  ;;  %v5548_v12 = vpop.f32.mrf.mxu1 }
 0x29f   : > { %v7228_v33 = vpop.f32.mrf.mxu0  ;;  %9001 = vst [vmem:[#allocation25_spill] sm:$0xff] %v7281_v46 }
 0x2a0   : > { %v7230_v34 = vpack.c.bf16 %v1157_v29, %v1156_v28  ;;  %v1121_v35 = vpop.f32.mrf.mxu1 }
 0x2a1   : > { %v1006_v36 = vpop.f32.mrf.mxu0 }
 0x2a2   : > { %v5549_v47 = vpop.f32.mrf.mxu1  ;;  %v1158_v22 = vmul.f32 0.17677669, %v1006_v36 }
 0x2a3   : > { %v7232_v57 = vpop.f32.mrf.mxu0  ;;  %v7249_v54 = vpack.c.bf16 %v5549_v47, %v5548_v12 }
 0x2a4   : > { %v1124_v37 = vpop.f32.mrf.mxu1 }
 0x2a5   : > { %v1010_v15 = vpop.f32.mrf.mxu0  ;;  %8996 = vst [vmem:[#allocation20_spill] sm:$0xff] %v7249_v54  ;;  %v7253_v56 = vpack.c.bf16 %v1124_v37, %v1121_v35 }
 0x2a6   : > { %v1159_v40 = vmul.f32 0.17677669, %v1010_v15  ;;  %v5552_v41 = vpop.f32.mrf.mxu1 }
 0x2a7   : > { %v7234_v42 = vpop.f32.mrf.mxu0  ;;  %8997 = vst [vmem:[#allocation21_spill] sm:$0xff] %v7253_v56 }
 0x2a8   : > { %v7236_v43 = vpack.c.bf16 %v1159_v40, %v1158_v22  ;;  %v1137_v58 = vpop.f32.mrf.mxu1  ;;  %v7313_v37 = vpack.c.bf16 %v7234_v42, %v7232_v57  ;;  %v7321_v22 = vpack.c.bf16 %v7228_v33, %v7226_v26  ;;  %v7329_v57 = vpack.c.bf16 %v7222_v39, %v7218_v7 }
 0x2a9   : > { %v1016_v44 = vpop.f32.mrf.mxu0  ;;  %v7337_v26 = vpack.c.bf16 %v7208_v2, %v7204_v25  ;;  %v7363_v2 = vld [vmem:[#allocation5 + $0x10] sm:$0xff] }
 0x2aa   : > { %v5553_v45 = vpop.f32.mrf.mxu1  ;;  %v1160_v53 = vmul.f32 0.17677669, %v1016_v44  ;;  %9005 = vst [vmem:[#allocation29_spill] sm:$0xff] %v7313_v37  ;;  %9006 = vst [vmem:[#allocation30_spill] sm:$0xff] %v7321_v22  ;;  %v1259_v40 = vsel %vm1224_vm0, %v7313_v37, 0  ;;  %v1253_v33 = vsel %vm1224_vm0, %v7329_v57, 0 }
 0x2ab   : > { %v7238_v3 = vpack.c.bf16 %v5553_v45, %v5552_v41  ;;  %v7240_v49 = vpop.f32.mrf.mxu0  ;;  %v1256_v41 = vsel %vm1224_vm0, %v7321_v22, 0  ;;  %v1250_v7 = vsel %vm1224_vm0, %v7337_v26, 0  ;;  %v7368_v44 = vld [vmem:[#allocation5] sm:$0xff]  ;;  %v7370_v45 = vld [vmem:[#allocation5 + $0x18] sm:$0xff] }
 0x2ac   : > { %v1140_v50 = vpop.f32.mrf.mxu1 }
 0x2ad   : > { %v7242_v51 = vpack.c.bf16 %v1140_v50, %v1137_v58  ;;  %5586 = vmatprep.subr.bf16.mxu1 %v7238_v3  ;;  %v1020_v52 = vpop.f32.mrf.mxu0 }
 0x2ae   : > { %v1161_v4 = vmul.f32 0.17677669, %v1020_v52  ;;  %5587 = vmatpush3.bf16.msra.mxu1 %v7238_v3 }
 0x2af   : > { %5588 = vmatprep.subr.bf16.mxu1 %v7242_v51  ;;  %v1022_v11 = vpop.f32.mrf.mxu0 }
 0x2b0   : > { %v7247_v30 = vpack.c.bf16 %v1161_v4, %v1160_v53  ;;  %v7305_v36 = vpack.c.bf16 %v1022_v11, %v7240_v49  ;;  %v7379_v4 = vld [vmem:[#allocation5 + $0x30] sm:$0xff]  ;;  %v7381_v11 = vld [vmem:[#allocation5 + $0x8] sm:$0xff] }
 0x2b1   : > { %v1026_v55 = vpop.f32.mrf.mxu0 }
 0x2b2   : > { %5589 = vmatpush3.bf16.msra.mxu1 %v7242_v51  ;;  %v1162_v19 = vmul.f32 0.17677669, %v1026_v55  ;;  %9004 = vst [vmem:[#allocation28_spill] sm:$0xff] %v7305_v36  ;;  %v1262_v15 = vsel %vm1224_vm0, %v7305_v36, 0 }
 0x2b3   : > { %5590 = vmatprep.subr.bf16.mxu1 %v7249_v54  ;;  %v1028_v23 = vpop.f32.mrf.mxu0 }
 0x2b5   : > { %v1030_v59 = vpop.f32.mrf.mxu0 }
 0x2b6   : > { %v1163_v60 = vmul.f32 0.17677669, %v1030_v59  ;;  %5591 = vmatpush3.bf16.msra.mxu1 %v7249_v54 }
 0x2b7   : > { %5592 = vmatprep.subr.bf16.mxu1 %v7253_v56  ;;  %v1032_v13 = vpop.f32.mrf.mxu0 }
 0x2b8   : > { %v7257_v61 = vpack.c.bf16 %v1163_v60, %v1162_v19  ;;  %v7298_v8 = vpack.c.bf16 %v1032_v13, %v1028_v23  ;;  %v7391_v60 = vld [vmem:[#allocation5 + $0x20] sm:$0xff]  ;;  %v7393_v13 = vld [vmem:[#allocation5 + $0x38] sm:$0xff] }
 0x2b9   : > { %v1036_v32 = vpop.f32.mrf.mxu0 }
 0x2ba   : > { %5593 = vmatpush3.bf16.msra.mxu1 %v7253_v56  ;;  %v1164_v6 = vmul.f32 0.17677669, %v1036_v32  ;;  %9003 = vst [vmem:[#allocation27_spill] sm:$0xff] %v7298_v8  ;;  %v1265_v47 = vsel %vm1224_vm0, %v7298_v8, 0 }
 0x2bb   : > { %5594 = vmatprep.subr.bf16.mxu1 %v7259_v62  ;;  %v1038_v63 = vpop.f32.mrf.mxu0 }
 0x2bd   : > { %v1040_v14 = vpop.f32.mrf.mxu0 }
 0x2be   : > { %v1165_v9 = vmul.f32 0.17677669, %v1040_v14  ;;  %5595 = vmatpush3.bf16.msra.mxu1 %v7259_v62 }
 0x2bf   : > { %5596 = vmatprep.subr.bf16.mxu1 %v7263_v0  ;;  %v1042_v16 = vpop.f32.mrf.mxu0 }
 0x2c0   : > { %v7267_v17 = vpack.c.bf16 %v1165_v9, %v1164_v6  ;;  %v7269_v18 = vpack.c.bf16 %v1042_v16, %v1038_v63  ;;  %v7403_v9 = vld [vmem:[#allocation5 + $0x50] sm:$0xff]  ;;  %v7405_v16 = vld [vmem:[#allocation5 + $0x28] sm:$0xff] }
 0x2c1   : > { %v1046_v24 = vpop.f32.mrf.mxu0 }
 0x2c2   : > { %8999 = vst [vmem:[#allocation23_spill] sm:$0xff] %v7269_v18  ;;  %5597 = vmatpush3.bf16.msra.mxu1 %v7263_v0  ;;  %1671 = vrot.lane.b32.xlu1 %v7269_v18, %s6756_s30  ;;  %v1166_v28 = vmul.f32 0.17677669, %v1046_v24  ;;  %v1268_v35 = vsel %vm1224_vm0, %v7269_v18, 0 }
 0x2c3   : > { %5598 = vmatprep.subr.bf16.mxu1 %v7273_v21  ;;  %v1048_v20 = vpop.f32.mrf.mxu0 }
 0x2c5   : > { %v1050_v27 = vpop.f32.mrf.mxu0 }
 0x2c6   : > { %v1167_v29 = vmul.f32 0.17677669, %v1050_v27  ;;  %5599 = vmatpush3.bf16.msra.mxu1 %v7273_v21 }
 0x2c7   : > { %5600 = vmatprep.subr.bf16.mxu1 %v7281_v46  ;;  %v1052_v1 = vpop.f32.mrf.mxu0 }
 0x2c8   : > { %v7285_v38 = vpack.c.bf16 %v1167_v29, %v1166_v28  ;;  %v7287_v12 = vpack.c.bf16 %v1052_v1, %v1048_v20  ;;  %v7415_v29 = vld [vmem:[#allocation5 + $0x40] sm:$0xff]  ;;  %v7417_v1 = vld [vmem:[#allocation5 + $0x58] sm:$0xff] }
 0x2ca   : > { %9002 = vst [vmem:[#allocation26_spill] sm:$0xff] %v7287_v12  ;;  %5601 = vmatpush3.bf16.msra.mxu1 %v7281_v46  ;;  %1673 = vrot.lane.b32.xlu0 %v7287_v12, %s6756_s30  ;;  %v1271_v5 = vsel %vm1224_vm0, %v7287_v12, 0 }
 0x2cb   : > { %5890 = vmatprep.subr.msk.bf16.mxu0 %vm1224_vm0, %v7287_v12 }
 0x2cc   : > { %5555 = vmatpush3.bf16.xpose.msra.mxu0 %v1271_v5 }
 0x2cd   : > { %5891 = vmatprep.subr.msk.bf16.mxu0 %vm1224_vm0, %v7269_v18 }
 0x2d4   : > { %5557 = vmatpush3.bf16.xpose.msra.mxu0 %v1268_v35 }
 0x2d5   : > { %5892 = vmatprep.subr.msk.bf16.mxu0 %vm1224_vm0, %v7298_v8 }
 0x2dc   : > { %5559 = vmatpush3.bf16.xpose.msra.mxu0 %v1265_v47 }
 0x2dd   : > { %5893 = vmatprep.subr.msk.bf16.mxu0 %vm1224_vm0, %v7305_v36 }
 0x2e4   : > { %5561 = vmatpush3.bf16.xpose.msra.mxu0 %v1262_v15 }
 0x2e5   : > { %5894 = vmatprep.subr.msk.bf16.mxu0 %vm1224_vm0, %v7313_v37 }
 0x2ec   : > { %5563 = vmatpush3.bf16.xpose.msra.mxu0 %v1259_v40  ;;  %v7427_v40 = vld [vmem:[#allocation5 + $0x70] sm:$0xff] }
 0x2ed   : > { %5895 = vmatprep.subr.msk.bf16.mxu0 %vm1224_vm0, %v7321_v22 }
 0x2f4   : > { %5565 = vmatpush3.bf16.xpose.msra.mxu0 %v1256_v41  ;;  %v7429_v41 = vld [vmem:[#allocation5 + $0x48] sm:$0xff] }
 0x2f5   : > { %5896 = vmatprep.subr.msk.bf16.mxu0 %vm1224_vm0, %v7329_v57 }
 0x2fc   : > { %5567 = vmatpush3.bf16.xpose.msra.mxu0 %v1253_v33 }
 0x2fd   : > { %5897 = vmatprep.subr.msk.bf16.mxu0 %vm1224_vm0, %v7337_v26 }
 0x304   : > { %5569 = vmatpush3.bf16.xpose.msra.mxu0 %v1250_v7 }
 0x30b   : > { %5571 = vmatmul.mubr.msk.bf16.vlgmr.msra.gmra.mxu0 %vm1224_vm0, %v7224_v10 }
 0x30c   : > { %5574 = vmatprep.mubr.msk.bf16.mxu0 %vm1224_vm0, %v7230_v34 }
 0x313   : > { %5575 = vmatmul.mubr.msk.bf16.gmra.mxu0 %vm1224_vm0, %v7236_v43 }
 0x314   : > { %5578 = vmatprep.mubr.msk.bf16.mxu0 %vm1224_vm0, %v7247_v30 }
 0x31b   : > { %5579 = vmatmul.mubr.msk.bf16.gmra.mxu0 %vm1224_vm0, %v7257_v61 }
 0x31c   : > { %5582 = vmatprep.mubr.msk.bf16.mxu0 %vm1224_vm0, %v7267_v17 }
 0x323   : > { %5583 = vmatmul.mubr.msk.bf16.gmra.mxu0 %vm1224_vm0, %v7285_v38 }
 0x33c   : > { %v7359_v25 = vpop.permute.xlu0 %1673 }
 0x33d   : > { %5898 = vmatprep.subr.msk.bf16.mxu1 %vm1224_vm0, %v7359_v25 }
 0x3cb   : > { %v5572_v39 = vpop.f32.mrf.mxu0 }
 0x3cc   : > { %v7366_v42 = vadd.f32 %v5572_v39, %v7363_v2 }
 0x3cd   : > { %v1307_v58 = vpop.f32.mrf.mxu0 }
 0x3ce   : > { %1374 = vmax.xlane.f32.xlu0 %v7366_v42  ;;  %v7374_v50 = vadd.f32 %v1307_v58, %v7368_v44 }
 0x3cf   : > { %v5573_v49 = vpop.f32.mrf.mxu0 }
 0x3d0   : > { %v7377_v52 = vadd.f32 %v5573_v49, %v7370_v45  ;;  %v7439_v49 = vld [vmem:[#allocation5 + $0x60] sm:$0xff] }
 0x3d1   : > { %v1310_v53 = vpop.f32.mrf.mxu0  ;;  %9007 = vst [vmem:[#allocation31_spill] sm:$0xff] %v7439_v49 }
 0x3d2   : > { %1376 = vmax.xlane.f32.xlu1 %v7377_v52  ;;  %1370 = vmax.xlane.f32.xlu0 %v7374_v50  ;;  %v7389_v59 = vadd.f32 %v1310_v53, %v7381_v11 }
 0x3d3   : > { %v5576_v55 = vpop.f32.mrf.mxu0 }
 0x3d4   : > { %v7386_v23 = vadd.f32 %v5576_v55, %v7379_v4  ;;  %v7451_v55 = vld [vmem:[#allocation5 + $0x78] sm:$0xff] }
 0x3d5   : > { %v1323_v19 = vpop.f32.mrf.mxu0 }
 0x3d6   : > { %1372 = vmax.xlane.f32.xlu1 %v7389_v59  ;;  %1382 = vmax.xlane.f32.xlu0 %v7386_v23  ;;  %v7398_v63 = vadd.f32 %v1323_v19, %v7391_v60 }
 0x3d7   : > { %v5577_v32 = vpop.f32.mrf.mxu0 }
 0x3d8   : > { %v7401_v14 = vadd.f32 %v5577_v32, %v7393_v13 }
 0x3d9   : > { %v1326_v6 = vpop.f32.mrf.mxu0 }
 0x3da   : > { %1384 = vmax.xlane.f32.xlu1 %v7401_v14  ;;  %1378 = vmax.xlane.f32.xlu0 %v7398_v63  ;;  %v7413_v27 = vadd.f32 %v1326_v6, %v7405_v16 }
 0x3db   : > { %v5580_v24 = vpop.f32.mrf.mxu0 }
 0x3dc   : > { %v7410_v20 = vadd.f32 %v5580_v24, %v7403_v9  ;;  %v7456_v24 = vld [vmem:[#allocation5 + $0x68] sm:$0xff] }
 0x3dd   : > { %v1339_v28 = vpop.f32.mrf.mxu0 }
 0x3de   : > { %1380 = vmax.xlane.f32.xlu1 %v7413_v27  ;;  %1390 = vmax.xlane.f32.xlu0 %v7410_v20  ;;  %v7422_v35 = vadd.f32 %v1339_v28, %v7415_v29 }
 0x3df   : > { %v5581_v5 = vpop.f32.mrf.mxu0 }
 0x3e0   : > { %v7425_v47 = vadd.f32 %v5581_v5, %v7417_v1  ;;  %v7463_v5 = vpop.permute.xlu1 %1671 }
 0x3e1   : > { %v1342_v15 = vpop.f32.mrf.mxu0 }
 0x3e2   : > { %1392 = vmax.xlane.f32.xlu1 %v7425_v47  ;;  %1386 = vmax.xlane.f32.xlu0 %v7422_v35  ;;  %v7437_v39 = vadd.f32 %v1342_v15, %v7429_v41 }
 0x3e3   : > { %v5584_v33 = vpop.f32.mrf.mxu0 }
 0x3e4   : > { %v7434_v7 = vadd.f32 %v5584_v33, %v7427_v40 }
 0x3e5   : > { %v1355_v58 = vpop.f32.mrf.mxu0 }
 0x3e6   : > { %1388 = vmax.xlane.f32.xlu1 %v7437_v39  ;;  %1398 = vmax.xlane.f32.xlu0 %v7434_v7  ;;  %v7444_v53 = vadd.f32 %v1355_v58, %v7439_v49 }
 0x3e7   : > { %v5585_v19 = vpop.f32.mrf.mxu0 }
 0x3e8   : > { %v7454_v32 = vadd.f32 %v5585_v19, %v7451_v55 }
 0x3e9   : > { %v1358_v6 = vpop.f32.mrf.mxu0 }
 0x3ea   : > { %1394 = vmax.xlane.f32.xlu0 %v7444_v53  ;;  %v7460_v28 = vadd.f32 %v1358_v6, %v7456_v24 }
 0x3f7   : > { %1667 = vrot.lane.b32.xlu1 %v7305_v36, %s6756_s30 }
 0x400   : > { %1669 = vrot.lane.b32.xlu0 %v7298_v8, %s6756_s30 }
 0x41b   : > { %1400 = vmax.xlane.f32.xlu1 %v7454_v32 }
 0x41f   : > { %1396 = vmax.xlane.f32.xlu1 %v7460_v28 }
 0x457   : > { %v1375_v15 = vpop.xlane.xlu0 %1374 }
 0x458   : > { %v1404_v33 = vsub.f32 %v7366_v42, %v1375_v15 }
 0x45a   : > { %v1422_v58 = vmul.f32 1.442695, %v1404_v33 }
 0x45b   : > { %v1377_v48 = vpop.xlane.xlu1 %1376  ;;  %v1371_v12 = vpop.xlane.xlu0 %1370 }
 0x45c   : > { %6185 = vpow2.f32 %v1422_v58  ;;  %v1405_v19 = vsub.f32 %v7377_v52, %v1377_v48  ;;  %v1402_v36 = vsub.f32 %v7374_v50, %v1371_v12 }
 0x45e   : > { %v1424_v8 = vmul.f32 1.442695, %v1405_v19  ;;  %v1418_v18 = vmul.f32 1.442695, %v1402_v36 }
 0x45f   : > { %v1373_v46 = vpop.xlane.xlu1 %1372 }
 0x460   : > { %6187 = vpow2.f32 %v1424_v8  ;;  %v1403_v6 = vsub.f32 %v7389_v59, %v1373_v46  ;;  %v1383_v46 = vpop.xlane.xlu0 %1382 }
 0x461   : > { %6189 = vpow2.f32 %v1418_v18  ;;  %v1408_v36 = vsub.f32 %v7386_v23, %v1383_v46 }
 0x462   : > { %v1420_v21 = vmul.f32 1.442695, %v1403_v6 }
 0x463   : > { %v1385_v12 = vpop.xlane.xlu1 %1384  ;;  %v1430_v33 = vmul.f32 1.442695, %v1408_v36 }
 0x464   : > { %6191 = vpow2.f32 %v1420_v21  ;;  %v1379_v18 = vpop.xlane.xlu0 %1378  ;;  %v1409_v6 = vsub.f32 %v7401_v14, %v1385_v12 }
 0x465   : > { %v1406_v52 = vsub.f32 %v7398_v63, %v1379_v18  ;;  %6193 = vpow2.f32 %v1430_v33 }
 0x466   : > { %v1432_v49 = vmul.f32 1.442695, %v1409_v6 }
 0x467   : > { %v1381_v50 = vpop.xlane.xlu1 %1380  ;;  %v1426_v56 = vmul.f32 1.442695, %v1406_v52 }
 0x468   : > { %v1391_v21 = vpop.xlane.xlu0 %1390  ;;  %v1407_v58 = vsub.f32 %v7413_v27, %v1381_v50 }
 0x469   : > { %v7469_v62 = vpop.eup %6185  ;;  %6195 = vpow2.f32 %v1426_v56  ;;  %v1412_v23 = vsub.f32 %v7410_v20, %v1391_v21 }
 0x46a   : > { %1454 = vadd.xlane.f32.xlu0 %v7469_v62 }
 0x46b   : > { %v1393_v19 = vpop.xlane.xlu1 %1392  ;;  %v1438_v27 = vmul.f32 1.442695, %v1412_v23 }
 0x46c   : > { %v1387_v8 = vpop.xlane.xlu0 %1386  ;;  %v1413_v12 = vsub.f32 %v7425_v47, %v1393_v19 }
 0x46d   : > { %v7472_v42 = vpop.eup %6187  ;;  %v1410_v36 = vsub.f32 %v7422_v35, %v1387_v8 }
 0x46e   : > { %v7474_v15 = vpop.eup %6189  ;;  %1456 = vadd.xlane.f32.xlu1 %v7472_v42 }
 0x46f   : > { %1450 = vadd.xlane.f32.xlu0 %v7474_v15  ;;  %v1389_v46 = vpop.xlane.xlu1 %1388 }
 0x470   : > { %v1399_v59 = vpop.xlane.xlu0 %1398 }
 0x471   : > { %v7478_v48 = vpop.eup %6191  ;;  %v1416_v54 = vsub.f32 %v7434_v7, %v1399_v59  ;;  %v1434_v7 = vmul.f32 1.442695, %v1410_v36 }
 0x472   : > { %1452 = vadd.xlane.f32.xlu1 %v7478_v48  ;;  %v7496_v56 = vpop.eup %6193 }
 0x473   : > { %v1446_v63 = vmul.f32 1.442695, %v1416_v54  ;;  %v7494_v50 = vpop.permute.xlu1 %1667 }
 0x476   : > { %v7501_v35 = vpop.eup %6195 }
 0x483   : > { %1663 = vrot.lane.b32.xlu1 %v7321_v22, %s6756_s30  ;;  %v1428_v22 = vmul.f32 1.442695, %v1407_v58 }
 0x485   : > { %1665 = vrot.lane.b32.xlu0 %v7313_v37, %s6756_s30  ;;  %v1395_v37 = vpop.xlane.xlu0 %1394  ;;  %6197 = vpow2.f32 %v1428_v22  ;;  %v1440_v22 = vmul.f32 1.442695, %v1413_v12 }
 0x486   : > { %v1414_v18 = vsub.f32 %v7444_v53, %v1395_v37  ;;  %6199 = vpow2.f32 %v1432_v49  ;;  %v1411_v37 = vsub.f32 %v7437_v39, %v1389_v46 }
 0x487   : > { %6201 = vpow2.f32 %v1446_v63 }
 0x488   : > { %v1442_v14 = vmul.f32 1.442695, %v1414_v18  ;;  %6203 = vpow2.f32 %v1438_v27  ;;  %v1436_v21 = vmul.f32 1.442695, %v1411_v37 }
 0x489   : > { %v1670_v46 = vpop.permute.xlu0 %1669 }
 0x48a   : > { %6205 = vpow2.f32 %v1442_v14 }
 0x48b   : > { %6207 = vpow2.f32 %v1434_v7 }
 0x48c   : > { %6209 = vpow2.f32 %v1440_v22 }
 0x492   : > { %v7503_v49 = vpop.eup %6197 }
 0x493   : > { %v7508_v52 = vpop.eup %6199 }
 0x494   : > { %v7510_v39 = vpop.eup %6201 }
 0x495   : > { %v7514_v59 = vpop.eup %6203 }
 0x497   : > { %v7516_v33 = vpop.eup %6205 }
 0x4a4   : > { %1462 = vadd.xlane.f32.xlu0 %v7496_v56  ;;  %v1401_v54 = vpop.xlane.xlu1 %1400 }
 0x4a5   : > { %v1417_v20 = vsub.f32 %v7454_v32, %v1401_v54 }
 0x4a7   : > { %v1448_v47 = vmul.f32 1.442695, %v1417_v20  ;;  %1458 = vadd.xlane.f32.xlu1 %v7501_v35 }
 0x4a8   : > { %1460 = vadd.xlane.f32.xlu0 %v7503_v49  ;;  %v1397_v53 = vpop.xlane.xlu1 %1396 }
 0x4a9   : > { %6211 = vpow2.f32 %v1448_v47  ;;  %v1415_v8 = vsub.f32 %v7460_v28, %v1397_v53  ;;  %v7520_v28 = vpop.eup %6207 }
 0x4aa   : > { %6213 = vpow2.f32 %v1436_v21  ;;  %v7523_v58 = vpop.eup %6209 }
 0x4ab   : > { %1464 = vadd.xlane.f32.xlu1 %v7508_v52  ;;  %v1444_v32 = vmul.f32 1.442695, %v1415_v8  ;;  %v1721_v8 = vsel %vm1224_vm0, %v7359_v25, 0 }
 0x4ac   : > { %1478 = vadd.xlane.f32.xlu0 %v7510_v39 }
 0x4ad   : > { %6215 = vpow2.f32 %v1444_v32 }
 0x4af   : > { %1470 = vadd.xlane.f32.xlu1 %v7514_v59 }
 0x4b0   : > { %1474 = vadd.xlane.f32.xlu0 %v7516_v33 }
 0x4b3   : > { %1466 = vadd.xlane.f32.xlu1 %v7520_v28 }
 0x4b6   : > { %v7525_v19 = vpop.eup %6211 }
 0x4b7   : > { %1472 = vadd.xlane.f32.xlu1 %v7523_v58  ;;  %1480 = vadd.xlane.f32.xlu0 %v7525_v19  ;;  %v7529_v6 = vpop.eup %6213 }
 0x4ba   : > { %v7532_v23 = vpop.eup %6215 }
 0x4bb   : > { %1468 = vadd.xlane.f32.xlu1 %v7529_v6 }
 0x4bf   : > { %1476 = vadd.xlane.f32.xlu1 %v7532_v23 }
 0x4cd   : > { %1661 = vrot.lane.b32.xlu0 %v7329_v57, %s6756_s30 }
 0x4d0   : > { %1659 = vrot.lane.b32.xlu1 %v7337_v26, %s6756_s30 }
 0x4d1   : > { %1635 = vrot.lane.b32.xlu0 %v7210_v31, %s6756_s30 }
 0x4d4   : > { %1637 = vrot.lane.b32.xlu1 %v7224_v10, %s6756_s30 }
 0x4d5   : > { %1639 = vrot.lane.b32.xlu0 %v7230_v34, %s6756_s30 }
 0x4d8   : > { %1641 = vrot.lane.b32.xlu1 %v7236_v43, %s6756_s30 }
 0x4d9   : > { %1643 = vrot.lane.b32.xlu0 %v7247_v30, %s6756_s30 }
 0x4dc   : > { %1645 = vrot.lane.b32.xlu1 %v7257_v61, %s6756_s30 }
 0x4dd   : > { %1647 = vrot.lane.b32.xlu0 %v7267_v17, %s6756_s30 }
 0x4e0   : > { %1649 = vrot.lane.b32.xlu1 %v7285_v38, %s6756_s30 }
 0x4e4   : > { %1992 = vrot.lane.b32.xlu1 %v7242_v51, %s6756_s30 }
 0x4f3   : > { %v1455_v63 = vpop.xlane.xlu0 %1454 }
 0x4f7   : > { %v1457_v18 = vpop.xlane.xlu1 %1456 }
 0x4f8   : > { %v1451_v27 = vpop.xlane.xlu0 %1450  ;;  %6217 = vrcp.f32 %v1457_v18 }
 0x4f9   : > { %6219 = vrcp.f32 %v1451_v27 }
 0x4fa   : > { %6221 = vrcp.f32 %v1455_v63 }
 0x4fb   : > { %v1453_v36 = vpop.xlane.xlu1 %1452 }
 0x4fc   : > { %6223 = vrcp.f32 %v1453_v36  ;;  %v1666_v25 = vpop.permute.xlu0 %1665 }
 0x505   : > { %v6218_v14 = vpop.eup %6217 }
 0x506   : > { %v6220_v12 = vpop.eup %6219  ;;  %v1501_v54 = vmul.f32 %v6218_v14, %v7472_v42  ;;  %v1718_v42 = vsel %vm1224_vm0, %v7463_v5, 0 }
 0x507   : > { %v6222_v7 = vpop.eup %6221  ;;  %v1498_v37 = vmul.f32 %v6220_v12, %v7474_v15  ;;  %v1715_v15 = vsel %vm1224_vm0, %v1670_v46, 0 }
 0x508   : > { %v1500_v47 = vmul.f32 %v6222_v7, %v7469_v62  ;;  %v1712_v62 = vsel %vm1224_vm0, %v7494_v50, 0 }
 0x509   : > { %v6224_v22 = vpop.eup %6223 }
 0x50a   : > { %v1499_v20 = vmul.f32 %v6224_v22, %v7478_v48  ;;  %v1515_v21 = vpack.c.bf16 %v1501_v54, %v1500_v47  ;;  %v1664_v48 = vpop.permute.xlu1 %1663 }
 0x50c   : > { %v1514_v53 = vpack.c.bf16 %v1499_v20, %v1498_v37 }
 0x50e   : > { %5602 = vmatprep.mubr.bf16.mxu1 %v1514_v53 }
 0x50f   : > { %5603 = vmatmul.mubr.bf16.vlgmr.msra.gmra.mxu1 %v1515_v21 }
 0x510   : > { %5619 = vmatpush3.bf16.xpose.msra.mxu1 %v1721_v8 }
 0x511   : > { %5899 = vmatprep.subr.msk.bf16.mxu1 %vm1224_vm0, %v7463_v5  ;;  %v1709_v5 = vsel %vm1224_vm0, %v1666_v25, 0 }
 0x518   : > { %5621 = vmatpush3.bf16.xpose.msra.mxu1 %v1718_v42 }
 0x519   : > { %5900 = vmatprep.subr.msk.bf16.mxu1 %vm1224_vm0, %v1670_v46 }
 0x520   : > { %5623 = vmatpush3.bf16.xpose.msra.mxu1 %v1715_v15 }
 0x521   : > { %5901 = vmatprep.subr.msk.bf16.mxu1 %vm1224_vm0, %v7494_v50  ;;  %v1706_v50 = vsel %vm1224_vm0, %v1664_v48, 0 }
 0x528   : > { %5625 = vmatpush3.bf16.xpose.msra.mxu1 %v1712_v62 }
 0x529   : > { %5902 = vmatprep.subr.msk.bf16.mxu1 %vm1224_vm0, %v1666_v25 }
 0x52d   : > { %v1463_v32 = vpop.xlane.xlu0 %1462 }
 0x530   : > { %5627 = vmatpush3.bf16.xpose.msra.mxu1 %v1709_v5  ;;  %v1459_v63 = vpop.xlane.xlu1 %1458 }
 0x531   : > { %6225 = vrcp.f32 %v1459_v63  ;;  %5903 = vmatprep.subr.msk.bf16.mxu1 %vm1224_vm0, %v1664_v48  ;;  %v1461_v46 = vpop.xlane.xlu0 %1460  ;;  %v6065_v63 = vld [vmem:[#allocation8 + $0x8] sm:$0xff]  }
 0x532   : > { %6227 = vrcp.f32 %v1461_v46 }
 0x533   : > { %6229 = vrcp.f32 %v1463_v32 }
 0x534   : > { %v1465_v18 = vpop.xlane.xlu1 %1464 }
 0x535   : > { %6231 = vrcp.f32 %v1465_v18  ;;  %v1479_v27 = vpop.xlane.xlu0 %1478 }
 0x538   : > { %5629 = vmatpush3.bf16.xpose.msra.mxu1 %v1706_v50  ;;  %v1471_v36 = vpop.xlane.xlu1 %1470 }
 0x539   : > { %v1475_v14 = vpop.xlane.xlu0 %1474 }
 0x53c   : > { %v1467_v12 = vpop.xlane.xlu1 %1466 }
 0x53e   : > { %v6226_v7 = vpop.eup %6225 }
 0x53f   : > { %v6228_v22 = vpop.eup %6227  ;;  %v1502_v54 = vmul.f32 %v6226_v7, %v7501_v35 }
 0x540   : > { %v6230_v37 = vpop.eup %6229  ;;  %v1473_v20 = vpop.xlane.xlu1 %1472  ;;  %v1503_v53 = vmul.f32 %v6228_v22, %v7503_v49 }
 0x541   : > { %v1481_v47 = vpop.xlane.xlu0 %1480  ;;  %6233 = vrcp.f32 %v1473_v20  ;;  %v1504_v42 = vmul.f32 %v6230_v37, %v7496_v56 }
 0x542   : > { %v6232_v21 = vpop.eup %6231  ;;  %v1516_v8 = vpack.c.bf16 %v1503_v53, %v1502_v54  ;;  %6235 = vrcp.f32 %v1467_v12 }
 0x543   : > { %v1505_v15 = vmul.f32 %v6232_v21, %v7508_v52  ;;  %6237 = vrcp.f32 %v1471_v36 }
 0x544   : > { %5606 = vmatprep.mubr.bf16.mxu1 %v1516_v8  ;;  %v1469_v62 = vpop.xlane.xlu1 %1468 }
 0x545   : > { %v1662_v25 = vpop.permute.xlu0 %1661  ;;  %6239 = vrcp.f32 %v1469_v62  ;;  %v1517_v48 = vpack.c.bf16 %v1505_v15, %v1504_v42 }
 0x546   : > { %5904 = vmatprep.subr.msk.bf16.mxu1 %vm1224_vm0, %v1662_v25  ;;  %v1703_v35 = vsel %vm1224_vm0, %v1662_v25, 0  ;;  %6241 = vrcp.f32 %v1475_v14 }
 0x547   : > { %5631 = vmatpush3.bf16.xpose.msra.mxu1 %v1703_v35 }
 0x548   : > { %5607 = vmatmul.mubr.bf16.gmra.mxu1 %v1517_v48  ;;  %v1477_v49 = vpop.xlane.xlu1 %1476 }
 0x549   : > { %6243 = vrcp.f32 %v1477_v49  ;;  %v1636_v8 = vpop.permute.xlu0 %1635 }
 0x54a   : > { %6245 = vrcp.f32 %v1481_v47 }
 0x54b   : > { %6247 = vrcp.f32 %v1479_v27 }
 0x54c   : > { %v1660_v56 = vpop.permute.xlu1 %1659 }
 0x54d   : > { %5905 = vmatprep.subr.msk.bf16.mxu1 %vm1224_vm0, %v1660_v56  ;;  %v1700_v52 = vsel %vm1224_vm0, %v1660_v56, 0  ;;  %v1640_v15 = vpop.permute.xlu0 %1639 }
 0x54e   : > { %v6234_v32 = vpop.eup %6233 }
 0x54f   : > { %5633 = vmatpush3.bf16.xpose.msra.mxu1 %v1700_v52  ;;  %v6236_v5 = vpop.eup %6235  ;;  %v1509_v50 = vmul.f32 %v6234_v32, %v7523_v58 }
 0x550   : > { %v6238_v46 = vpop.eup %6237  ;;  %5702 = vmatprep.subr.bf16.mxu1 %v6065_v63  ;;  %v1506_v36 = vmul.f32 %v6236_v5, %v7520_v28  ;;  %v1638_v42 = vpop.permute.xlu1 %1637 }
 0x551   : > { %v1508_v27 = vmul.f32 %v6238_v46, %v7514_v59  ;;  %v6066_v59 = vld [vmem:[#allocation8] sm:$0xff]  }
 0x552   : > { %v6240_v18 = vpop.eup %6239 }
 0x553   : > { %v1507_v14 = vmul.f32 %v6240_v18, %v7529_v6  ;;  %v6242_v12 = vpop.eup %6241  ;;  %v1519_v54 = vpack.c.bf16 %v1509_v50, %v1508_v27 }
 0x554   : > { %v1510_v20 = vmul.f32 %v6242_v12, %v7516_v33  ;;  %v1642_v33 = vpop.permute.xlu1 %1641 }
 0x555   : > { %v1518_v7 = vpack.c.bf16 %v1507_v14, %v1506_v36 }
 0x556   : > { %v6244_v22 = vpop.eup %6243 }
 0x557   : > { %v6246_v37 = vpop.eup %6245  ;;  %5610 = vmatprep.mubr.bf16.mxu1 %v1518_v7  ;;  %v1511_v47 = vmul.f32 %v6244_v22, %v7532_v23 }
 0x558   : > { %5611 = vmatmul.mubr.bf16.gmra.mxu1 %v1519_v54  ;;  %v6248_v53 = vpop.eup %6247  ;;  %v1513_v21 = vmul.f32 %v6246_v37, %v7525_v19  ;;  %v1644_v19 = vpop.permute.xlu0 %1643 }
 0x559   : > { %v1520_v58 = vpack.c.bf16 %v1511_v47, %v1510_v20  ;;  %v1512_v28 = vmul.f32 %v6248_v53, %v7510_v39  ;;  %v1646_v39 = vpop.permute.xlu1 %1645 }
 0x55b   : > { %5614 = vmatprep.mubr.bf16.mxu1 %v1520_v58  ;;  %v1521_v6 = vpack.c.bf16 %v1513_v21, %v1512_v28 }
 0x55c   : > { %v1648_v23 = vpop.permute.xlu0 %1647 }
 0x55d   : > { %v1650_v62 = vpop.permute.xlu1 %1649 }
 0x560   : > { %5615 = vmatmul.mubr.bf16.gmra.mxu1 %v1521_v6 }
 0x561   : > { %5634 = vmatprep.mubr.msk.bf16.mxu1 %vm1224_vm0, %v1636_v8 }
 0x568   : > { %5635 = vmatmul.mubr.msk.bf16.vlgmr.msra.gmra.mxu1 %vm1224_vm0, %v1638_v42 }
 0x569   : > { %5638 = vmatprep.mubr.msk.bf16.mxu1 %vm1224_vm0, %v1640_v15  ;;  %5703 = vmatpush3.bf16.msra.mxu1 %v6065_v63 }
 0x56a   : > { %5704 = vmatprep.subr.bf16.mxu1 %v6066_v59 }
 0x56d   : > { %5705 = vmatpush3.bf16.msra.mxu1 %v6066_v59 }
 0x570   : > { %5639 = vmatmul.mubr.msk.bf16.gmra.mxu1 %vm1224_vm0, %v1642_v33 }
 0x571   : > { %5642 = vmatprep.mubr.msk.bf16.mxu1 %vm1224_vm0, %v1644_v19 }
 0x578   : > { %5643 = vmatmul.mubr.msk.bf16.gmra.mxu1 %vm1224_vm0, %v1646_v39 }
 0x579   : > { %5646 = vmatprep.mubr.msk.bf16.mxu1 %vm1224_vm0, %v1648_v23 }
 0x580   : > { %5647 = vmatmul.mubr.msk.bf16.gmra.mxu1 %vm1224_vm0, %v1650_v62 }
 0x5cf   : > { %v5604_v25 = vpop.f32.mrf.mxu1 }
 0x5d1   : > { %v1556_v35 = vpop.f32.mrf.mxu1 }
 0x5d3   : > { %v5605_v48 = vpop.f32.mrf.mxu1 }
 0x5d4   : > { %v1620_v52 = vpack.c.bf16 %v5605_v48, %v5604_v25 }
 0x5d5   : > { %v1559_v49 = vpop.f32.mrf.mxu1 }
 0x5d6   : > { %v1619_v56 = vpack.c.bf16 %v1559_v49, %v1556_v35 }
 0x5d8   : > { %5706 = vmatprep.mubr.msk.bf16.mxu1 %vm1224_vm0, %v1619_v56 }
 0x5d9   : > { %5707 = vmatmul.mubr.msk.bf16.vlgmr.msra.gmra.mxu1 %vm1224_vm0, %v1620_v52 }
 0x608   : > { %v5608_v32 = vpop.f32.mrf.mxu1 }
 0x60a   : > { %v1572_v5 = vpop.f32.mrf.mxu1 }
 0x60c   : > { %v5609_v63 = vpop.f32.mrf.mxu1 }
 0x60d   : > { %v1622_v50 = vpack.c.bf16 %v5609_v63, %v5608_v32 }
 0x60e   : > { %v1575_v46 = vpop.f32.mrf.mxu1 }
 0x60f   : > { %v1621_v18 = vpack.c.bf16 %v1575_v46, %v1572_v5 }
 0x611   : > { %5710 = vmatprep.mubr.msk.bf16.mxu1 %vm1224_vm0, %v1621_v18  ;;  %v9012_v18 = vld [vmem:[#allocation24_spill] sm:$0xff] }
 0x612   : > { %5711 = vmatmul.mubr.msk.bf16.gmra.mxu1 %vm1224_vm0, %v1622_v50 }
 0x618   : > { %v5612_v36 = vpop.f32.mrf.mxu1 }
 0x61a   : > { %v1588_v14 = vpop.f32.mrf.mxu1 }
 0x61c   : > { %v5613_v12 = vpop.f32.mrf.mxu1 }
 0x61d   : > { %v1624_v22 = vpack.c.bf16 %v5613_v12, %v5612_v36  ;;  %v1993_v36 = vpop.permute.xlu1 %1992 }
 0x61e   : > { %v1591_v27 = vpop.f32.mrf.mxu1 }
 0x61f   : > { %v1623_v7 = vpack.c.bf16 %v1591_v27, %v1588_v14 }
 0x620   : > { %v5616_v54 = vpop.f32.mrf.mxu1 }
 0x621   : > { %5714 = vmatprep.mubr.msk.bf16.mxu1 %vm1224_vm0, %v1623_v7 }
 0x622   : > { %v1604_v37 = vpop.f32.mrf.mxu1  ;;  %5715 = vmatmul.mubr.msk.bf16.gmra.mxu1 %vm1224_vm0, %v1624_v22 }
 0x624   : > { %v5617_v20 = vpop.f32.mrf.mxu1 }
 0x625   : > { %v1626_v58 = vpack.c.bf16 %v5617_v20, %v5616_v54 }
 0x626   : > { %v1607_v47 = vpop.f32.mrf.mxu1 }
 0x627   : > { %v1625_v53 = vpack.c.bf16 %v1607_v47, %v1604_v37 }
 0x628   : > { %v5636_v21 = vpop.f32.mrf.mxu1 }
 0x629   : > { %v1766_v28 = vadd.f32 %v5636_v21, %v7363_v2  ;;  %5718 = vmatprep.mubr.msk.bf16.mxu1 %vm1224_vm0, %v1625_v53 }
 0x62a   : > { %v1757_v6 = vpop.f32.mrf.mxu1  ;;  %5719 = vmatmul.mubr.msk.bf16.gmra.mxu1 %vm1224_vm0, %v1626_v58 }
 0x62b   : > { %1824 = vmax.xlane.f32.xlu0 %v1766_v28  ;;  %v1758_v59 = vadd.f32 %v1757_v6, %v7368_v44 }
 0x62c   : > { %v5637_v8 = vpop.f32.mrf.mxu1 }
 0x62d   : > { %v1769_v19 = vadd.f32 %v5637_v8, %v7370_v45 }
 0x62e   : > { %v1760_v42 = vpop.f32.mrf.mxu1 }
 0x62f   : > { %1820 = vmax.xlane.f32.xlu0 %v1758_v59  ;;  %v1761_v15 = vadd.f32 %v1760_v42, %v7381_v11 }
 0x630   : > { %v5640_v33 = vpop.f32.mrf.mxu1 }
 0x631   : > { %1822 = vmax.xlane.f32.xlu1 %v1761_v15 }
 0x632   : > { %v1773_v39 = vpop.f32.mrf.mxu1 }
 0x633   : > { %1826 = vmax.xlane.f32.xlu0 %v1769_v19 }
 0x634   : > { %v5641_v2 = vpop.f32.mrf.mxu1 }
 0x635   : > { %v7614_v23 = vadd.f32 %v5641_v2, %v7393_v13 }
 0x636   : > { %v1776_v62 = vpop.f32.mrf.mxu1 }
 0x637   : > { %1834 = vmax.xlane.f32.xlu1 %v7614_v23  ;;  %v7618_v44 = vadd.f32 %v1776_v62, %v7405_v16 }
 0x638   : > { %v5644_v25 = vpop.f32.mrf.mxu1 }
 0x639   : > { %v7647_v5 = vadd.f32 %v5644_v25, %v7403_v9  ;;  %v9010_v9 = vld [vmem:[#allocation21_spill] sm:$0xff] }
 0x63a   : > { %v1789_v35 = vpop.f32.mrf.mxu1 }
 0x63b   : > { %1830 = vmax.xlane.f32.xlu1 %v7618_v44 }
 0x63c   : > { %v5645_v11 = vpop.f32.mrf.mxu1 }
 0x63d   : > { %v7622_v45 = vadd.f32 %v5645_v11, %v7417_v1 }
 0x63e   : > { %v1792_v48 = vpop.f32.mrf.mxu1 }
 0x63f   : > { %1842 = vmax.xlane.f32.xlu1 %v7622_v45  ;;  %v7626_v13 = vadd.f32 %v1792_v48, %v7429_v41  ;;  %v7642_v41 = vadd.f32 %v5640_v33, %v7379_v4  ;;  %v9008_v4 = vld [vmem:[#allocation31_spill] sm:$0xff] }
 0x640   : > { %v5648_v49 = vpop.f32.mrf.mxu1 }
 0x641   : > { %v7655_v63 = vadd.f32 %v5648_v49, %v7427_v40 }
 0x642   : > { %v1805_v56 = vpop.f32.mrf.mxu1 }
 0x643   : > { %1838 = vmax.xlane.f32.xlu1 %v7626_v13  ;;  %v7659_v46 = vadd.f32 %v1805_v56, %v9008_v4 }
 0x644   : > { %v5649_v52 = vpop.f32.mrf.mxu1 }
 0x645   : > { %v7630_v16 = vadd.f32 %v5649_v52, %v7451_v55  ;;  %v1774_v55 = vadd.f32 %v1773_v39, %v7391_v60  ;;  %v9009_v60 = vld [vmem:[#allocation20_spill] sm:$0xff] }
 0x646   : > { %v1808_v32 = vpop.f32.mrf.mxu1 }
 0x647   : > { %1850 = vmax.xlane.f32.xlu1 %v7630_v16  ;;  %v7636_v1 = vadd.f32 %v1808_v32, %v7456_v24  ;;  %v7651_v24 = vadd.f32 %v1789_v35, %v7415_v29  ;;  %v9011_v29 = vld [vmem:[#allocation22_spill] sm:$0xff] }
 0x649   : > { %1994 = vrot.lane.b32.xlu0 %v7238_v3, %s6756_s30 }
 0x64b   : > { %1846 = vmax.xlane.f32.xlu1 %v7636_v1 }
 0x65c   : > { %1984 = vrot.lane.b32.xlu1 %v7263_v0, %s6756_s30 }
 0x668   : > { %1832 = vmax.xlane.f32.xlu0 %v7642_v41 }
 0x66c   : > { %1828 = vmax.xlane.f32.xlu0 %v1774_v55 }
 0x670   : > { %1840 = vmax.xlane.f32.xlu0 %v7647_v5 }
 0x674   : > { %1836 = vmax.xlane.f32.xlu0 %v7651_v24 }
 0x678   : > { %1848 = vmax.xlane.f32.xlu0 %v7655_v63 }
 0x67c   : > { %1844 = vmax.xlane.f32.xlu0 %v7659_v46 }
 0x692   : > { %1990 = vrot.lane.b32.xlu0 %v9009_v60, %s6756_s30 }
 0x696   : > { %1988 = vrot.lane.b32.xlu0 %v9010_v9, %s6756_s30 }
 0x69a   : > { %1986 = vrot.lane.b32.xlu0 %v9011_v29, %s6756_s30 }
 0x69e   : > { %1982 = vrot.lane.b32.xlu0 %v9012_v18, %s6756_s30 }
 0x6b4   : > { %v1825_v40 = vpop.xlane.xlu0 %1824 }
 0x6b5   : > { %v1854_v50 = vsub.f32 %v1766_v28, %v1825_v40 }
 0x6b7   : > { %v1872_v14 = vmul.f32 1.442695, %v1854_v50 }
 0x6b8   : > { %v1821_v12 = vpop.xlane.xlu0 %1820 }
 0x6b9   : > { %6249 = vpow2.f32 %v1872_v14  ;;  %v1852_v27 = vsub.f32 %v1758_v59, %v1821_v12 }
 0x6ba   : > { %v1823_v7 = vpop.xlane.xlu1 %1822 }
 0x6bb   : > { %v1868_v22 = vmul.f32 1.442695, %v1852_v27  ;;  %v1853_v37 = vsub.f32 %v1761_v15, %v1823_v7  ;;  %v9013_v15 = vld [vmem:[#allocation25_spill] sm:$0xff] }
 0x6bc   : > { %v1827_v54 = vpop.xlane.xlu0 %1826 }
 0x6bd   : > { %6251 = vpow2.f32 %v1868_v22  ;;  %v1855_v20 = vsub.f32 %v1769_v19, %v1827_v54  ;;  %v1870_v58 = vmul.f32 1.442695, %v1853_v37 }
 0x6bf   : > { %v1874_v47 = vmul.f32 1.442695, %v1855_v20 }
 0x6c0   : > { %v1995_v53 = vpop.permute.xlu0 %1994  ;;  %v1835_v59 = vpop.xlane.xlu1 %1834 }
 0x6c1   : > { %6253 = vpow2.f32 %v1874_v47  ;;  %5650 = vmatprep.subr.bf16.mxu0 %v1995_v53  ;;  %v1859_v52 = vsub.f32 %v7614_v23, %v1835_v59 }
 0x6c2   : > { %5651 = vmatpush3.bf16.msra.mxu0 %v1995_v53  ;;  %6255 = vpow2.f32 %v1870_v58 }
 0x6c3   : > { %5652 = vmatprep.subr.bf16.mxu0 %v1993_v36 }
 0x6c4   : > { %v1831_v42 = vpop.xlane.xlu1 %1830 }
 0x6c5   : > { %v1857_v39 = vsub.f32 %v7618_v44, %v1831_v42  ;;  %v1882_v44 = vmul.f32 1.442695, %v1859_v52  ;;  %v9016_v52 = vld [vmem:[#allocation28_spill] sm:$0xff] }
 0x6c6   : > { %v7670_v21 = vpop.eup %6249  ;;  %5653 = vmatpush3.bf16.msra.mxu0 %v1993_v36 }
 0x6c7   : > { %1904 = vadd.xlane.f32.xlu1 %v7670_v21  ;;  %v1878_v25 = vmul.f32 1.442695, %v1857_v39 }
 0x6c8   : > { %v1843_v33 = vpop.xlane.xlu1 %1842 }
 0x6c9   : > { %6257 = vpow2.f32 %v1878_v25  ;;  %v1863_v40 = vsub.f32 %v7622_v45, %v1843_v33 }
 0x6ca   : > { %v7673_v28 = vpop.eup %6251 }
 0x6cb   : > { %1900 = vadd.xlane.f32.xlu1 %v7673_v28  ;;  %v1890_v12 = vmul.f32 1.442695, %v1863_v40  ;;  %v9019_v40 = vld [vmem:[#allocation29_spill] sm:$0xff] }
 0x6cc   : > { %v1839_v19 = vpop.xlane.xlu1 %1838 }
 0x6cd   : > { %v1861_v35 = vsub.f32 %v7626_v13, %v1839_v19 }
 0x6ce   : > { %v7676_v6 = vpop.eup %6253 }
 0x6cf   : > { %1906 = vadd.xlane.f32.xlu1 %v7676_v6  ;;  %v7679_v8 = vpop.eup %6255  ;;  %v1886_v32 = vmul.f32 1.442695, %v1861_v35 }
 0x6d0   : > { %v1851_v62 = vpop.xlane.xlu1 %1850 }
 0x6d1   : > { %v1867_v23 = vsub.f32 %v7630_v16, %v1851_v62 }
 0x6d3   : > { %1902 = vadd.xlane.f32.xlu1 %v7679_v8  ;;  %v1898_v22 = vmul.f32 1.442695, %v1867_v23 }
 0x6d4   : > { %v1847_v50 = vpop.xlane.xlu1 %1846 }
 0x6d5   : > { %v1865_v14 = vsub.f32 %v7636_v1, %v1847_v50 }
 0x6d6   : > { %v7693_v37 = vpop.eup %6257 }
 0x6e4   : > { %1980 = vrot.lane.b32.xlu1 %v9013_v15, %s6756_s30  ;;  %s8822_s30 = scalar_lea.vmem [#allocation13], %s5030_s1  ;;  %s5209_s1 = sshll.u32 %s6853_s14, 11 }
 0x6e5   : > { %s8872_s9 = scalar_lea.hbm %s9048_s17, %s5209_s1  ;;  %s6759_s14 = smov [#allocation13]  }
 0x6f1   : > { %v1833_v2 = vpop.xlane.xlu0 %1832 }
 0x6f2   : > { %v1858_v48 = vsub.f32 %v7642_v41, %v1833_v2  ;;  %v1985_v2 = vpop.permute.xlu1 %1984 }
 0x6f4   : > { %v1880_v36 = vmul.f32 1.442695, %v1858_v48 }
 0x6f5   : > { %v1829_v11 = vpop.xlane.xlu0 %1828 }
 0x6f6   : > { %v1856_v49 = vsub.f32 %v1774_v55, %v1829_v11  ;;  %v1894_v55 = vmul.f32 1.442695, %v1865_v14 }
 0x6f8   : > { %v1876_v56 = vmul.f32 1.442695, %v1856_v49  ;;  %v9014_v49 = vld [vmem:[#allocation23_spill] sm:$0xff] }
 0x6f9   : > { %v1841_v4 = vpop.xlane.xlu0 %1840 }
 0x6fa   : > { %6259 = vpow2.f32 %v1876_v56  ;;  %v1862_v45 = vsub.f32 %v7647_v5, %v1841_v4  ;;  %v9015_v56 = vld [vmem:[#allocation27_spill] sm:$0xff]  ;;  %v9018_v4 = vld [vmem:[#allocation26_spill] sm:$0xff] }
 0x6fb   : > { %6261 = vpow2.f32 %v1886_v32  ;;  %v9017_v32 = vld [vmem:[#allocation30_spill] sm:$0xff] }
 0x6fc   : > { %6263 = vpow2.f32 %v1880_v36  ;;  %v1888_v1 = vmul.f32 1.442695, %v1862_v45 }
 0x6fd   : > { %v1837_v13 = vpop.xlane.xlu0 %1836  ;;  %6265 = vpow2.f32 %v1882_v44 }
 0x6fe   : > { %v1860_v41 = vsub.f32 %v7651_v24, %v1837_v13  ;;  %6267 = vpow2.f32 %v1890_v12  ;;  %v6067_v13 = vld [vmem:[#allocation8 + $0x18] sm:$0xff]  }
 0x6ff   : > { %6269 = vpow2.f32 %v1894_v55  ;;  %v6068_v55 = vld [vmem:[#allocation8 + $0x10] sm:$0xff]  }
 0x700   : > { %v1884_v7 = vmul.f32 1.442695, %v1860_v41 }
 0x701   : > { %v1849_v27 = vpop.xlane.xlu0 %1848 }
 0x702   : > { %6271 = vpow2.f32 %v1884_v7  ;;  %v1866_v5 = vsub.f32 %v7655_v63, %v1849_v27 }
 0x703   : > { %6273 = vpow2.f32 %v1898_v22 }
 0x704   : > { %6275 = vpow2.f32 %v1888_v1  ;;  %v1896_v42 = vmul.f32 1.442695, %v1866_v5 }
 0x705   : > { %v1845_v54 = vpop.xlane.xlu0 %1844 }
 0x706   : > { %v1864_v20 = vsub.f32 %v7659_v46, %v1845_v54 }
 0x707   : > { %v7696_v47 = vpop.eup %6259 }
 0x708   : > { %1910 = vadd.xlane.f32.xlu1 %v7693_v37  ;;  %1908 = vadd.xlane.f32.xlu0 %v7696_v47  ;;  %v7700_v24 = vpop.eup %6261  ;;  %v1892_v53 = vmul.f32 1.442695, %v1864_v20 }
 0x709   : > { %v1991_v16 = vpop.permute.xlu0 %1990  ;;  %v7703_v58 = vpop.eup %6263 }
 0x70a   : > { %5654 = vmatprep.subr.bf16.mxu0 %v1991_v16  ;;  %v7707_v59 = vpop.eup %6265  ;;  %6277 = vpow2.f32 %v1892_v53 }
 0x70b   : > { %5655 = vmatpush3.bf16.msra.mxu0 %v1991_v16  ;;  %v7709_v33 = vpop.eup %6267  ;;  %6279 = vpow2.f32 %v1896_v42 }
 0x70c   : > { %1918 = vadd.xlane.f32.xlu1 %v7700_v24  ;;  %1912 = vadd.xlane.f32.xlu0 %v7703_v58  ;;  %v7713_v19 = vpop.eup %6269 }
 0x70d   : > { %v1989_v46 = vpop.permute.xlu0 %1988 }
 0x70e   : > { %5656 = vmatprep.subr.bf16.mxu0 %v1989_v46 }
 0x70f   : > { %5657 = vmatpush3.bf16.msra.mxu0 %v1989_v46  ;;  %v7715_v39 = vpop.eup %6271 }
 0x710   : > { %1922 = vadd.xlane.f32.xlu1 %v7709_v33  ;;  %1914 = vadd.xlane.f32.xlu0 %v7707_v59  ;;  %v7719_v62 = vpop.eup %6273 }
 0x711   : > { %v1987_v63 = vpop.permute.xlu0 %1986  ;;  %v7721_v25 = vpop.eup %6275 }
 0x712   : > { %5658 = vmatprep.subr.bf16.mxu0 %v1987_v63 }
 0x713   : > { %5659 = vmatpush3.bf16.msra.mxu0 %v1987_v63 }
 0x714   : > { %1926 = vadd.xlane.f32.xlu1 %v7713_v19  ;;  %1916 = vadd.xlane.f32.xlu0 %v7715_v39 }
 0x715   : > { %5660 = vmatprep.subr.bf16.mxu0 %v1985_v2  ;;  %v1983_v35 = vpop.permute.xlu0 %1982 }
 0x717   : > { %5661 = vmatpush3.bf16.msra.mxu0 %v1985_v2  ;;  %v7725_v11 = vpop.eup %6277 }
 0x718   : > { %1930 = vadd.xlane.f32.xlu1 %v7719_v62  ;;  %1920 = vadd.xlane.f32.xlu0 %v7721_v25  ;;  %v7728_v48 = vpop.eup %6279 }
 0x719   : > { %5662 = vmatprep.subr.bf16.mxu0 %v1983_v35 }
 0x71b   : > { %5663 = vmatpush3.bf16.msra.mxu0 %v1983_v35 }
 0x71c   : > { %1924 = vadd.xlane.f32.xlu0 %v7725_v11 }
 0x720   : > { %1928 = vadd.xlane.f32.xlu0 %v7728_v48 }
 0x729   : > { %2403 = vrot.lane.b32.xlu1 %v9014_v49, %s6757_s22 }
 0x72d   : > { %2401 = vrot.lane.b32.xlu1 %v9015_v56, %s6757_s22 }
 0x731   : > { %2399 = vrot.lane.b32.xlu1 %v9016_v52, %s6757_s22 }
 0x735   : > { %2395 = vrot.lane.b32.xlu1 %v9017_v32, %s6757_s22 }
 0x736   : > { %2405 = vrot.lane.b32.xlu0 %v9018_v4, %s6757_s22 }
 0x739   : > { %2391 = vrot.lane.b32.xlu1 %v7337_v26, %s6757_s22 }
 0x73a   : > { %2397 = vrot.lane.b32.xlu0 %v9019_v40, %s6757_s22 }
 0x73d   : > { %2377 = vrot.lane.b32.xlu1 %v7224_v10, %s6757_s22 }
 0x73e   : > { %2393 = vrot.lane.b32.xlu0 %v7329_v57, %s6757_s22 }
 0x741   : > { %2381 = vrot.lane.b32.xlu1 %v7236_v43, %s6757_s22 }
 0x742   : > { %2375 = vrot.lane.b32.xlu0 %v7210_v31, %s6757_s22 }
 0x745   : > { %2385 = vrot.lane.b32.xlu1 %v7257_v61, %s6757_s22 }
 0x746   : > { %2379 = vrot.lane.b32.xlu0 %v7230_v34, %s6757_s22 }
 0x749   : > { %2389 = vrot.lane.b32.xlu1 %v7285_v38, %s6757_s22 }
 0x74a   : > { %2383 = vrot.lane.b32.xlu0 %v7247_v30, %s6757_s22 }
 0x74d   : > { %3010 = vrot.lane.b32.xlu1 %v9014_v49, %s6758_s16 }
 0x74e   : > { %2387 = vrot.lane.b32.xlu0 %v7267_v17, %s6757_s22 }
 0x750   : > { %v1905_v50 = vpop.xlane.xlu1 %1904 }
 0x751   : > { %3006 = vrot.lane.b32.xlu1 %v9016_v52, %s6758_s16 }
 0x752   : > { %3012 = vrot.lane.b32.xlu0 %v9018_v4, %s6758_s16 }
 0x754   : > { %v1901_v36 = vpop.xlane.xlu1 %1900 }
 0x755   : > { %3002 = vrot.lane.b32.xlu1 %v9017_v32, %s6758_s16 }
 0x756   : > { %3008 = vrot.lane.b32.xlu0 %v9015_v56, %s6758_s16 }
 0x758   : > { %v1907_v44 = vpop.xlane.xlu1 %1906 }
 0x759   : > { %2998 = vrot.lane.b32.xlu1 %v7337_v26, %s6758_s16  ;;  %6281 = vrcp.f32 %v1907_v44 }
 0x75a   : > { %3004 = vrot.lane.b32.xlu0 %v9019_v40, %s6758_s16  ;;  %6283 = vrcp.f32 %v1901_v36 }
 0x75b   : > { %6285 = vrcp.f32 %v1905_v50 }
 0x75c   : > { %v1903_v14 = vpop.xlane.xlu1 %1902 }
 0x75d   : > { %6287 = vrcp.f32 %v1903_v14  ;;  %2984 = vrot.lane.b32.xlu1 %v7224_v10, %s6758_s16 }
 0x75e   : > { %3000 = vrot.lane.b32.xlu0 %v7329_v57, %s6758_s16 }
 0x760   : > { %v1981_v12 = vpop.permute.xlu1 %1980 }
 0x761   : > { %2988 = vrot.lane.b32.xlu1 %v7236_v43, %s6758_s16  ;;  %5664 = vmatprep.subr.bf16.mxu0 %v1981_v12 }
 0x762   : > { %2982 = vrot.lane.b32.xlu0 %v7210_v31, %s6758_s16  ;;  %5665 = vmatpush3.bf16.msra.mxu0 %v1981_v12 }
 0x763   : > { %5682 = vmatprep.subr.bf16.mxu0 %v6067_v13 }
 0x765   : > { %2992 = vrot.lane.b32.xlu1 %v7257_v61, %s6758_s16 }
 0x766   : > { %2986 = vrot.lane.b32.xlu0 %v7230_v34, %s6758_s16  ;;  %v6282_v10 = vpop.eup %6281 }
 0x767   : > { %v6284_v26 = vpop.eup %6283  ;;  %v1951_v31 = vmul.f32 %v6282_v10, %v7676_v6 }
 0x768   : > { %v6286_v57 = vpop.eup %6285  ;;  %v1948_v43 = vmul.f32 %v6284_v26, %v7673_v28 }
 0x769   : > { %2996 = vrot.lane.b32.xlu1 %v7285_v38, %s6758_s16  ;;  %v1950_v61 = vmul.f32 %v6286_v57, %v7670_v21 }
 0x76a   : > { %v6288_v41 = vpop.eup %6287  ;;  %2990 = vrot.lane.b32.xlu0 %v7247_v30, %s6758_s16 }
 0x76b   : > { %v1949_v23 = vmul.f32 %v6288_v41, %v7679_v8  ;;  %v1965_v38 = vpack.c.bf16 %v1951_v31, %v1950_v61 }
 0x76d   : > { %2716 = vrot.lane.b32.xlu1 %v7242_v51, %s6757_s22  ;;  %v1964_v34 = vpack.c.bf16 %v1949_v23, %v1948_v43 }
 0x76e   : > { %2994 = vrot.lane.b32.xlu0 %v7267_v17, %s6758_s16 }
 0x76f   : > { %5666 = vmatprep.mubr.bf16.mxu0 %v1964_v34 }
 0x770   : > { %5667 = vmatmul.mubr.bf16.vlgmr.msra.gmra.mxu0 %v1965_v38 }
 0x771   : > { %5683 = vmatpush3.bf16.msra.mxu0 %v6067_v13 }
 0x772   : > { %2718 = vrot.lane.b32.xlu0 %v7238_v3, %s6757_s22  ;;  %5684 = vmatprep.subr.bf16.mxu0 %v6068_v55 }
 0x775   : > { %5685 = vmatpush3.bf16.msra.mxu0 %v6068_v55 }
 0x776   : > { %2714 = vrot.lane.b32.xlu0 %v9009_v60, %s6757_s22 }
 0x791   : > { %v1911_v30 = vpop.xlane.xlu1 %1910  ;;  %v1909_v21 = vpop.xlane.xlu0 %1908 }
 0x792   : > { %6289 = vrcp.f32 %v1911_v30 }
 0x793   : > { %6291 = vrcp.f32 %v1909_v21 }
 0x795   : > { %v1919_v28 = vpop.xlane.xlu1 %1918  ;;  %v1913_v6 = vpop.xlane.xlu0 %1912 }
 0x796   : > { %6293 = vrcp.f32 %v1913_v6 }
 0x799   : > { %v1923_v17 = vpop.xlane.xlu1 %1922  ;;  %v1915_v8 = vpop.xlane.xlu0 %1914 }
 0x79a   : > { %6295 = vrcp.f32 %v1915_v8 }
 0x79b   : > { %6297 = vrcp.f32 %v1919_v28 }
 0x79d   : > { %v1927_v27 = vpop.xlane.xlu1 %1926  ;;  %v1917_v45 = vpop.xlane.xlu0 %1916 }
 0x79e   : > { %6299 = vrcp.f32 %v1917_v45 }
 0x79f   : > { %v6290_v7 = vpop.eup %6289  ;;  %6301 = vrcp.f32 %v1923_v17 }
 0x7a0   : > { %v6292_v22 = vpop.eup %6291  ;;  %v1953_v54 = vmul.f32 %v6290_v7, %v7693_v37 }
 0x7a1   : > { %v1931_v1 = vpop.xlane.xlu1 %1930  ;;  %v1921_v20 = vpop.xlane.xlu0 %1920  ;;  %v1952_v16 = vmul.f32 %v6292_v22, %v7696_v47 }
 0x7a2   : > { %6303 = vrcp.f32 %v1921_v20 }
 0x7a3   : > { %v1966_v5 = vpack.c.bf16 %v1953_v54, %v1952_v16  ;;  %6305 = vrcp.f32 %v1927_v27  ;;  %v6294_v42 = vpop.eup %6293 }
 0x7a4   : > { %v1954_v37 = vmul.f32 %v6294_v42, %v7703_v58 }
 0x7a5   : > { %5670 = vmatprep.mubr.bf16.mxu0 %v1966_v5  ;;  %v7807_v53 = vpop.permute.xlu1 %2403  ;;  %v1925_v46 = vpop.xlane.xlu0 %1924 }
 0x7a6   : > { %6307 = vrcp.f32 %v1925_v46 }
 0x7a7   : > { %v6296_v63 = vpop.eup %6295  ;;  %6309 = vrcp.f32 %v1931_v1 }
 0x7a8   : > { %v1955_v49 = vmul.f32 %v6296_v63, %v7707_v59  ;;  %v6298_v56 = vpop.eup %6297 }
 0x7a9   : > { %v7809_v2 = vpop.permute.xlu1 %2401  ;;  %v1929_v35 = vpop.xlane.xlu0 %1928  ;;  %v1957_v50 = vmul.f32 %v6298_v56, %v7700_v24 }
 0x7aa   : > { %6311 = vrcp.f32 %v1929_v35  ;;  %v1967_v47 = vpack.c.bf16 %v1955_v49, %v1954_v37 }
 0x7ab   : > { %v6300_v52 = vpop.eup %6299 }
 0x7ac   : > { %5671 = vmatmul.mubr.bf16.gmra.mxu0 %v1967_v47  ;;  %v1956_v40 = vmul.f32 %v6300_v52, %v7715_v39  ;;  %v6302_v36 = vpop.eup %6301 }
 0x7ad   : > { %v7813_v32 = vpop.permute.xlu1 %2399  ;;  %v7815_v4 = vpop.permute.xlu0 %2405  ;;  %v1959_v10 = vmul.f32 %v6302_v36, %v7709_v33 }
 0x7ae   : > { %5906 = vmatprep.subr.msk.bf16.mxu0 %vm1224_vm0, %v7815_v4  ;;  %v1968_v58 = vpack.c.bf16 %v1957_v50, %v1956_v40 }
 0x7af   : > { %v6304_v44 = vpop.eup %6303 }
 0x7b0   : > { %v6306_v59 = vpop.eup %6305  ;;  %5674 = vmatprep.mubr.bf16.mxu0 %v1968_v58  ;;  %v1958_v12 = vmul.f32 %v6304_v44, %v7721_v25  ;;  %v2453_v58 = vsel %vm1224_vm0, %v7815_v4, 0  ;;  %v2450_v44 = vsel %vm1224_vm0, %v7807_v53, 0  ;;  %v2444_v4 = vsel %vm1224_vm0, %v7813_v32, 0 }
 0x7b1   : > { %v7821_v14 = vpop.permute.xlu1 %2395  ;;  %v7823_v13 = vpop.permute.xlu0 %2397  ;;  %v1961_v57 = vmul.f32 %v6306_v59, %v7713_v19  ;;  %v2447_v59 = vsel %vm1224_vm0, %v7809_v2, 0 }
 0x7b2   : > { %v1969_v39 = vpack.c.bf16 %v1959_v10, %v1958_v12 }
 0x7b3   : > { %v6308_v26 = vpop.eup %6307 }
 0x7b4   : > { %v1960_v24 = vmul.f32 %v6308_v26, %v7725_v11  ;;  %v6310_v41 = vpop.eup %6309  ;;  %5675 = vmatmul.mubr.bf16.gmra.mxu0 %v1969_v39 }
 0x7b5   : > { %v7829_v31 = vpop.permute.xlu1 %2391  ;;  %v7831_v43 = vpop.permute.xlu0 %2393  ;;  %v1963_v25 = vmul.f32 %v6310_v41, %v7719_v62 }
 0x7b6   : > { %v1970_v23 = vpack.c.bf16 %v1961_v57, %v1960_v24  ;;  %v2432_v26 = vsel %vm1224_vm0, %v7829_v31, 0 }
 0x7b7   : > { %v6312_v61 = vpop.eup %6311 }
 0x7b8   : > { %5678 = vmatprep.mubr.bf16.mxu0 %v1970_v23  ;;  %v1962_v34 = vmul.f32 %v6312_v61, %v7728_v48 }
 0x7b9   : > { %v7835_v33 = vpop.permute.xlu1 %2377  ;;  %v7837_v38 = vpop.permute.xlu0 %2375 }
 0x7ba   : > { %v1971_v11 = vpack.c.bf16 %v1963_v25, %v1962_v34 }
 0x7bc   : > { %5679 = vmatmul.mubr.bf16.gmra.mxu0 %v1971_v11 }
 0x7bd   : > { %v7839_v19 = vpop.permute.xlu1 %2381  ;;  %v7841_v55 = vpop.permute.xlu0 %2379 }
 0x7c1   : > { %v7843_v30 = vpop.permute.xlu1 %2385  ;;  %v7845_v21 = vpop.permute.xlu0 %2383 }
 0x7c5   : > { %v7847_v28 = vpop.permute.xlu1 %2389  ;;  %v7849_v6 = vpop.permute.xlu0 %2387 }
 0x7c9   : > { %v7851_v48 = vpop.permute.xlu1 %3010  ;;  %v7853_v62 = vpop.permute.xlu0 %3012 }
 0x7cd   : > { %v7855_v17 = vpop.permute.xlu1 %3006  ;;  %v7857_v8 = vpop.permute.xlu0 %3008 }
 0x7d1   : > { %v7859_v27 = vpop.permute.xlu1 %3002  ;;  %v7861_v45 = vpop.permute.xlu0 %3004 }
 0x7d5   : > { %v7863_v7 = vpop.permute.xlu1 %2998  ;;  %v7865_v22 = vpop.permute.xlu0 %3000 }
 0x7d9   : > { %v7867_v54 = vpop.permute.xlu1 %2984  ;;  %v7869_v1 = vpop.permute.xlu0 %2982 }
 0x7dd   : > { %v7871_v20 = vpop.permute.xlu1 %2988  ;;  %v7873_v16 = vpop.permute.xlu0 %2986 }
 0x7e1   : > { %v7875_v5 = vpop.permute.xlu1 %2992  ;;  %v7877_v46 = vpop.permute.xlu0 %2990 }
 0x7e5   : > { %v7879_v42 = vpop.permute.xlu1 %2996  ;;  %v7881_v63 = vpop.permute.xlu0 %2994 }
 0x7e9   : > { %v2719_v35 = vpop.permute.xlu0 %2718  ;;  %v2717_v37 = vpop.permute.xlu1 %2716 }
 0x7ea   : > { %5754 = vmatprep.subr.bf16.mxu1 %v2719_v35 }
 0x7eb   : > { %5755 = vmatpush3.bf16.msra.mxu1 %v2719_v35 }
 0x7ec   : > { %5756 = vmatprep.subr.bf16.mxu1 %v2717_v37 }
 0x7ed   : > { %v2715_v49 = vpop.permute.xlu0 %2714 }
 0x7ef   : > { %5757 = vmatpush3.bf16.msra.mxu1 %v2717_v37 }
 0x7f0   : > { %5758 = vmatprep.subr.bf16.mxu1 %v2715_v49 }
 0x7f3   : > { %5759 = vmatpush3.bf16.msra.mxu1 %v2715_v49 }
 0x830   : > { %v5668_v56 = vpop.f32.mrf.mxu0 }
 0x832   : > { %v2038_v47 = vpop.f32.mrf.mxu0 }
 0x834   : > { %v5669_v52 = vpop.f32.mrf.mxu0 }
 0x835   : > { %v2102_v36 = vpack.c.bf16 %v5669_v52, %v5668_v56  ;;  %v3060_v56 = vsel %vm1224_vm0, %v7853_v62, 0  ;;  %v8018_v52 = vld [vmem:[#allocation5 + $0x10] sm:$0xff] }
 0x836   : > { %v2041_v40 = vpop.f32.mrf.mxu0 }
 0x837   : > { %v2101_v50 = vpack.c.bf16 %v2041_v40, %v2038_v47  ;;  %v3057_v47 = vsel %vm1224_vm0, %v7851_v48, 0 }
 0x839   : > { %5686 = vmatprep.mubr.msk.bf16.mxu0 %vm1224_vm0, %v2101_v50 }
 0x83a   : > { %5687 = vmatmul.mubr.msk.bf16.vlgmr.msra.gmra.mxu0 %vm1224_vm0, %v2102_v36 }
 0x83b   : > { %5723 = vmatpush3.bf16.xpose.msra.mxu0 %v2453_v58  ;;  %v8024_v58 = vld [vmem:[#allocation5] sm:$0xff] }
 0x83c   : > { %5907 = vmatprep.subr.msk.bf16.mxu0 %vm1224_vm0, %v7807_v53  ;;  %v2441_v53 = vsel %vm1224_vm0, %v7823_v13, 0 }
 0x843   : > { %5725 = vmatpush3.bf16.xpose.msra.mxu0 %v2450_v44 }
 0x844   : > { %5908 = vmatprep.subr.msk.bf16.mxu0 %vm1224_vm0, %v7809_v2  ;;  %v2438_v2 = vsel %vm1224_vm0, %v7821_v14, 0 }
 0x84b   : > { %5727 = vmatpush3.bf16.xpose.msra.mxu0 %v2447_v59 }
 0x84c   : > { %5909 = vmatprep.subr.msk.bf16.mxu0 %vm1224_vm0, %v7813_v32  ;;  %v2435_v32 = vsel %vm1224_vm0, %v7831_v43, 0 }
 0x853   : > { %5729 = vmatpush3.bf16.xpose.msra.mxu0 %v2444_v4  ;;  %v8029_v4 = vld [vmem:[#allocation5 + $0x8] sm:$0xff] }
 0x854   : > { %5910 = vmatprep.subr.msk.bf16.mxu0 %vm1224_vm0, %v7823_v13 }
 0x85b   : > { %5731 = vmatpush3.bf16.xpose.msra.mxu0 %v2441_v53 }
 0x85c   : > { %5911 = vmatprep.subr.msk.bf16.mxu0 %vm1224_vm0, %v7821_v14 }
 0x863   : > { %5733 = vmatpush3.bf16.xpose.msra.mxu0 %v2438_v2 }
 0x864   : > { %5912 = vmatprep.subr.msk.bf16.mxu0 %vm1224_vm0, %v7831_v43 }
 0x86b   : > { %5735 = vmatpush3.bf16.xpose.msra.mxu0 %v2435_v32  ;;  %v8035_v32 = vld [vmem:[#allocation5 + $0x18] sm:$0xff] }
 0x86c   : > { %5913 = vmatprep.subr.msk.bf16.mxu0 %vm1224_vm0, %v7829_v31  ;;  %v5672_v12 = vpop.f32.mrf.mxu0 }
 0x86e   : > { %v2054_v13 = vpop.f32.mrf.mxu0 }
 0x870   : > { %v5673_v10 = vpop.f32.mrf.mxu0 }
 0x871   : > { %v2104_v24 = vpack.c.bf16 %v5673_v10, %v5672_v12  ;;  %v8041_v10 = vld [vmem:[#allocation5 + $0x20] sm:$0xff] }
 0x872   : > { %v2057_v39 = vpop.f32.mrf.mxu0 }
 0x873   : > { %5737 = vmatpush3.bf16.xpose.msra.mxu0 %v2432_v26  ;;  %v2103_v14 = vpack.c.bf16 %v2057_v39, %v2054_v13 }
 0x874   : > { %5914 = vmatprep.subr.msk.bf16.mxu0 %vm1224_vm0, %v7853_v62  ;;  %v5676_v57 = vpop.f32.mrf.mxu0 }
 0x875   : > { %5690 = vmatprep.mubr.msk.bf16.mxu0 %vm1224_vm0, %v2103_v14  ;;  %v8047_v14 = vld [vmem:[#allocation5 + $0x30] sm:$0xff] }
 0x876   : > { %v2070_v41 = vpop.f32.mrf.mxu0  ;;  %5691 = vmatmul.mubr.msk.bf16.gmra.mxu0 %vm1224_vm0, %v2104_v24 }
 0x878   : > { %v5677_v43 = vpop.f32.mrf.mxu0 }
 0x879   : > { %v2106_v34 = vpack.c.bf16 %v5677_v43, %v5676_v57 }
 0x87a   : > { %v2073_v23 = vpop.f32.mrf.mxu0 }
 0x87b   : > { %v2105_v61 = vpack.c.bf16 %v2073_v23, %v2070_v41  ;;  %v8053_v41 = vld [vmem:[#allocation5 + $0x38] sm:$0xff] }
 0x87c   : > { %v5680_v25 = vpop.f32.mrf.mxu0 }
 0x87d   : > { %5694 = vmatprep.mubr.msk.bf16.mxu0 %vm1224_vm0, %v2105_v61  ;;  %v8059_v61 = vld [vmem:[#allocation5 + $0x28] sm:$0xff] }
 0x87e   : > { %v2086_v31 = vpop.f32.mrf.mxu0  ;;  %5695 = vmatmul.mubr.msk.bf16.gmra.mxu0 %vm1224_vm0, %v2106_v34 }
 0x880   : > { %v5681_v11 = vpop.f32.mrf.mxu0 }
 0x881   : > { %v2108_v49 = vpack.c.bf16 %v5681_v11, %v5680_v25  ;;  %v8066_v11 = vld [vmem:[#allocation5 + $0x50] sm:$0xff] }
 0x882   : > { %v2089_v35 = vpop.f32.mrf.mxu0 }
 0x883   : > { %v2107_v37 = vpack.c.bf16 %v2089_v35, %v2086_v31 }
 0x885   : > { %5698 = vmatprep.mubr.msk.bf16.mxu0 %vm1224_vm0, %v2107_v37  ;;  %v8071_v37 = vld [vmem:[#allocation5 + $0x58] sm:$0xff] }
 0x886   : > { %5699 = vmatmul.mubr.msk.bf16.gmra.mxu0 %vm1224_vm0, %v2108_v49 }
 0x887   : > { %5738 = vmatprep.mubr.msk.bf16.mxu0 %vm1224_vm0, %v7837_v38  ;;  %v3051_v38 = vsel %vm1224_vm0, %v7855_v17, 0 }
 0x88e   : > { %5739 = vmatmul.mubr.msk.bf16.vlgmr.msra.gmra.mxu0 %vm1224_vm0, %v7835_v33  ;;  %v3054_v33 = vsel %vm1224_vm0, %v7857_v8, 0 }
 0x88f   : > { %5807 = vmatpush3.bf16.xpose.msra.mxu0 %v3060_v56  ;;  %5742 = vmatprep.mubr.msk.bf16.mxu0 %vm1224_vm0, %v7841_v55  ;;  %v3045_v55 = vsel %vm1224_vm0, %v7859_v27, 0 }
 0x890   : > { %5915 = vmatprep.subr.msk.bf16.mxu0 %vm1224_vm0, %v7851_v48 }
 0x896   : > { %5743 = vmatmul.mubr.msk.bf16.gmra.mxu0 %vm1224_vm0, %v7839_v19  ;;  %v3048_v19 = vsel %vm1224_vm0, %v7861_v45, 0 }
 0x897   : > { %5809 = vmatpush3.bf16.xpose.msra.mxu0 %v3057_v47  ;;  %5746 = vmatprep.mubr.msk.bf16.mxu0 %vm1224_vm0, %v7845_v21  ;;  %v3039_v21 = vsel %vm1224_vm0, %v7863_v7, 0 }
 0x898   : > { %5916 = vmatprep.subr.msk.bf16.mxu0 %vm1224_vm0, %v7857_v8 }
 0x89e   : > { %5747 = vmatmul.mubr.msk.bf16.gmra.mxu0 %vm1224_vm0, %v7843_v30  ;;  %v3042_v30 = vsel %vm1224_vm0, %v7865_v22, 0 }
 0x89f   : > { %5811 = vmatpush3.bf16.xpose.msra.mxu0 %v3054_v33  ;;  %5750 = vmatprep.mubr.msk.bf16.mxu0 %vm1224_vm0, %v7849_v6  ;;  %v8078_v33 = vld [vmem:[#allocation5 + $0x40] sm:$0xff] }
 0x8a0   : > { %5917 = vmatprep.subr.msk.bf16.mxu0 %vm1224_vm0, %v7855_v17 }
 0x8a6   : > { %5751 = vmatmul.mubr.msk.bf16.gmra.mxu0 %vm1224_vm0, %v7847_v28  ;;  %v9020_v28 = vmov 0  }
 0x8a7   : > { %5813 = vmatpush3.bf16.xpose.msra.mxu0 %v3051_v38  ;;  %5822 = vmatprep.mubr.msk.bf16.mxu0 %vm1224_vm0, %v7869_v1 }
 0x8a8   : > { %5918 = vmatprep.subr.msk.bf16.mxu0 %vm1224_vm0, %v7861_v45 }
 0x8af   : > { %5815 = vmatpush3.bf16.xpose.msra.mxu0 %v3048_v19  ;;  %v8083_v19 = vld [vmem:[#allocation5 + $0x48] sm:$0xff] }
 0x8b0   : > { %5919 = vmatprep.subr.msk.bf16.mxu0 %vm1224_vm0, %v7859_v27 }
 0x8b7   : > { %5817 = vmatpush3.bf16.xpose.msra.mxu0 %v3045_v55 }
 0x8b8   : > { %5920 = vmatprep.subr.msk.bf16.mxu0 %vm1224_vm0, %v7865_v22 }
 0x8bf   : > { %5819 = vmatpush3.bf16.xpose.msra.mxu0 %v3042_v30 }
 0x8c0   : > { %5921 = vmatprep.subr.msk.bf16.mxu0 %vm1224_vm0, %v7863_v7 }
 0x8c7   : > { %5821 = vmatpush3.bf16.xpose.msra.mxu0 %v3039_v21 }
 0x8ce   : > { %5823 = vmatmul.mubr.msk.bf16.vlgmr.msra.gmra.mxu0 %vm1224_vm0, %v7867_v54 }
 0x8cf   : > { %5826 = vmatprep.mubr.msk.bf16.mxu0 %vm1224_vm0, %v7873_v16 }
 0x8d6   : > { %5827 = vmatmul.mubr.msk.bf16.gmra.mxu0 %vm1224_vm0, %v7871_v20 }
 0x8d7   : > { %5830 = vmatprep.mubr.msk.bf16.mxu0 %vm1224_vm0, %v7877_v46 }
 0x8de   : > { %5831 = vmatmul.mubr.msk.bf16.gmra.mxu0 %vm1224_vm0, %v7875_v5 }
 0x8df   : > { %5834 = vmatprep.mubr.msk.bf16.mxu0 %vm1224_vm0, %v7881_v63 }
 0x8e6   : > { %5835 = vmatmul.mubr.msk.bf16.gmra.mxu0 %vm1224_vm0, %v7879_v42 }
 0x8e7   : > { %4104 = vmatprep.mubr.bf16.mxu0 %v9020_v28 }
 0x8fa   : > { %v7986_v6 = vpop.f32.mrf.mxu0 }
 0x8fc   : > { %v7988_v48 = vpop.f32.mrf.mxu0 }
 0x8fe   : > { %v7990_v62 = vpop.f32.mrf.mxu0 }
 0x900   : > { %v7992_v17 = vpop.f32.mrf.mxu0 }
 0x901   : > { %9021 = vst [vmem:[#allocation31_spill] sm:$0xff] %v7992_v17 }
 0x936   : > { %v7994_v8 = vpop.f32.mrf.mxu0 }
 0x937   : > { %9022 = vst [vmem:[#allocation20_spill] sm:$0xff] %v7994_v8 }
 0x938   : > { %v7996_v27 = vpop.f32.mrf.mxu0 }
 0x939   : > { %9023 = vst [vmem:[#allocation21_spill] sm:$0xff] %v7996_v27 }
 0x93a   : > { %v7998_v45 = vpop.f32.mrf.mxu0 }
 0x93b   : > { %9024 = vst [vmem:[#allocation22_spill] sm:$0xff] %v7998_v45 }
 0x93c   : > { %v8000_v7 = vpop.f32.mrf.mxu0 }
 0x93d   : > { %9025 = vst [vmem:[#allocation24_spill] sm:$0xff] %v8000_v7 }
 0x93e   : > { %v8002_v22 = vpop.f32.mrf.mxu0 }
 0x93f   : > { %9026 = vst [vmem:[#allocation25_spill] sm:$0xff] %v8002_v22 }
 0x940   : > { %v8004_v54 = vpop.f32.mrf.mxu0 }
 0x941   : > { %9027 = vst [vmem:[#allocation23_spill] sm:$0xff] %v8004_v54 }
 0x942   : > { %v8006_v1 = vpop.f32.mrf.mxu0 }
 0x943   : > { %9028 = vst [vmem:[#allocation27_spill] sm:$0xff] %v8006_v1 }
 0x944   : > { %v8008_v20 = vpop.f32.mrf.mxu0 }
 0x945   : > { %9029 = vst [vmem:[#allocation28_spill] sm:$0xff] %v8008_v20 }
 0x946   : > { %v8010_v16 = vpop.f32.mrf.mxu0 }
 0x947   : > { %9030 = vst [vmem:[#allocation30_spill] sm:$0xff] %v8010_v16 }
 0x948   : > { %v8012_v5 = vpop.f32.mrf.mxu0 }
 0x949   : > { %9031 = vst [vmem:[#allocation26_spill] sm:$0xff] %v8012_v5 }
 0x94a   : > { %v8014_v46 = vpop.f32.mrf.mxu0 }
 0x94b   : > { %9032 = vst [vmem:[#allocation29_spill] sm:$0xff] %v8014_v46 }
 0x94c   : > { %v8016_v42 = vpop.f32.mrf.mxu0 }
 0x94d   : > { %9033 = vst [vmem:[#allocation32_spill] sm:$0xff] %v8016_v42 }
 0x94e   : > { %v5740_v63 = vpop.f32.mrf.mxu0 }
 0x94f   : > { %v8021_v40 = vadd.f32 %v8018_v52, %v5740_v63  ;;  %v8090_v63 = vld [vmem:[#allocation5 + $0x70] sm:$0xff] }
 0x950   : > { %v2489_v50 = vpop.f32.mrf.mxu0 }
 0x951   : > { %2556 = vmax.xlane.f32.xlu0 %v8021_v40  ;;  %v8027_v44 = vadd.f32 %v8024_v58, %v2489_v50 }
 0x952   : > { %v5741_v36 = vpop.f32.mrf.mxu0 }
 0x953   : > { %v8038_v12 = vadd.f32 %v8035_v32, %v5741_v36  ;;  %v8095_v36 = vld [vmem:[#allocation5 + $0x60] sm:$0xff] }
 0x954   : > { %v2492_v59 = vpop.f32.mrf.mxu0 }
 0x955   : > { %v8032_v53 = vadd.f32 %v8029_v4, %v2492_v59  ;;  %2552 = vmax.xlane.f32.xlu0 %v8027_v44 }
 0x956   : > { %v5744_v2 = vpop.f32.mrf.mxu0 }
 0x957   : > { %2554 = vmax.xlane.f32.xlu1 %v8032_v53  ;;  %v8050_v24 = vadd.f32 %v8047_v14, %v5744_v2 }
 0x958   : > { %v2505_v13 = vpop.f32.mrf.mxu0 }
 0x959   : > { %v8044_v26 = vadd.f32 %v8041_v10, %v2505_v13  ;;  %2558 = vmax.xlane.f32.xlu0 %v8038_v12  ;;  %v8102_v13 = vld [vmem:[#allocation5 + $0x78] sm:$0xff] }
 0x95a   : > { %v5745_v39 = vpop.f32.mrf.mxu0 }
 0x95b   : > { %2560 = vmax.xlane.f32.xlu1 %v8044_v26  ;;  %v8056_v43 = vadd.f32 %v8053_v41, %v5745_v39 }
 0x95c   : > { %v2508_v57 = vpop.f32.mrf.mxu0 }
 0x95d   : > { %2564 = vmax.xlane.f32.xlu0 %v8050_v24  ;;  %v8062_v34 = vadd.f32 %v8059_v61, %v2508_v57  ;;  %v8107_v57 = vld [vmem:[#allocation5 + $0x68] sm:$0xff] }
 0x95e   : > { %v5748_v23 = vpop.f32.mrf.mxu0 }
 0x95f   : > { %2566 = vmax.xlane.f32.xlu1 %v8056_v43  ;;  %v8069_v35 = vadd.f32 %v8066_v11, %v5748_v23 }
 0x960   : > { %v2521_v25 = vpop.f32.mrf.mxu0 }
 0x961   : > { %2562 = vmax.xlane.f32.xlu0 %v8062_v34  ;;  %v8081_v38 = vadd.f32 %v8078_v33, %v2521_v25 }
 0x962   : > { %v5749_v31 = vpop.f32.mrf.mxu0 }
 0x963   : > { %v8074_v49 = vadd.f32 %v8071_v37, %v5749_v31 }
 0x964   : > { %v2524_v56 = vpop.f32.mrf.mxu0 }
 0x965   : > { %2572 = vmax.xlane.f32.xlu0 %v8069_v35  ;;  %2574 = vmax.xlane.f32.xlu1 %v8074_v49  ;;  %v8086_v55 = vadd.f32 %v8083_v19, %v2524_v56 }
 0x966   : > { %v5752_v47 = vpop.f32.mrf.mxu0 }
 0x967   : > { %v8093_v50 = vadd.f32 %v8090_v63, %v5752_v47 }
 0x968   : > { %v2537_v30 = vpop.f32.mrf.mxu0 }
 0x969   : > { %2570 = vmax.xlane.f32.xlu1 %v8086_v55  ;;  %2568 = vmax.xlane.f32.xlu0 %v8081_v38  ;;  %v8098_v59 = vadd.f32 %v8095_v36, %v2537_v30 }
 0x96a   : > { %v5753_v21 = vpop.f32.mrf.mxu0 }
 0x96b   : > { %v8105_v39 = vadd.f32 %v8102_v13, %v5753_v21 }
 0x96c   : > { %v2540_v2 = vpop.f32.mrf.mxu0 }
 0x96d   : > { %2580 = vmax.xlane.f32.xlu0 %v8093_v50  ;;  %2576 = vmax.xlane.f32.xlu1 %v8098_v59  ;;  %v8110_v23 = vadd.f32 %v8107_v57, %v2540_v2 }
 0x971   : > { %2578 = vmax.xlane.f32.xlu0 %v8110_v23  ;;  %2582 = vmax.xlane.f32.xlu1 %v8105_v39 }
 0x982   : > { %2710 = vrot.lane.b32.xlu1 %v9011_v29, %s6757_s22 }
 0x986   : > { %2708 = vrot.lane.b32.xlu1 %v7263_v0, %s6757_s22 }
 0x987   : > { %2712 = vrot.lane.b32.xlu0 %v9010_v9, %s6757_s22 }
 0x9da   : > { %v2557_v25 = vpop.xlane.xlu0 %2556 }
 0x9db   : > { %v2586_v31 = vsub.f32 %v8021_v40, %v2557_v25 }
 0x9dd   : > { %v2604_v56 = vmul.f32 1.442695, %v2586_v31 }
 0x9de   : > { %v2553_v47 = vpop.xlane.xlu0 %2552 }
 0x9df   : > { %6313 = vpow2.f32 %v2604_v56  ;;  %v2584_v30 = vsub.f32 %v8027_v44, %v2553_v47 }
 0x9e0   : > { %v2555_v21 = vpop.xlane.xlu1 %2554 }
 0x9e1   : > { %v2600_v2 = vmul.f32 1.442695, %v2584_v30  ;;  %v2585_v28 = vsub.f32 %v8032_v53, %v2555_v21 }
 0x9e2   : > { %v2559_v42 = vpop.xlane.xlu0 %2558 }
 0x9e3   : > { %6315 = vpow2.f32 %v2600_v2  ;;  %v2587_v46 = vsub.f32 %v8038_v12, %v2559_v42  ;;  %v2602_v20 = vmul.f32 1.442695, %v2585_v28 }
 0x9e4   : > { %v2561_v5 = vpop.xlane.xlu1 %2560 }
 0x9e5   : > { %v2606_v16 = vmul.f32 1.442695, %v2587_v46  ;;  %v2588_v1 = vsub.f32 %v8044_v26, %v2561_v5 }
 0x9e6   : > { %v2565_v54 = vpop.xlane.xlu0 %2564 }
 0x9e7   : > { %6317 = vpow2.f32 %v2606_v16  ;;  %v2590_v40 = vsub.f32 %v8050_v24, %v2565_v54  ;;  %v2608_v44 = vmul.f32 1.442695, %v2588_v1 }
 0x9e8   : > { %v2567_v25 = vpop.xlane.xlu1 %2566  ;;  %6319 = vpow2.f32 %v2602_v20 }
 0x9e9   : > { %v2612_v31 = vmul.f32 1.442695, %v2590_v40  ;;  %v2591_v53 = vsub.f32 %v8056_v43, %v2567_v25 }
 0x9ea   : > { %v2563_v56 = vpop.xlane.xlu0 %2562 }
 0x9eb   : > { %6321 = vpow2.f32 %v2612_v31  ;;  %v2589_v47 = vsub.f32 %v8062_v34, %v2563_v56  ;;  %v2614_v5 = vmul.f32 1.442695, %v2591_v53 }
 0x9ec   : > { %v8128_v42 = vpop.eup %6313  ;;  %6323 = vpow2.f32 %v2608_v44 }
 0x9ed   : > { %v2610_v46 = vmul.f32 1.442695, %v2589_v47  ;;  %2636 = vadd.xlane.f32.xlu1 %v8128_v42 }
 0x9ee   : > { %v2575_v28 = vpop.xlane.xlu1 %2574  ;;  %v2573_v16 = vpop.xlane.xlu0 %2572 }
 0x9ef   : > { %6325 = vpow2.f32 %v2610_v46  ;;  %v2594_v54 = vsub.f32 %v8069_v35, %v2573_v16  ;;  %v2595_v26 = vsub.f32 %v8074_v49, %v2575_v28 }
 0x9f0   : > { %v8132_v20 = vpop.eup %6315  ;;  %6327 = vpow2.f32 %v2614_v5 }
 0x9f1   : > { %2632 = vadd.xlane.f32.xlu1 %v8132_v20  ;;  %v2620_v24 = vmul.f32 1.442695, %v2594_v54  ;;  %v2622_v40 = vmul.f32 1.442695, %v2595_v26 }
 0x9f2   : > { %v2571_v1 = vpop.xlane.xlu1 %2570  ;;  %v2569_v12 = vpop.xlane.xlu0 %2568 }
 0x9f3   : > { %v2592_v43 = vsub.f32 %v8081_v38, %v2569_v12  ;;  %6329 = vpow2.f32 %v2620_v24  ;;  %v2593_v25 = vsub.f32 %v8086_v55, %v2571_v1 }
 0x9f4   : > { %v8137_v34 = vpop.eup %6317 }
 0x9f5   : > { %v2616_v30 = vmul.f32 1.442695, %v2592_v43  ;;  %2638 = vadd.xlane.f32.xlu1 %v8137_v34  ;;  %v8140_v35 = vpop.eup %6319  ;;  %v2618_v46 = vmul.f32 1.442695, %v2593_v25 }
 0x9f6   : > { %v2577_v21 = vpop.xlane.xlu1 %2576  ;;  %v2581_v2 = vpop.xlane.xlu0 %2580 }
 0x9f7   : > { %v2598_v31 = vsub.f32 %v8093_v50, %v2581_v2  ;;  %6331 = vpow2.f32 %v2616_v30  ;;  %v2596_v49 = vsub.f32 %v8098_v59, %v2577_v21  ;;  %v5824_v30 = vpop.f32.mrf.mxu0 }
 0x9f8   : > { %v8144_v44 = vpop.eup %6321  ;;  %6333 = vpow2.f32 %v2622_v40 }
 0x9f9   : > { %v2628_v38 = vmul.f32 1.442695, %v2598_v31  ;;  %2634 = vadd.xlane.f32.xlu1 %v8140_v35  ;;  %2644 = vadd.xlane.f32.xlu0 %v8144_v44  ;;  %v8149_v47 = vpop.eup %6323  ;;  %v2624_v55 = vmul.f32 1.442695, %v2596_v49  ;;  %v3096_v21 = vpop.f32.mrf.mxu0 }
 0x9fa   : > { %v2583_v56 = vpop.xlane.xlu1 %2582  ;;  %v2579_v53 = vpop.xlane.xlu0 %2578 }
 0x9fb   : > { %6335 = vpow2.f32 %v2628_v38  ;;  %v5825_v2 = vpop.f32.mrf.mxu0  ;;  %v2597_v38 = vsub.f32 %v8110_v23, %v2579_v53  ;;  %v8205_v53 = vadd.f32 %v8018_v52, %v5824_v30 }
 0x9fc   : > { %v8151_v28 = vpop.eup %6325  ;;  %6337 = vpow2.f32 %v2618_v46 }
 0x9fd   : > { %2640 = vadd.xlane.f32.xlu0 %v8149_v47  ;;  %2642 = vadd.xlane.f32.xlu1 %v8151_v28  ;;  %v8155_v16 = vpop.eup %6327  ;;  %6339 = vpow2.f32 %v2624_v55  ;;  %v3099_v40 = vpop.f32.mrf.mxu0  ;;  %v2599_v55 = vsub.f32 %v8105_v39, %v2583_v56  ;;  %v8197_v56 = vadd.f32 %v8024_v58, %v3096_v21 }
 0x9fe   : > { %v2711_v50 = vpop.permute.xlu1 %2710  ;;  %v2713_v59 = vpop.permute.xlu0 %2712 }
 0x9ff   : > { %5760 = vmatprep.subr.bf16.mxu1 %v2713_v59  ;;  %v5828_v25 = vpop.f32.mrf.mxu0 }
 0xa00   : > { %5761 = vmatpush3.bf16.msra.mxu1 %v2713_v59  ;;  %v8158_v5 = vpop.eup %6329 }
 0xa01   : > { %2646 = vadd.xlane.f32.xlu0 %v8155_v16  ;;  %5762 = vmatprep.subr.bf16.mxu1 %v2711_v50  ;;  %v3112_v31 = vpop.f32.mrf.mxu0 }
 0xa02   : > { %v2709_v54 = vpop.permute.xlu1 %2708  ;;  %v8185_v8 = vadd.f32 %v8041_v10, %v3112_v31  ;;  %v8201_v10 = vadd.f32 %v8029_v4, %v3099_v40  ;;  %v8219_v4 = vadd.f32 %v8047_v14, %v5828_v25 }
 0xa03   : > { %v5829_v49 = vpop.f32.mrf.mxu0 }
 0xa04   : > { %5763 = vmatpush3.bf16.msra.mxu1 %v2711_v50  ;;  %v8160_v1 = vpop.eup %6331  ;;  %v2626_v50 = vmul.f32 1.442695, %v2597_v38  ;;  %v8225_v52 = vadd.f32 %v8053_v41, %v5829_v49 }
 0xa05   : > { %2652 = vadd.xlane.f32.xlu0 %v8158_v5  ;;  %5764 = vmatprep.subr.bf16.mxu1 %v2709_v54  ;;  %v8164_v12 = vpop.eup %6333  ;;  %v3115_v46 = vpop.f32.mrf.mxu0 }
 0xa06   : > { %2648 = vadd.xlane.f32.xlu1 %v8160_v1  ;;  %6341 = vpow2.f32 %v2626_v50  ;;  %v8213_v58 = vadd.f32 %v8059_v61, %v3115_v46 }
 0xa07   : > { %v5832_v59 = vpop.f32.mrf.mxu0 }
 0xa08   : > { %5765 = vmatpush3.bf16.msra.mxu1 %v2709_v54  ;;  %v8166_v26 = vpop.eup %6335  ;;  %v2630_v54 = vmul.f32 1.442695, %v2599_v55 }
 0xa09   : > { %2654 = vadd.xlane.f32.xlu0 %v8164_v12  ;;  %v8170_v24 = vpop.eup %6337  ;;  %v3128_v22 = vpop.f32.mrf.mxu0 }
 0xa0a   : > { %2660 = vadd.xlane.f32.xlu1 %v8166_v26  ;;  %v8172_v43 = vpop.eup %6339  ;;  %6343 = vpow2.f32 %v2630_v54 }
 0xa0b   : > { %v5833_v7 = vpop.f32.mrf.mxu0 }
 0xa0d   : > { %2650 = vadd.xlane.f32.xlu0 %v8170_v24  ;;  %v3131_v45 = vpop.f32.mrf.mxu0 }
 0xa0e   : > { %2656 = vadd.xlane.f32.xlu1 %v8172_v43 }
 0xa0f   : > { %v5836_v17 = vpop.f32.mrf.mxu0 }
 0xa10   : > { %v8192_v39 = vadd.f32 %v8090_v63, %v5836_v17  ;;  %v8209_v17 = vadd.f32 %v8035_v32, %v5825_v2  ;;  %v8241_v32 = vadd.f32 %v8066_v11, %v5832_v59 }
 0xa11   : > { %v3144_v14 = vpop.f32.mrf.mxu0 }
 0xa13   : > { %v8182_v27 = vpop.eup %6341 }
 0xa17   : > { %v8189_v23 = vpop.eup %6343 }
 0xa1f   : > { %2704 = vrot.lane.b32.xlu1 %v9013_v15, %s6757_s22 }
 0xa23   : > { %2706 = vrot.lane.b32.xlu0 %v9012_v18, %s6757_s22  ;;  %s4897_s22 = sshll.u32 %s8822_s30, 4  ;;  %s8874_s22 = int_to_ptr.vmem [resolvable:$true] %s4897_s22 }
 0xa24   : > { %s6663_s19 = scalar_lea.vmem %s8874_s22, 2048 }
 0xa25   : > { %p6664_p10 = scmp.ne.s32.totalorder %s8874_s22, %s6663_s19 }
 0xa27   : > { %p6665_p13 = pnand %p6664_p10, %p9049_p11 }
 0xa29   : > { %p6666_p0 = pneg %p6665_p13 }
 0xa42   : > { %2658 = vadd.xlane.f32.xlu0 %v8182_v27 }
 0xa43   : > { %3167 = vmax.xlane.f32.xlu1 %v8185_v8 }
 0xa46   : > { %2662 = vadd.xlane.f32.xlu0 %v8189_v23 }
 0xa47   : > { %3187 = vmax.xlane.f32.xlu1 %v8192_v39 }
 0xa4a   : > { %3159 = vmax.xlane.f32.xlu0 %v8197_v56 }
 0xa4e   : > { %3161 = vmax.xlane.f32.xlu0 %v8201_v10 }
 0xa52   : > { %3163 = vmax.xlane.f32.xlu0 %v8205_v53 }
 0xa56   : > { %3165 = vmax.xlane.f32.xlu0 %v8209_v17 }
 0xa58   : > { %3325 = vrot.lane.b32.xlu1 %v7238_v3, %s6758_s16  ;;  %v8231_v3 = vadd.f32 %v8078_v33, %v3128_v22  ;;  %v5837_v22 = vpop.f32.mrf.mxu0 }
 0xa59   : > { %v8257_v33 = vadd.f32 %v8102_v13, %v5837_v22 }
 0xa5a   : > { %3169 = vmax.xlane.f32.xlu0 %v8213_v58  ;;  %v3147_v41 = vpop.f32.mrf.mxu0 }
 0xa5b   : > { %v8253_v61 = vadd.f32 %v8107_v57, %v3147_v41 }
 0xa5c   : > { %3323 = vrot.lane.b32.xlu1 %v7242_v51, %s6758_s16  ;;  %v8237_v51 = vadd.f32 %v8083_v19, %v3131_v45 }
 0xa5e   : > { %3171 = vmax.xlane.f32.xlu0 %v8219_v4 }
 0xa60   : > { %3319 = vrot.lane.b32.xlu1 %v9010_v9, %s6758_s16  ;;  %v8245_v9 = vadd.f32 %v8071_v37, %v5833_v7 }
 0xa62   : > { %3173 = vmax.xlane.f32.xlu0 %v8225_v52 }
 0xa64   : > { %3317 = vrot.lane.b32.xlu1 %v9011_v29, %s6758_s16  ;;  %v8249_v29 = vadd.f32 %v8095_v36, %v3144_v14 }
 0xa66   : > { %3175 = vmax.xlane.f32.xlu0 %v8231_v3 }
 0xa6a   : > { %3177 = vmax.xlane.f32.xlu0 %v8237_v51 }
 0xa6e   : > { %3179 = vmax.xlane.f32.xlu0 %v8241_v32 }
 0xa72   : > { %3181 = vmax.xlane.f32.xlu0 %v8245_v9 }
 0xa76   : > { %v2637_v45 = vpop.xlane.xlu1 %2636  ;;  %3183 = vmax.xlane.f32.xlu0 %v8249_v29 }
 0xa7a   : > { %v2633_v11 = vpop.xlane.xlu1 %2632  ;;  %3185 = vmax.xlane.f32.xlu0 %v8253_v61 }
 0xa7b   : > { %6345 = vrcp.f32 %v2633_v11 }
 0xa7e   : > { %v2639_v7 = vpop.xlane.xlu1 %2638  ;;  %3189 = vmax.xlane.f32.xlu0 %v8257_v33 }
 0xa82   : > { %v2635_v37 = vpop.xlane.xlu1 %2634  ;;  %v2645_v19 = vpop.xlane.xlu0 %2644 }
 0xa83   : > { %6347 = vrcp.f32 %v2635_v37  ;;  %v6070_v37 = vld [vmem:[#allocation8 + $0x20] sm:$0xff]  }
 0xa84   : > { %6349 = vrcp.f32 %v2639_v7 }
 0xa86   : > { %v2641_v63 = vpop.xlane.xlu0 %2640  ;;  %v2643_v36 = vpop.xlane.xlu1 %2642 }
 0xa87   : > { %6351 = vrcp.f32 %v2643_v36 }
 0xa88   : > { %v6346_v57 = vpop.eup %6345  ;;  %6353 = vrcp.f32 %v2641_v63 }
 0xa89   : > { %6355 = vrcp.f32 %v2637_v45  ;;  %v2680_v13 = vmul.f32 %v6346_v57, %v8132_v20 }
 0xa8a   : > { %v2647_v30 = vpop.xlane.xlu0 %2646 }
 0xa8b   : > { %6357 = vrcp.f32 %v2647_v30 }
 0xa8c   : > { %6359 = vrcp.f32 %v2645_v19 }
 0xa8e   : > { %v2653_v21 = vpop.xlane.xlu0 %2652 }
 0xa8f   : > { %v2649_v2 = vpop.xlane.xlu1 %2648 }
 0xa90   : > { %v6348_v40 = vpop.eup %6347 }
 0xa91   : > { %v2681_v25 = vmul.f32 %v6348_v40, %v8140_v35  ;;  %v6350_v50 = vpop.eup %6349 }
 0xa92   : > { %v2655_v31 = vpop.xlane.xlu0 %2654  ;;  %v2683_v22 = vmul.f32 %v6350_v50, %v8137_v34 }
 0xa93   : > { %v2661_v49 = vpop.xlane.xlu1 %2660  ;;  %v2696_v38 = vpack.c.bf16 %v2681_v25, %v2680_v13 }
 0xa94   : > { %3321 = vrot.lane.b32.xlu0 %v9009_v60, %s6758_s16  ;;  %v6352_v59 = vpop.eup %6351  ;;  %v6069_v60 = vld [vmem:[#allocation8 + $0x28] sm:$0xff]  }
 0xa95   : > { %5770 = vmatprep.mubr.bf16.mxu1 %v2696_v38  ;;  %v6354_v14 = vpop.eup %6353  ;;  %v2685_v45 = vmul.f32 %v6352_v59, %v8151_v28 }
 0xa96   : > { %v2651_v46 = vpop.xlane.xlu0 %2650  ;;  %v6356_v20 = vpop.eup %6355  ;;  %v2684_v41 = vmul.f32 %v6354_v14, %v8149_v47 }
 0xa97   : > { %v2657_v55 = vpop.xlane.xlu1 %2656  ;;  %6361 = vrcp.f32 %v2651_v46  ;;  %v2682_v11 = vmul.f32 %v6356_v20, %v8128_v42 }
 0xa98   : > { %6363 = vrcp.f32 %v2649_v2  ;;  %v6358_v19 = vpop.eup %6357  ;;  %v2698_v63 = vpack.c.bf16 %v2685_v45, %v2684_v41 }
 0xa99   : > { %6365 = vrcp.f32 %v2655_v31  ;;  %v2697_v7 = vpack.c.bf16 %v2683_v22, %v2682_v11  ;;  %v6360_v36 = vpop.eup %6359  ;;  %v2687_v57 = vmul.f32 %v6358_v19, %v8155_v16 }
 0xa9a   : > { %v2707_v54 = vpop.permute.xlu0 %2706  ;;  %6367 = vrcp.f32 %v2653_v21  ;;  %v2686_v28 = vmul.f32 %v6360_v36, %v8144_v44 }
 0xa9b   : > { %5766 = vmatprep.subr.bf16.mxu1 %v2707_v54  ;;  %v2705_v35 = vpop.permute.xlu1 %2704  ;;  %6369 = vrcp.f32 %v2657_v55 }
 0xa9c   : > { %5767 = vmatpush3.bf16.msra.mxu1 %v2707_v54  ;;  %v2699_v21 = vpack.c.bf16 %v2687_v57, %v2686_v28 }
 0xa9d   : > { %5768 = vmatprep.subr.bf16.mxu1 %v2705_v35 }
 0xaa0   : > { %5769 = vmatpush3.bf16.msra.mxu1 %v2705_v35 }
 0xaa1   : > { %5786 = vmatprep.subr.bf16.mxu1 %v6069_v60 }
 0xaa3   : > { %5771 = vmatmul.mubr.bf16.vlgmr.msra.gmra.mxu1 %v2697_v7 }
 0xaa4   : > { %v6362_v30 = vpop.eup %6361  ;;  %5774 = vmatprep.mubr.bf16.mxu1 %v2698_v63  ;;  %5787 = vmatpush3.bf16.msra.mxu1 %v6069_v60 }
 0xaa5   : > { %v6364_v34 = vpop.eup %6363  ;;  %5788 = vmatprep.subr.bf16.mxu1 %v6070_v37  ;;  %v2689_v47 = vmul.f32 %v6362_v30, %v8170_v24 }
 0xaa6   : > { %v2688_v42 = vmul.f32 %v6364_v34, %v8160_v1  ;;  %v6366_v2 = vpop.eup %6365 }
 0xaa7   : > { %v6368_v13 = vpop.eup %6367  ;;  %v2691_v25 = vmul.f32 %v6366_v2, %v8164_v12 }
 0xaa8   : > { %5789 = vmatpush3.bf16.msra.mxu1 %v6070_v37  ;;  %v2700_v40 = vpack.c.bf16 %v2689_v47, %v2688_v42  ;;  %v2690_v31 = vmul.f32 %v6368_v13, %v8158_v5  ;;  %v6370_v59 = vpop.eup %6369 }
 0xaa9   : > { %v2692_v5 = vmul.f32 %v6370_v59, %v8172_v43 }
 0xaaa   : > { %v2701_v38 = vpack.c.bf16 %v2691_v25, %v2690_v31 }
 0xaab   : > { %5775 = vmatmul.mubr.bf16.gmra.mxu1 %v2699_v21 }
 0xaac   : > { %5778 = vmatprep.mubr.bf16.mxu1 %v2700_v40 }
 0xab3   : > { %5779 = vmatmul.mubr.bf16.gmra.mxu1 %v2701_v38 }
 0xacb   : > { %v2659_v16 = vpop.xlane.xlu0 %2658 }
 0xacc   : > { %v3168_v24 = vpop.xlane.xlu1 %3167  ;;  %6371 = vrcp.f32 %v2659_v16 }
 0xacd   : > { %6373 = vrcp.f32 %v2661_v49  ;;  %v3195_v63 = vsub.f32 %v8185_v8, %v3168_v24 }
 0xacf   : > { %v2663_v44 = vpop.xlane.xlu0 %2662  ;;  %v3215_v57 = vmul.f32 1.442695, %v3195_v63 }
 0xad0   : > { %v8274_v1 = vpop.xlane.xlu1 %3187  ;;  %6375 = vrcp.f32 %v2663_v44 }
 0xad3   : > { %v3160_v46 = vpop.xlane.xlu0 %3159 }
 0xad4   : > { %v8276_v50 = vpop.permute.xlu1 %3325  ;;  %v3191_v49 = vsub.f32 %v8197_v56, %v3160_v46 }
 0xad5   : > { %5838 = vmatprep.subr.bf16.mxu1 %v8276_v50 }
 0xad6   : > { %v3207_v37 = vmul.f32 1.442695, %v3191_v49 }
 0xad7   : > { %v3162_v12 = vpop.xlane.xlu0 %3161 }
 0xad8   : > { %v3192_v19 = vsub.f32 %v8201_v10, %v3162_v12 }
 0xad9   : > { %v6372_v54 = vpop.eup %6371 }
 0xada   : > { %v2693_v55 = vmul.f32 %v6372_v54, %v8182_v27  ;;  %v6374_v14 = vpop.eup %6373  ;;  %v3209_v36 = vmul.f32 1.442695, %v3192_v19 }
 0xadb   : > { %v3164_v20 = vpop.xlane.xlu0 %3163  ;;  %v2694_v45 = vmul.f32 %v6374_v14, %v8166_v26 }
 0xadc   : > { %v3193_v35 = vsub.f32 %v8205_v53, %v3164_v20  ;;  %v2702_v22 = vpack.c.bf16 %v2693_v55, %v2692_v5  ;;  %v8326_v55 = vpop.f32.mrf.mxu1 }
 0xadd   : > { %v6376_v60 = vpop.eup %6375 }
 0xade   : > { %v3211_v41 = vmul.f32 1.442695, %v3193_v35  ;;  %5782 = vmatprep.mubr.bf16.mxu1 %v2702_v22  ;;  %v2695_v11 = vmul.f32 %v6376_v60, %v8189_v23  ;;  %v8331_v20 = vpop.f32.mrf.mxu1 }
 0xadf   : > { %v3166_v7 = vpop.xlane.xlu0 %3165 }
 0xae0   : > { %6377 = vpow2.f32 %v3211_v41  ;;  %v3194_v43 = vsub.f32 %v8209_v17, %v3166_v7  ;;  %v2703_v27 = vpack.c.bf16 %v2695_v11, %v2694_v45 }
 0xae1   : > { %6379 = vpow2.f32 %v3207_v37 }
 0xae2   : > { %5783 = vmatmul.mubr.bf16.gmra.mxu1 %v2703_v27  ;;  %v3213_v53 = vmul.f32 1.442695, %v3194_v43 }
 0xae3   : > { %v3170_v56 = vpop.xlane.xlu0 %3169 }
 0xae4   : > { %6381 = vpow2.f32 %v3213_v53  ;;  %v3196_v26 = vsub.f32 %v8213_v58, %v3170_v56 }
 0xae5   : > { %6383 = vpow2.f32 %v3209_v36 }
 0xae6   : > { %v3217_v47 = vmul.f32 1.442695, %v3196_v26 }
 0xae7   : > { %v3172_v30 = vpop.xlane.xlu0 %3171 }
 0xae8   : > { %v3197_v23 = vsub.f32 %v8219_v4, %v3172_v30 }
 0xaea   : > { %v3219_v34 = vmul.f32 1.442695, %v3197_v23 }
 0xaeb   : > { %v3174_v17 = vpop.xlane.xlu0 %3173 }
 0xaec   : > { %6385 = vpow2.f32 %v3219_v34  ;;  %v3198_v10 = vsub.f32 %v8225_v52, %v3174_v17 }
 0xaed   : > { %v8291_v28 = vpop.eup %6377  ;;  %6387 = vpow2.f32 %v3215_v57 }
 0xaee   : > { %3243 = vadd.xlane.f32.xlu0 %v8291_v28  ;;  %6389 = vpow2.f32 %v3217_v47  ;;  %v3221_v8 = vmul.f32 1.442695, %v3198_v10  ;;  %v8294_v42 = vpop.eup %6379 }
 0xaef   : > { %v3176_v13 = vpop.xlane.xlu0 %3175 }
 0xaf0   : > { %6391 = vpow2.f32 %v3221_v8  ;;  %v3199_v16 = vsub.f32 %v8231_v3, %v3176_v13 }
 0xaf1   : > { %v8297_v58 = vpop.eup %6381 }
 0xaf2   : > { %3239 = vadd.xlane.f32.xlu0 %v8294_v42  ;;  %v8300_v4 = vpop.eup %6383  ;;  %v3223_v44 = vmul.f32 1.442695, %v3199_v16 }
 0xaf3   : > { %v3178_v25 = vpop.xlane.xlu0 %3177 }
 0xaf4   : > { %v3200_v59 = vsub.f32 %v8237_v51, %v3178_v25  ;;  %6393 = vpow2.f32 %v3223_v44 }
 0xaf6   : > { %3245 = vadd.xlane.f32.xlu0 %v8297_v58  ;;  %v3225_v5 = vmul.f32 1.442695, %v3200_v59 }
 0xaf7   : > { %v3180_v31 = vpop.xlane.xlu0 %3179 }
 0xaf8   : > { %v3201_v46 = vsub.f32 %v8241_v32, %v3180_v31  ;;  %v3205_v32 = vsub.f32 %v8192_v39, %v8274_v1 }
 0xaf9   : > { %v8302_v21 = vpop.eup %6385 }
 0xafa   : > { %3241 = vadd.xlane.f32.xlu0 %v8300_v4  ;;  %3251 = vadd.xlane.f32.xlu1 %v8302_v21  ;;  %v8306_v52 = vpop.eup %6387  ;;  %v3227_v54 = vmul.f32 1.442695, %v3201_v46  ;;  %v3235_v35 = vmul.f32 1.442695, %v3205_v32 }
 0xafb   : > { %v8308_v2 = vpop.eup %6389  ;;  %v3182_v38 = vpop.xlane.xlu0 %3181 }
 0xafc   : > { %6395 = vpow2.f32 %v3227_v54 }
 0xafd   : > { %v8312_v40 = vpop.eup %6391  ;;  %6397 = vpow2.f32 %v3225_v5 }
 0xafe   : > { %3249 = vadd.xlane.f32.xlu0 %v8308_v2  ;;  %3247 = vadd.xlane.f32.xlu1 %v8306_v52 }
 0xaff   : > { %v3184_v24 = vpop.xlane.xlu0 %3183 }
 0xb01   : > { %v8336_v60 = vpop.eup %6393 }
 0xb02   : > { %3253 = vadd.xlane.f32.xlu1 %v8312_v40 }
 0xb03   : > { %v3186_v12 = vpop.xlane.xlu0 %3185 }
 0xb04   : > { %v3204_v3 = vsub.f32 %v8253_v61, %v3186_v12 }
 0xb06   : > { %v3233_v49 = vmul.f32 1.442695, %v3204_v3 }
 0xb07   : > { %v3190_v14 = vpop.xlane.xlu0 %3189 }
 0xb09   : > { %v8341_v61 = vpop.eup %6395 }
 0xb0b   : > { %v3322_v44 = vpop.permute.xlu0 %3321 }
 0xb13   : > { %3313 = vrot.lane.b32.xlu1 %v9012_v18, %s6758_s16  ;;  %v3202_v18 = vsub.f32 %v8245_v9, %v3182_v38  ;;  %v3206_v9 = vsub.f32 %v8257_v33, %v3190_v14  ;;  %v8346_v33 = vpop.eup %6397  ;;  %v3324_v38 = vpop.permute.xlu1 %3323 }
 0xb14   : > { %3315 = vrot.lane.b32.xlu0 %v7263_v0, %s6758_s16  ;;  %v3203_v0 = vsub.f32 %v8249_v29, %v3184_v24  ;;  %v8334_v29 = vpop.f32.mrf.mxu1 }
 0xb15   : > { %v3237_v22 = vmul.f32 1.442695, %v3206_v9 }
 0xb16   : > { %v3231_v51 = vmul.f32 1.442695, %v3203_v0  ;;  %v8339_v39 = vpop.f32.mrf.mxu1 }
 0xb17   : > { %3311 = vrot.lane.b32.xlu1 %v9013_v15, %s6758_s16  ;;  %v3229_v15 = vmul.f32 1.442695, %v3202_v18  ;;  %v3320_v54 = vpop.permute.xlu1 %3319 }
 0xb18   : > { %v8343_v1 = vpop.f32.mrf.mxu1 }
 0xb19   : > { %6399 = vpow2.f32 %v3229_v15 }
 0xb1a   : > { %6401 = vpow2.f32 %v3231_v51  ;;  %v8350_v45 = vpop.f32.mrf.mxu1 }
 0xb1b   : > { %6403 = vpow2.f32 %v3233_v49  ;;  %v3318_v15 = vpop.permute.xlu1 %3317 }
 0xb1c   : > { %6405 = vpow2.f32 %v3235_v35  ;;  %v8358_v37 = vpop.f32.mrf.mxu1 }
 0xb1d   : > { %6407 = vpow2.f32 %v3237_v22 }
 0xb1e   : > { %v8366_v19 = vpop.f32.mrf.mxu1 }
 0xb20   : > { %v8370_v56 = vpop.f32.mrf.mxu1 }
 0xb22   : > { %v8372_v53 = vpop.f32.mrf.mxu1 }
 0xb24   : > { %v8374_v63 = vpop.f32.mrf.mxu1 }
 0xb26   : > { %v8348_v41 = vpop.eup %6399  ;;  %v8376_v36 = vpop.f32.mrf.mxu1 }
 0xb27   : > { %v8354_v11 = vpop.eup %6401 }
 0xb28   : > { %v8356_v7 = vpop.eup %6403  ;;  %v8378_v30 = vpop.f32.mrf.mxu1 }
 0xb29   : > { %v8362_v43 = vpop.eup %6405 }
 0xb2a   : > { %v8364_v27 = vpop.eup %6407  ;;  %v8380_v26 = vpop.f32.mrf.mxu1 }
 0xb2c   : > { %v8382_v23 = vpop.f32.mrf.mxu1 }
 0xb2e   : > { %v8384_v34 = vpop.f32.mrf.mxu1 }
 0xb33   : > { %3255 = vadd.xlane.f32.xlu0 %v8336_v60 }
 0xb37   : > { %3259 = vadd.xlane.f32.xlu0 %v8341_v61 }
 0xb3b   : > { %3257 = vadd.xlane.f32.xlu1 %v8346_v33  ;;  %3261 = vadd.xlane.f32.xlu0 %v8348_v41 }
 0xb3f   : > { %3263 = vadd.xlane.f32.xlu1 %v8354_v11  ;;  %3265 = vadd.xlane.f32.xlu0 %v8356_v7 }
 0xb43   : > { %3267 = vadd.xlane.f32.xlu1 %v8362_v43  ;;  %3269 = vadd.xlane.f32.xlu0 %v8364_v27 }
 0xb63   : > { %v5772_v57 = vpop.f32.mrf.mxu1 }
 0xb65   : > { %v2762_v17 = vpop.f32.mrf.mxu1 }
 0xb67   : > { %v5773_v47 = vpop.f32.mrf.mxu1 }
 0xb68   : > { %v2826_v13 = vpack.c.bf16 %v5773_v47, %v5772_v57 }
 0xb69   : > { %v2765_v10 = vpop.f32.mrf.mxu1 }
 0xb6a   : > { %v2825_v8 = vpack.c.bf16 %v2765_v10, %v2762_v17 }
 0xb6b   : > { %v5776_v25 = vpop.f32.mrf.mxu1 }
 0xb6c   : > { %5790 = vmatprep.mubr.msk.bf16.mxu1 %vm1224_vm0, %v2825_v8 }
 0xb6d   : > { %v2778_v31 = vpop.f32.mrf.mxu1  ;;  %5791 = vmatmul.mubr.msk.bf16.vlgmr.msra.gmra.mxu1 %vm1224_vm0, %v2826_v13 }
 0xb6e   : > { %5839 = vmatpush3.bf16.msra.mxu1 %v8276_v50 }
 0xb6f   : > { %5840 = vmatprep.subr.bf16.mxu1 %v3324_v38  ;;  %v5777_v16 = vpop.f32.mrf.mxu1 }
 0xb70   : > { %v2828_v59 = vpack.c.bf16 %v5777_v16, %v5776_v25 }
 0xb71   : > { %v2781_v24 = vpop.f32.mrf.mxu1 }
 0xb72   : > { %v2827_v46 = vpack.c.bf16 %v2781_v24, %v2778_v31  ;;  %5841 = vmatpush3.bf16.msra.mxu1 %v3324_v38 }
 0xb73   : > { %5842 = vmatprep.subr.bf16.mxu1 %v3322_v44  ;;  %v5780_v12 = vpop.f32.mrf.mxu1 }
 0xb74   : > { %5794 = vmatprep.mubr.msk.bf16.mxu1 %vm1224_vm0, %v2827_v46 }
 0xb75   : > { %v2794_v18 = vpop.f32.mrf.mxu1  ;;  %5795 = vmatmul.mubr.msk.bf16.gmra.mxu1 %vm1224_vm0, %v2828_v59 }
 0xb76   : > { %5843 = vmatpush3.bf16.msra.mxu1 %v3322_v44 }
 0xb77   : > { %5844 = vmatprep.subr.bf16.mxu1 %v3320_v54  ;;  %v5781_v5 = vpop.f32.mrf.mxu1  ;;  %v3244_v0 = vpop.xlane.xlu0 %3243 }
 0xb78   : > { %v2830_v14 = vpack.c.bf16 %v5781_v5, %v5780_v12 }
 0xb79   : > { %v2797_v50 = vpop.f32.mrf.mxu1 }
 0xb7a   : > { %v2829_v3 = vpack.c.bf16 %v2797_v50, %v2794_v18  ;;  %5845 = vmatpush3.bf16.msra.mxu1 %v3320_v54 }
 0xb7b   : > { %5846 = vmatprep.subr.bf16.mxu1 %v3318_v15  ;;  %v3240_v32 = vpop.xlane.xlu0 %3239 }
 0xb7c   : > { %5798 = vmatprep.mubr.msk.bf16.mxu1 %vm1224_vm0, %v2829_v3 }
 0xb7d   : > { %5799 = vmatmul.mubr.msk.bf16.gmra.mxu1 %vm1224_vm0, %v2830_v14 }
 0xb7e   : > { %5847 = vmatpush3.bf16.msra.mxu1 %v3318_v15 }
 0xb7f   : > { %v3246_v51 = vpop.xlane.xlu0 %3245 }
 0xb83   : > { %v3252_v49 = vpop.xlane.xlu1 %3251  ;;  %v3242_v9 = vpop.xlane.xlu0 %3241 }
 0xb84   : > { %6409 = vrcp.f32 %v3242_v9 }
 0xb85   : > { %6411 = vrcp.f32 %v3240_v32 }
 0xb86   : > { %6413 = vrcp.f32 %v3246_v51 }
 0xb87   : > { %v3248_v35 = vpop.xlane.xlu1 %3247  ;;  %v3250_v22 = vpop.xlane.xlu0 %3249 }
 0xb88   : > { %6415 = vrcp.f32 %v3248_v35 }
 0xb89   : > { %6417 = vrcp.f32 %v3250_v22 }
 0xb8a   : > { %6419 = vrcp.f32 %v3244_v0 }
 0xb8b   : > { %v3254_v57 = vpop.xlane.xlu1 %3253  ;;  %v3316_v17 = vpop.permute.xlu0 %3315 }
 0xb8c   : > { %5848 = vmatprep.subr.bf16.mxu1 %v3316_v17  ;;  %6421 = vrcp.f32 %v3254_v57  ;;  %v6071_v57 = vld [vmem:[#allocation8 + $0x38] sm:$0xff]  }
 0xb8d   : > { %5849 = vmatpush3.bf16.msra.mxu1 %v3316_v17  ;;  %6423 = vrcp.f32 %v3252_v49 }
 0xb8f   : > { %v3314_v47 = vpop.permute.xlu1 %3313 }
 0xb90   : > { %5850 = vmatprep.subr.bf16.mxu1 %v3314_v47 }
 0xb91   : > { %5851 = vmatpush3.bf16.msra.mxu1 %v3314_v47  ;;  %v6410_v13 = vpop.eup %6409 }
 0xb92   : > { %v6412_v31 = vpop.eup %6411  ;;  %v3288_v16 = vmul.f32 %v6410_v13, %v8300_v4 }
 0xb93   : > { %v3312_v10 = vpop.permute.xlu1 %3311  ;;  %v3287_v46 = vmul.f32 %v6412_v31, %v8294_v42  ;;  %v6414_v59 = vpop.eup %6413 }
 0xb94   : > { %5852 = vmatprep.subr.bf16.mxu1 %v3312_v10  ;;  %v3290_v50 = vmul.f32 %v6414_v59, %v8297_v58 }
 0xb95   : > { %5853 = vmatpush3.bf16.msra.mxu1 %v3312_v10  ;;  %v6416_v54 = vpop.eup %6415  ;;  %v3303_v18 = vpack.c.bf16 %v3288_v16, %v3287_v46 }
 0xb96   : > { %v6418_v5 = vpop.eup %6417  ;;  %v3291_v4 = vmul.f32 %v6416_v54, %v8306_v52  ;;  %5870 = vmatprep.subr.bf16.mxu1 %v6071_v57 }
 0xb97   : > { %v6420_v0 = vpop.eup %6419  ;;  %v3292_v15 = vmul.f32 %v6418_v5, %v8308_v2 }
 0xb98   : > { %v3289_v3 = vmul.f32 %v6420_v0, %v8291_v28 }
 0xb99   : > { %v6422_v14 = vpop.eup %6421  ;;  %v3305_v32 = vpack.c.bf16 %v3292_v15, %v3291_v4 }
 0xb9a   : > { %v3304_v42 = vpack.c.bf16 %v3290_v50, %v3289_v3  ;;  %v6424_v51 = vpop.eup %6423  ;;  %v3294_v49 = vmul.f32 %v6422_v14, %v8312_v40  ;;  %v2321_v50 = vadd.f32 %v8326_v55, %v7986_v6  ;;  %v9035_v6 = vld [vmem:[#allocation20_spill] sm:$0xff] }
 0xb9b   : > { %v3293_v9 = vmul.f32 %v6424_v51, %v8302_v21  ;;  %v2337_v55 = vadd.f32 %v8343_v1, %v9035_v6 }
 0xb9d   : > { %v3306_v35 = vpack.c.bf16 %v3294_v49, %v3293_v9 }
 0xba2   : > { %v5784_v8 = vpop.f32.mrf.mxu1 }
 0xba4   : > { %v2810_v25 = vpop.f32.mrf.mxu1 }
 0xba6   : > { %v5785_v38 = vpop.f32.mrf.mxu1 }
 0xba7   : > { %v2832_v12 = vpack.c.bf16 %v5785_v38, %v5784_v8 }
 0xba8   : > { %v2813_v24 = vpop.f32.mrf.mxu1 }
 0xba9   : > { %v2831_v44 = vpack.c.bf16 %v2813_v24, %v2810_v25 }
 0xbab   : > { %5802 = vmatprep.mubr.msk.bf16.mxu1 %vm1224_vm0, %v2831_v44 }
 0xbac   : > { %5803 = vmatmul.mubr.msk.bf16.gmra.mxu1 %vm1224_vm0, %v2832_v12 }
 0xbad   : > { %5854 = vmatprep.mubr.bf16.mxu1 %v3303_v18 }
 0xbb4   : > { %5855 = vmatmul.mubr.bf16.vlgmr.msra.gmra.mxu1 %v3304_v42  ;;  %v9034_v42 = vld [vmem:[#allocation31_spill] sm:$0xff] }
 0xbb5   : > { %5858 = vmatprep.mubr.bf16.mxu1 %v3305_v32  ;;  %5871 = vmatpush3.bf16.msra.mxu1 %v6071_v57  ;;  %v2316_v14 = vadd.f32 %v8339_v39, %v9034_v42 }
 0xbbc   : > { %5859 = vmatmul.mubr.bf16.gmra.mxu1 %v3306_v35  ;;  %v3256_v22 = vpop.xlane.xlu0 %3255 }
 0xbbd   : > { %6425 = vrcp.f32 %v3256_v22 }
 0xbc0   : > { %v3260_v58 = vpop.xlane.xlu0 %3259 }
 0xbc1   : > { %6427 = vrcp.f32 %v3260_v58 }
 0xbc4   : > { %v3258_v52 = vpop.xlane.xlu1 %3257  ;;  %v3262_v2 = vpop.xlane.xlu0 %3261 }
 0xbc5   : > { %6429 = vrcp.f32 %v3258_v52  ;;  %v9038_v52 = vld [vmem:[#allocation24_spill] sm:$0xff] }
 0xbc6   : > { %6431 = vrcp.f32 %v3262_v2  ;;  %v2332_v2 = vadd.f32 %v8366_v19, %v9038_v52 }
 0xbc8   : > { %v3264_v28 = vpop.xlane.xlu1 %3263  ;;  %v3266_v17 = vpop.xlane.xlu0 %3265 }
 0xbc9   : > { %6433 = vrcp.f32 %v3264_v28  ;;  %v9039_v28 = vld [vmem:[#allocation25_spill] sm:$0xff] }
 0xbca   : > { %6435 = vrcp.f32 %v3266_v17  ;;  %v6426_v21 = vpop.eup %6425  ;;  %v2353_v17 = vadd.f32 %v8370_v56, %v9039_v28  ;;  %v9047_v28 = vmov 0  }
 0xbcb   : > { %v3295_v25 = vmul.f32 %v6426_v21, %v8336_v60 }
 0xbcc   : > { %v3268_v40 = vpop.xlane.xlu1 %3267  ;;  %v3270_v47 = vpop.xlane.xlu0 %3269 }
 0xbcd   : > { %6437 = vrcp.f32 %v3268_v40 }
 0xbce   : > { %6439 = vrcp.f32 %v3270_v47  ;;  %v6428_v10 = vpop.eup %6427  ;;  %v9040_v47 = vld [vmem:[#allocation23_spill] sm:$0xff] }
 0xbcf   : > { %v3297_v38 = vmul.f32 %v6428_v10, %v8341_v61  ;;  %v2345_v21 = vadd.f32 %v8372_v53, %v9040_v47 }
 0xbd2   : > { %v6430_v8 = vpop.eup %6429 }
 0xbd3   : > { %v6432_v13 = vpop.eup %6431  ;;  %v3296_v31 = vmul.f32 %v6430_v8, %v8346_v33  ;;  %v9041_v8 = vld [vmem:[#allocation27_spill] sm:$0xff] }
 0xbd4   : > { %v3298_v16 = vmul.f32 %v6432_v13, %v8348_v41  ;;  %v6072_v41 = vld [vmem:[#allocation8 + $0x30] sm:$0xff]   ;;  %v2356_v13 = vadd.f32 %v8374_v63, %v9041_v8 }
 0xbd5   : > { %v3307_v24 = vpack.c.bf16 %v3296_v31, %v3295_v25  ;;  %5872 = vmatprep.subr.bf16.mxu1 %v6072_v41  ;;  %v9042_v31 = vld [vmem:[#allocation28_spill] sm:$0xff] }
 0xbd6   : > { %v6434_v44 = vpop.eup %6433  ;;  %v3308_v46 = vpack.c.bf16 %v3298_v16, %v3297_v38  ;;  %5873 = vmatpush3.bf16.msra.mxu1 %v6072_v41  ;;  %v2348_v38 = vadd.f32 %v8376_v36, %v9042_v31 }
 0xbd7   : > { %v6436_v59 = vpop.eup %6435  ;;  %5862 = vmatprep.mubr.bf16.mxu1 %v3307_v24  ;;  %v3299_v12 = vmul.f32 %v6434_v44, %v8354_v11  ;;  %v9043_v44 = vld [vmem:[#allocation30_spill] sm:$0xff] }
 0xbd8   : > { %5863 = vmatmul.mubr.bf16.gmra.mxu1 %v3308_v46  ;;  %v3300_v54 = vmul.f32 %v6436_v59, %v8356_v7  ;;  %v2313_v7 = vadd.f32 %v8331_v20, %v7988_v48  ;;  %v9036_v20 = vld [vmem:[#allocation21_spill] sm:$0xff]  ;;  %v2369_v53 = vadd.f32 %v8378_v30, %v9043_v44  ;;  %v9044_v59 = vld [vmem:[#allocation26_spill] sm:$0xff] }
 0xbd9   : > { %v2329_v9 = vadd.f32 %v8350_v45, %v9036_v20 }
 0xbda   : > { %v6438_v18 = vpop.eup %6437  ;;  %v3309_v5 = vpack.c.bf16 %v3300_v54, %v3299_v12  ;;  %v2361_v12 = vadd.f32 %v8380_v26, %v9044_v59 }
 0xbdb   : > { %v6440_v0 = vpop.eup %6439  ;;  %v3301_v60 = vmul.f32 %v6438_v18, %v8362_v43  ;;  %v2324_v43 = vadd.f32 %v8334_v29, %v7990_v62  ;;  %v9037_v29 = vld [vmem:[#allocation22_spill] sm:$0xff]  ;;  %v9045_v18 = vld [vmem:[#allocation29_spill] sm:$0xff] }
 0xbdc   : > { %5866 = vmatprep.mubr.bf16.mxu1 %v3309_v5  ;;  %v3302_v61 = vmul.f32 %v6440_v0, %v8364_v27  ;;  %v2340_v22 = vadd.f32 %v8358_v37, %v9037_v29  ;;  %v2372_v5 = vadd.f32 %v8382_v23, %v9045_v18 }
 0xbde   : > { %v3310_v33 = vpack.c.bf16 %v3302_v61, %v3301_v60  ;;  %v9046_v60 = vld [vmem:[#allocation32_spill] sm:$0xff] }
 0xbdf   : > { %v2364_v61 = vadd.f32 %v8384_v34, %v9046_v60 }
 0xbe0   : > { %5867 = vmatmul.mubr.bf16.gmra.mxu1 %v3310_v33 }
 0xc2d   : > { %v5792_v11 = vpop.f32.mrf.mxu1 }
 0xc2e   : > { %v8415_v4 = vadd.f32 %v5792_v11, %v2321_v50 }
 0xc2f   : > { %v2903_v15 = vpop.f32.mrf.mxu1 }
 0xc30   : > { %v8419_v3 = vadd.f32 %v2903_v15, %v2313_v7 }
 0xc31   : > { %v5793_v27 = vpop.f32.mrf.mxu1 }
 0xc32   : > { %v8423_v32 = vadd.f32 %v5793_v27, %v2324_v43 }
 0xc33   : > { %v2906_v51 = vpop.f32.mrf.mxu1 }
 0xc34   : > { %v8427_v49 = vadd.f32 %v2906_v51, %v2316_v14 }
 0xc35   : > { %v5796_v48 = vpop.f32.mrf.mxu1 }
 0xc36   : > { %v8431_v35 = vadd.f32 %v5796_v48, %v2337_v55 }
 0xc37   : > { %v2919_v62 = vpop.f32.mrf.mxu1 }
 0xc38   : > { %v8435_v58 = vadd.f32 %v2919_v62, %v2329_v9 }
 0xc39   : > { %v5797_v39 = vpop.f32.mrf.mxu1 }
 0xc3a   : > { %v8439_v57 = vadd.f32 %v5797_v39, %v2340_v22 }
 0xc3b   : > { %v2922_v1 = vpop.f32.mrf.mxu1 }
 0xc3c   : > { %v8443_v40 = vadd.f32 %v2922_v1, %v2332_v2 }
 0xc3d   : > { %v5800_v45 = vpop.f32.mrf.mxu1 }
 0xc3e   : > { %v8447_v10 = vadd.f32 %v5800_v45, %v2353_v17 }
 0xc3f   : > { %v2935_v37 = vpop.f32.mrf.mxu1 }
 0xc40   : > { %v8451_v25 = vadd.f32 %v2935_v37, %v2345_v21  ;;  %v8489_v37 = vld [vmem:[%s8925_s6] ss:$0 sm:$0xff] }
 0xc41   : > { %v5801_v19 = vpop.f32.mrf.mxu1 }
 0xc42   : > { %v8455_v16 = vadd.f32 %v5801_v19, %v2356_v13 }
 0xc43   : > { %v2938_v56 = vpop.f32.mrf.mxu1 }
 0xc44   : > { %v8457_v24 = vadd.f32 %v2938_v56, %v2348_v38 }
 0xc6c   : > { %v5804_v46 = vpop.f32.mrf.mxu1 }
 0xc6d   : > { %v8463_v54 = vadd.f32 %v5804_v46, %v2369_v53 }
 0xc6e   : > { %v2951_v63 = vpop.f32.mrf.mxu1 }
 0xc6f   : > { %v8467_v0 = vadd.f32 %v2951_v63, %v2361_v12  ;;  %v6490_v63 = vld [vmem:[%s7008_s18 + $0x10] sm:$0xff] }
 0xc70   : > { %v5805_v36 = vpop.f32.mrf.mxu1 }
 0xc71   : > { %v8471_v33 = vadd.f32 %v5805_v36, %v2372_v5 }
 0xc72   : > { %v2954_v41 = vpop.f32.mrf.mxu1 }
 0xc73   : > { %v8473_v30 = vadd.f32 %v2954_v41, %v2364_v61 }
 0xc74   : > { %v5856_v50 = vpop.f32.mrf.mxu1 }
 0xc76   : > { %v3369_v11 = vpop.f32.mrf.mxu1 }
 0xc78   : > { %v5857_v26 = vpop.f32.mrf.mxu1 }
 0xc79   : > { %v3433_v43 = vpack.c.bf16 %v5857_v26, %v5856_v50  ;;  %v6493_v26 = vld [vmem:[%s7008_s18 + $0x20] sm:$0xff] }
 0xc7a   : > { %v3372_v7 = vpop.f32.mrf.mxu1 }
 0xc7b   : > { %v3432_v15 = vpack.c.bf16 %v3372_v7, %v3369_v11 }
 0xc7c   : > { %v5860_v27 = vpop.f32.mrf.mxu1 }
 0xc7d   : > { %5874 = vmatprep.mubr.msk.bf16.mxu1 %vm1224_vm0, %v3432_v15 }
 0xc7e   : > { %v3385_v23 = vpop.f32.mrf.mxu1  ;;  %5875 = vmatmul.mubr.msk.bf16.vlgmr.msra.gmra.mxu1 %vm1224_vm0, %v3433_v43 }
 0xc80   : > { %v5861_v42 = vpop.f32.mrf.mxu1 }
 0xc81   : > { %v3435_v51 = vpack.c.bf16 %v5861_v42, %v5860_v27  ;;  %v6494_v27 = vld [vmem:[%s7008_s18 + $0x30] sm:$0xff]  ;;  %v6495_v42 = vld [vmem:[%s7008_s18 + $0x28] sm:$0xff] }
 0xc82   : > { %v3388_v14 = vpop.f32.mrf.mxu1 }
 0xc83   : > { %v3434_v34 = vpack.c.bf16 %v3388_v14, %v3385_v23 }
 0xc85   : > { %5878 = vmatprep.mubr.msk.bf16.mxu1 %vm1224_vm0, %v3434_v34 }
 0xc86   : > { %5879 = vmatmul.mubr.msk.bf16.gmra.mxu1 %vm1224_vm0, %v3435_v51 }
 0xc98   : > { %v5864_v6 = vpop.f32.mrf.mxu1 }
 0xc9a   : > { %v3401_v55 = vpop.f32.mrf.mxu1 }
 0xc9c   : > { %v5865_v48 = vpop.f32.mrf.mxu1 }
 0xc9d   : > { %v3437_v62 = vpack.c.bf16 %v5865_v48, %v5864_v6 }
 0xc9e   : > { %v3404_v20 = vpop.f32.mrf.mxu1 }
 0xc9f   : > { %v3436_v9 = vpack.c.bf16 %v3404_v20, %v3401_v55 }
 0xca0   : > { %v5868_v29 = vpop.f32.mrf.mxu1 }
 0xca1   : > { %5882 = vmatprep.mubr.msk.bf16.mxu1 %vm1224_vm0, %v3436_v9 }
 0xca2   : > { %v3417_v22 = vpop.f32.mrf.mxu1  ;;  %5883 = vmatmul.mubr.msk.bf16.gmra.mxu1 %vm1224_vm0, %v3437_v62 }
 0xca4   : > { %v5869_v39 = vpop.f32.mrf.mxu1 }
 0xca5   : > { %v3439_v1 = vpack.c.bf16 %v5869_v39, %v5868_v29  ;;  %v6497_v39 = vld [vmem:[%s7008_s18 + $0x40] sm:$0xff] }
 0xca6   : > { %v3420_v52 = vpop.f32.mrf.mxu1 }
 0xca7   : > { %v3438_v2 = vpack.c.bf16 %v3420_v52, %v3417_v22 }
 0xca9   : > { %5886 = vmatprep.mubr.msk.bf16.mxu1 %vm1224_vm0, %v3438_v2 }
 0xcaa   : > { %5887 = vmatmul.mubr.msk.bf16.gmra.mxu1 %vm1224_vm0, %v3439_v1 }
 0xcab   : > { %4217 = vmatprep.mubr.bf16.mxu1 %v9047_v28 }
 0xd3e   : > { %v5876_v17 = vpop.f32.mrf.mxu1 }
 0xd3f   : > { %v3575_v47 = vadd.f32 %v5876_v17, %v8415_v4  ;;  %v6489_v4 = vld [vmem:[%s7008_s18] sm:$0xff] }
 0xd40   : > { %v3510_v45 = vpop.f32.mrf.mxu1 }
 0xd41   : > { %v3573_v21 = vadd.f32 %v3510_v45, %v8419_v3  ;;  %v3598_v38 = vadd.f32 %v8489_v37, %v3575_v47  ;;  %v6498_v45 = vld [vmem:[%s7008_s18 + $0x50] sm:$0xff] }
 0xd42   : > { %v5877_v8 = vpop.f32.mrf.mxu1 }
 0xd43   : > { %v3596_v13 = vadd.f32 %v8489_v37, %v3573_v21  ;;  %v3576_v19 = vadd.f32 %v5877_v8, %v8423_v32  ;;  %v8504_v18 = vadd.f32 %v6490_v63, %v3598_v38 }
 0xd44   : > { %v3513_v31 = vpop.f32.mrf.mxu1 }
 0xd45   : > { %v3574_v56 = vadd.f32 %v3513_v31, %v8427_v49  ;;  %v8496_v44 = vadd.f32 %v6489_v4, %v3596_v13  ;;  %v3599_v46 = vadd.f32 %v8489_v37, %v3576_v19  ;;  %v6491_v49 = vld [vmem:[%s7008_s18 + $0x8] sm:$0xff]  ;;  %v6501_v4 = vld [vmem:[%s7008_s18 + $0x60] sm:$0xff] }
 0xd46   : > { %v5880_v3 = vpop.f32.mrf.mxu1 }
 0xd47   : > { %v3597_v53 = vadd.f32 %v8489_v37, %v3574_v56  ;;  %3630 = vadd.xlane.f32.xlu1 %v8496_v44  ;;  %v3579_v12 = vadd.f32 %v5880_v3, %v8431_v35  ;;  %v6492_v35 = vld [vmem:[%s7008_s18 + $0x18] sm:$0xff] }
 0xd48   : > { %v3526_v59 = vpop.f32.mrf.mxu1  ;;  %v8513_v41 = vadd.f32 %v6492_v35, %v3599_v46 }
 0xd49   : > { %v3577_v32 = vadd.f32 %v3526_v59, %v8435_v58  ;;  %v8507_v5 = vadd.f32 %v6491_v49, %v3597_v53  ;;  %v3602_v58 = vadd.f32 %v8489_v37, %v3579_v12  ;;  %v6502_v59 = vld [vmem:[%s7008_s18 + $0x70] sm:$0xff] }
 0xd4a   : > { %v5881_v36 = vpop.f32.mrf.mxu1  ;;  %v6073_v49 = vld [vmem:[#allocation10 + $0xe0] ss:$16 sps:$4 sm:$0xff]  }
 0xd4b   : > { %v3600_v60 = vadd.f32 %v8489_v37, %v3577_v32  ;;  %3634 = vadd.xlane.f32.xlu1 %v8504_v18  ;;  %3632 = vadd.xlane.f32.xlu0 %v8507_v5  ;;  %v3580_v50 = vadd.f32 %v5881_v36, %v8439_v57  ;;  %v8526_v23 = vadd.f32 %v6494_v27, %v3602_v58  ;;  %v6496_v57 = vld [vmem:[%s7008_s18 + $0x38] sm:$0xff]  ;;  %v6503_v32 = vld [vmem:[%s7008_s18 + $0x68] sm:$0xff]  ;;  %v6075_v36 = vld [vmem:[#allocation10 + $0xe4] ss:$16 sps:$4 sm:$0xff]  }
 0xd4c   : > { %v3529_v61 = vpop.f32.mrf.mxu1  ;;  %4072 = vmatprep.subr.bf16.mxu0 %v6075_v36  ;;  %v6099_v36 = vld [vmem:[#allocation10 + $0x64] ss:$16 sps:$4 sm:$0xff]  }
 0xd4d   : > { %v3578_v11 = vadd.f32 %v3529_v61, %v8443_v40  ;;  %v8519_v7 = vadd.f32 %v6493_v26, %v3600_v60  ;;  %v3603_v43 = vadd.f32 %v8489_v37, %v3580_v50  ;;  %v6076_v60 = vld [vmem:[#allocation10 + $0xe8] ss:$16 sps:$4 sm:$0xff]   ;;  %v6078_v61 = vld [vmem:[#allocation10 + $0xec] ss:$16 sps:$4 sm:$0xff]   ;;  %4073 = vmatpush1.bf16.msra.mxu0 %v6073_v49 }
 0xd4e   : > { %4185 = vmatprep.subr.bf16.mxu1 %v6078_v61  ;;  %v6094_v49 = vld [vmem:[#allocation10 + $0x88] ss:$16 sps:$4 sm:$0xff]   ;;  %v6097_v61 = vld [vmem:[#allocation10 + $0x60] ss:$16 sps:$4 sm:$0xff]  }
 0xd4f   : > { %v3601_v15 = vadd.f32 %v8489_v37, %v3578_v11  ;;  %3636 = vadd.xlane.f32.xlu0 %v8513_v41  ;;  %3638 = vadd.xlane.f32.xlu1 %v8519_v7  ;;  %v8534_v40 = vadd.f32 %v6496_v57, %v3603_v43 }
 0xd50   : > { %4186 = vmatpush1.bf16.msra.mxu1 %v6076_v60  ;;  %v6102_v60 = vld [vmem:[#allocation10 + $0x6c] ss:$16 sps:$4 sm:$0xff]  }
 0xd51   : > { %v8529_v14 = vadd.f32 %v6495_v42, %v3601_v15 }
 0xd53   : > { %3642 = vadd.xlane.f32.xlu1 %v8526_v23  ;;  %3640 = vadd.xlane.f32.xlu0 %v8529_v14 }
 0xd57   : > { %3644 = vadd.xlane.f32.xlu0 %v8534_v40 }
 0xd62   : > { %v5884_v34 = vpop.f32.mrf.mxu1 }
 0xd63   : > { %v3583_v6 = vadd.f32 %v5884_v34, %v8447_v10 }
 0xd64   : > { %v3542_v51 = vpop.f32.mrf.mxu1 }
 0xd65   : > { %v3581_v55 = vadd.f32 %v3542_v51, %v8451_v25  ;;  %v3606_v29 = vadd.f32 %v8489_v37, %v3583_v6 }
 0xd66   : > { %v5885_v48 = vpop.f32.mrf.mxu1 }
 0xd67   : > { %v3604_v20 = vadd.f32 %v8489_v37, %v3581_v55  ;;  %v3584_v9 = vadd.f32 %v5885_v48, %v8455_v16  ;;  %v8552_v47 = vadd.f32 %v6498_v45, %v3606_v29 }
 0xd68   : > { %v3545_v62 = vpop.f32.mrf.mxu1 }
 0xd69   : > { %v3582_v22 = vadd.f32 %v3545_v62, %v8457_v24  ;;  %v8544_v52 = vadd.f32 %v6497_v39, %v3604_v20  ;;  %v3607_v25 = vadd.f32 %v8489_v37, %v3584_v9  ;;  %v6499_v24 = vld [vmem:[%s7008_s18 + $0x48] sm:$0xff] }
 0xd6a   : > { %v5888_v2 = vpop.f32.mrf.mxu1 }
 0xd6b   : > { %v3605_v10 = vadd.f32 %v8489_v37, %v3582_v22  ;;  %3646 = vadd.xlane.f32.xlu1 %v8544_v52  ;;  %v3587_v17 = vadd.f32 %v5888_v2, %v8463_v54  ;;  %v6500_v54 = vld [vmem:[%s7008_s18 + $0x58] sm:$0xff] }
 0xd6c   : > { %v3558_v1 = vpop.f32.mrf.mxu1  ;;  %v8561_v31 = vadd.f32 %v6500_v54, %v3607_v25  ;;  %v6079_v54 = vld [vmem:[#allocation10 + $0xc0] ss:$16 sps:$4 sm:$0xff]  }
 0xd6d   : > { %v3585_v16 = vadd.f32 %v3558_v1, %v8467_v0  ;;  %v8555_v21 = vadd.f32 %v6499_v24, %v3605_v10  ;;  %v3610_v0 = vadd.f32 %v8489_v37, %v3587_v17 }
 0xd6e   : > { %v5889_v8 = vpop.f32.mrf.mxu1 }
 0xd6f   : > { %v3608_v13 = vadd.f32 %v8489_v37, %v3585_v16  ;;  %3650 = vadd.xlane.f32.xlu1 %v8552_v47  ;;  %3648 = vadd.xlane.f32.xlu0 %v8555_v21  ;;  %v3588_v38 = vadd.f32 %v5889_v8, %v8471_v33  ;;  %v8574_v12 = vadd.f32 %v6502_v59, %v3610_v0  ;;  %v6504_v33 = vld [vmem:[%s7008_s18 + $0x78] sm:$0xff]  ;;  %v6081_v8 = vld [vmem:[#allocation10 + $0xc4] ss:$16 sps:$4 sm:$0xff]   ;;  %s6667_s18 = sshll.u32 %s6759_s14, 4  ;;  %s6668_s18 = int_to_ptr.vmem [resolvable:$false] %s6667_s18 }
 0xd70   : > { %v3561_v19 = vpop.f32.mrf.mxu1  ;;  %v6082_v0 = vld [vmem:[#allocation10 + $0xc8] ss:$16 sps:$4 sm:$0xff]   ;;  %4074 = vmatprep.subr.bf16.mxu0 %v6081_v8  ;;  %v6093_v59 = vld [vmem:[#allocation10 + $0x84] ss:$16 sps:$4 sm:$0xff]   ;;  %s6669_s4 = scalar_lea.vmem %s6668_s18, 4096  ;;  %p6670_p5 = scmp.lt.s32.totalorder %s8874_s22, %s6668_s18 }
 0xd71   : > { %v3586_v56 = vadd.f32 %v3561_v19, %v8473_v30  ;;  %v8567_v3 = vadd.f32 %v6501_v4, %v3608_v13  ;;  %v3611_v46 = vadd.f32 %v8489_v37, %v3588_v38  ;;  %v6084_v13 = vld [vmem:[#allocation10 + $0xcc] ss:$16 sps:$4 sm:$0xff]   ;;  %4075 = vmatpush1.bf16.msra.mxu0 %v6079_v54  ;;  %p6671_p9 = scmp.lt.s32.totalorder %s6669_s4, %s6663_s19 }
 0xd72   : > { %4187 = vmatprep.subr.bf16.mxu1 %v6084_v13  ;;  %v6090_v4 = vld [vmem:[#allocation10 + $0xac] ss:$16 sps:$4 sm:$0xff]  }
 0xd73   : > { %v3609_v53 = vadd.f32 %v8489_v37, %v3586_v56  ;;  %3652 = vadd.xlane.f32.xlu0 %v8561_v31  ;;  %3654 = vadd.xlane.f32.xlu1 %v8567_v3  ;;  %v8582_v30 = vadd.f32 %v6504_v33, %v3611_v46  ;;  %v6087_v56 = vld [vmem:[#allocation10 + $0xa4] ss:$16 sps:$4 sm:$0xff]   ;;  %v6088_v46 = vld [vmem:[#allocation10 + $0xa8] ss:$16 sps:$4 sm:$0xff]   ;;  %v6091_v33 = vld [vmem:[#allocation10 + $0x80] ss:$16 sps:$4 sm:$0xff]   ;;  %p6672_p1 = por %p6671_p9, %p6670_p5 }
 0xd74   : > { %4188 = vmatpush1.bf16.msra.mxu1 %v6082_v0  ;;  %4076 = vmatprep.subr.bf16.mxu0 %v6087_v56 }
 0xd75   : > { %v8577_v63 = vadd.f32 %v6503_v32, %v3609_v53  ;;  %v6085_v53 = vld [vmem:[#allocation10 + $0xa0] ss:$16 sps:$4 sm:$0xff]   ;;  %4189 = vmatprep.subr.bf16.mxu1 %v6090_v4  ;;  %v6096_v32 = vld [vmem:[#allocation10 + $0x8c] ss:$16 sps:$4 sm:$0xff]   ;;  %p6673_p3 = pnand %p6672_p1, %p6666_p0 }
 0xd76   : > { %4077 = vmatpush1.bf16.msra.mxu0 %v6085_v53 }
 0xd77   : > { %3658 = vadd.xlane.f32.xlu1 %v8574_v12  ;;  %3656 = vadd.xlane.f32.xlu0 %v8577_v63 }
 0xd78   : > { %4190 = vmatpush1.bf16.msra.mxu1 %v6088_v46  ;;  %4078 = vmatprep.subr.bf16.mxu0 %v6093_v59 }
 0xd79   : > { %4191 = vmatprep.subr.bf16.mxu1 %v6096_v32 }
 0xd7a   : > { %4079 = vmatpush1.bf16.msra.mxu0 %v6091_v33 }
 0xd7b   : > { %3660 = vadd.xlane.f32.xlu0 %v8582_v30  ;;  %4080 = vmatprep.subr.bf16.mxu0 %v6099_v36 }
 0xd7c   : > { %4192 = vmatpush1.bf16.msra.mxu1 %v6094_v49 }
 0xd7d   : > { %4193 = vmatprep.subr.bf16.mxu1 %v6102_v60 }
 0xd7e   : > { %4081 = vmatpush1.bf16.msra.mxu0 %v6097_v61 }
 0xdd0   : > { %v3631_v37 = vpop.xlane.xlu1 %3630 }
 0xdd1   : > { %v3662_v35 = vmul.f32 0.0078125, %v3631_v37  ;;  %v6100_v37 = vld [vmem:[#allocation10 + $0x68] ss:$16 sps:$4 sm:$0xff]  }
 0xdd2   : > { %4194 = vmatpush1.bf16.msra.mxu1 %v6100_v37 }
 0xdd3   : > { %v8586_v58 = vsub.f32 %v8496_v44, %v3662_v35  ;;  %v6105_v35 = vld [vmem:[#allocation10 + $0x44] ss:$16 sps:$4 sm:$0xff]  }
 0xdd4   : > { %v3635_v50 = vpop.xlane.xlu1 %3634  ;;  %v3633_v11 = vpop.xlane.xlu0 %3632  ;;  %4082 = vmatprep.subr.bf16.mxu0 %v6105_v35 }
 0xdd5   : > { %v3664_v26 = vmul.f32 0.0078125, %v3635_v50  ;;  %v3663_v15 = vmul.f32 0.0078125, %v3633_v11  ;;  %v3694_v43 = vmul.f32 %v8586_v58, %v8586_v58  ;;  %v6108_v50 = vld [vmem:[#allocation10 + $0x4c] ss:$16 sps:$4 sm:$0xff]   ;;  %v6103_v11 = vld [vmem:[#allocation10 + $0x40] ss:$16 sps:$4 sm:$0xff]  }
 0xdd6   : > { %4195 = vmatprep.subr.bf16.mxu1 %v6108_v50  ;;  %4083 = vmatpush1.bf16.msra.mxu0 %v6103_v11 }
 0xdd7   : > { %v8591_v27 = vsub.f32 %v8504_v18, %v3664_v26  ;;  %v8594_v42 = vsub.f32 %v8507_v5, %v3663_v15  ;;  %3710 = vadd.xlane.f32.xlu1 %v3694_v43  ;;  %v6106_v26 = vld [vmem:[#allocation10 + $0x48] ss:$16 sps:$4 sm:$0xff]  }
 0xdd8   : > { %v3637_v57 = vpop.xlane.xlu0 %3636  ;;  %v3639_v34 = vpop.xlane.xlu1 %3638  ;;  %4196 = vmatpush1.bf16.msra.mxu1 %v6106_v26 }
 0xdd9   : > { %v3665_v51 = vmul.f32 0.0078125, %v3637_v57  ;;  %v3666_v6 = vmul.f32 0.0078125, %v3639_v34  ;;  %v3696_v55 = vmul.f32 %v8591_v27, %v8591_v27  ;;  %v3695_v48 = vmul.f32 %v8594_v42, %v8594_v42  ;;  %v6111_v57 = vld [vmem:[#allocation10 + $0x24] ss:$16 sps:$4 sm:$0xff]   ;;  %v6114_v34 = vld [vmem:[#allocation10 + $0x2c] ss:$16 sps:$4 sm:$0xff]  }
 0xdda   : > { %4084 = vmatprep.subr.bf16.mxu0 %v6111_v57  ;;  %4197 = vmatprep.subr.bf16.mxu1 %v6114_v34  ;;  %v6123_v57 = vld [vmem:[#allocation11 + $0xf8] sm:$0xff]  }
 0xddb   : > { %v8601_v20 = vsub.f32 %v8513_v41, %v3665_v51  ;;  %v8604_v9 = vsub.f32 %v8519_v7, %v3666_v6  ;;  %3714 = vadd.xlane.f32.xlu1 %v3696_v55  ;;  %3712 = vadd.xlane.f32.xlu0 %v3695_v48  ;;  %v6109_v6 = vld [vmem:[#allocation10 + $0x20] ss:$16 sps:$4 sm:$0xff]   ;;  %v6112_v55 = vld [vmem:[#allocation10 + $0x28] ss:$16 sps:$4 sm:$0xff]  }
 0xddc   : > { %v3643_v62 = vpop.xlane.xlu1 %3642  ;;  %v3641_v29 = vpop.xlane.xlu0 %3640  ;;  %4085 = vmatpush1.bf16.msra.mxu0 %v6109_v6  ;;  %4198 = vmatpush1.bf16.msra.mxu1 %v6112_v55 }
 0xddd   : > { %v3668_v22 = vmul.f32 0.0078125, %v3643_v62  ;;  %v3667_v39 = vmul.f32 0.0078125, %v3641_v29  ;;  %v3698_v2 = vmul.f32 %v8604_v9, %v8604_v9  ;;  %v3697_v10 = vmul.f32 %v8601_v20, %v8601_v20 }
 0xddf   : > { %v8611_v25 = vsub.f32 %v8526_v23, %v3668_v22  ;;  %v8614_v1 = vsub.f32 %v8529_v14, %v3667_v39  ;;  %3718 = vadd.xlane.f32.xlu1 %v3698_v2  ;;  %3716 = vadd.xlane.f32.xlu0 %v3697_v10  ;;  %v6115_v2 = vld [vmem:[#allocation10] ss:$16 sps:$4 sm:$0xff]   ;;  %v6117_v10 = vld [vmem:[#allocation10 + $0x4] ss:$16 sps:$4 sm:$0xff]  }
 0xde0   : > { %v3645_v17 = vpop.xlane.xlu0 %3644  ;;  %4086 = vmatprep.subr.bf16.mxu0 %v6117_v10 }
 0xde1   : > { %v3669_v16 = vmul.f32 0.0078125, %v3645_v17  ;;  %v3700_v45 = vmul.f32 %v8611_v25, %v8611_v25  ;;  %v3699_v24 = vmul.f32 %v8614_v1, %v8614_v1  ;;  %v6118_v17 = vld [vmem:[#allocation10 + $0x8] ss:$16 sps:$4 sm:$0xff]   ;;  %4087 = vmatpush1.bf16.msra.mxu0 %v6115_v2 }
 0xde3   : > { %v8621_v19 = vsub.f32 %v8534_v40, %v3669_v16  ;;  %3722 = vadd.xlane.f32.xlu1 %v3700_v45  ;;  %3720 = vadd.xlane.f32.xlu0 %v3699_v24  ;;  %v6120_v24 = vld [vmem:[#allocation10 + $0xc] ss:$16 sps:$4 sm:$0xff]  }
 0xde4   : > { %4199 = vmatprep.subr.bf16.mxu1 %v6120_v24 }
 0xde5   : > { %v3701_v38 = vmul.f32 %v8621_v19, %v8621_v19  ;;  %4200 = vmatpush1.bf16.msra.mxu1 %v6118_v17 }
 0xde6   : > { %5458 = vmatprep.subr.bf16.mxu1 %v6123_v57 }
 0xde7   : > { %3724 = vadd.xlane.f32.xlu0 %v3701_v38 }
 0xdf4   : > { %v3647_v15 = vpop.xlane.xlu1 %3646 }
 0xdf5   : > { %v3670_v43 = vmul.f32 0.0078125, %v3647_v15 }
 0xdf7   : > { %v8626_v51 = vsub.f32 %v8544_v52, %v3670_v43  ;;  %v6121_v43 = vld [vmem:[#allocation11 + $0x78] sm:$0xff]  }
 0xdf8   : > { %v3651_v48 = vpop.xlane.xlu1 %3650  ;;  %v3649_v62 = vpop.xlane.xlu0 %3648  ;;  %5394 = vmatprep.subr.bf16.mxu0 %v6121_v43 }
 0xdf9   : > { %v3672_v29 = vmul.f32 0.0078125, %v3651_v48  ;;  %v3671_v22 = vmul.f32 0.0078125, %v3649_v62  ;;  %v3702_v39 = vmul.f32 %v8626_v51, %v8626_v51 }
 0xdfb   : > { %v8631_v16 = vsub.f32 %v8552_v47, %v3672_v29  ;;  %v8634_v45 = vsub.f32 %v8555_v21, %v3671_v22  ;;  %3726 = vadd.xlane.f32.xlu1 %v3702_v39 }
 0xdfc   : > { %v3653_v8 = vpop.xlane.xlu0 %3652  ;;  %v3655_v13 = vpop.xlane.xlu1 %3654 }
 0xdfd   : > { %v3673_v54 = vmul.f32 0.0078125, %v3653_v8  ;;  %v3674_v0 = vmul.f32 0.0078125, %v3655_v13  ;;  %v3704_v38 = vmul.f32 %v8631_v16, %v8631_v16  ;;  %v3703_v56 = vmul.f32 %v8634_v45, %v8634_v45 }
 0xdff   : > { %v8641_v4 = vsub.f32 %v8561_v31, %v3673_v54  ;;  %v8644_v53 = vsub.f32 %v8567_v3, %v3674_v0  ;;  %3730 = vadd.xlane.f32.xlu1 %v3704_v38  ;;  %3728 = vadd.xlane.f32.xlu0 %v3703_v56 }
 0xe00   : > { %v3659_v46 = vpop.xlane.xlu1 %3658  ;;  %v3657_v59 = vpop.xlane.xlu0 %3656 }
 0xe01   : > { %v3676_v32 = vmul.f32 0.0078125, %v3659_v46  ;;  %v3675_v33 = vmul.f32 0.0078125, %v3657_v59  ;;  %v3706_v49 = vmul.f32 %v8644_v53, %v8644_v53  ;;  %v3705_v36 = vmul.f32 %v8641_v4, %v8641_v4 }
 0xe03   : > { %v8651_v60 = vsub.f32 %v8574_v12, %v3676_v32  ;;  %v8654_v61 = vsub.f32 %v8577_v63, %v3675_v33  ;;  %3734 = vadd.xlane.f32.xlu1 %v3706_v49  ;;  %3732 = vadd.xlane.f32.xlu0 %v3705_v36 }
 0xe04   : > { %v3661_v37 = vpop.xlane.xlu0 %3660 }
 0xe05   : > { %v3677_v35 = vmul.f32 0.0078125, %v3661_v37  ;;  %v3708_v50 = vmul.f32 %v8651_v60, %v8651_v60  ;;  %v3707_v11 = vmul.f32 %v8654_v61, %v8654_v61  ;;  %v8669_v37 = vld [vmem:[%s8926_s7] ss:$0 sm:$0xff] }
 0xe07   : > { %v8661_v26 = vsub.f32 %v8582_v30, %v3677_v35  ;;  %3738 = vadd.xlane.f32.xlu1 %v3708_v50  ;;  %3736 = vadd.xlane.f32.xlu0 %v3707_v11 }
 0xe09   : > { %v3709_v15 = vmul.f32 %v8661_v26, %v8661_v26 }
 0xe0b   : > { %3740 = vadd.xlane.f32.xlu0 %v3709_v15 }
 0xe60   : > { %v3711_v34 = vpop.xlane.xlu1 %3710 }
 0xe61   : > { %v3742_v6 = vmul.f32 0.0078125, %v3711_v34  ;;  %v8676_v34 = vld [vmem:[%s8927_s8] ss:$0 sm:$0xff] }
 0xe63   : > { %v3758_v55 = vadd.f32 1e-05, %v3742_v6 }
 0xe64   : > { %v3715_v48 = vpop.xlane.xlu1 %3714  ;;  %v3713_v62 = vpop.xlane.xlu0 %3712 }
 0xe65   : > { %6441 = vrsqrt.f32 %v3758_v55  ;;  %v3744_v29 = vmul.f32 0.0078125, %v3715_v48  ;;  %v3743_v22 = vmul.f32 0.0078125, %v3713_v62 }
 0xe67   : > { %v3759_v39 = vadd.f32 1e-05, %v3743_v22  ;;  %v3760_v2 = vadd.f32 1e-05, %v3744_v29 }
 0xe68   : > { %v3717_v10 = vpop.xlane.xlu0 %3716  ;;  %v3719_v17 = vpop.xlane.xlu1 %3718 }
 0xe69   : > { %v3745_v24 = vmul.f32 0.0078125, %v3717_v10  ;;  %6443 = vrsqrt.f32 %v3759_v39  ;;  %v3746_v13 = vmul.f32 0.0078125, %v3719_v17  ;;  %v6122_v39 = vld [vmem:[#allocation11 + $0x38] sm:$0xff]   ;;  %v6125_v17 = vld [vmem:[#allocation11 + $0x70] sm:$0xff]  }
 0xe6a   : > { %6445 = vrsqrt.f32 %v3760_v2  ;;  %v6124_v2 = vld [vmem:[#allocation11 + $0xb8] sm:$0xff]  }
 0xe6b   : > { %v3761_v8 = vadd.f32 1e-05, %v3745_v24  ;;  %v3762_v56 = vadd.f32 1e-05, %v3746_v13  ;;  %v6127_v24 = vld [vmem:[#allocation11 + $0xf0] sm:$0xff]  }
 0xe6c   : > { %v3721_v54 = vpop.xlane.xlu0 %3720  ;;  %v3723_v46 = vpop.xlane.xlu1 %3722 }
 0xe6d   : > { %v3747_v0 = vmul.f32 0.0078125, %v3721_v54  ;;  %6447 = vrsqrt.f32 %v3761_v8  ;;  %v3748_v49 = vmul.f32 0.0078125, %v3723_v46  ;;  %v6126_v54 = vld [vmem:[#allocation11 + $0x30] sm:$0xff]  }
 0xe6f   : > { %v3763_v38 = vadd.f32 1e-05, %v3747_v0  ;;  %v3764_v11 = vadd.f32 1e-05, %v3748_v49  ;;  %v6128_v0 = vld [vmem:[#allocation11 + $0xb0] sm:$0xff]  }
 0xe70   : > { %v3725_v59 = vpop.xlane.xlu0 %3724 }
 0xe71   : > { %6449 = vrsqrt.f32 %v3763_v38  ;;  %v3749_v33 = vmul.f32 0.0078125, %v3725_v59  ;;  %v6129_v38 = vld [vmem:[#allocation11 + $0x68] sm:$0xff]  }
 0xe72   : > { %v6442_v32 = vpop.eup %6441  ;;  %6451 = vrsqrt.f32 %v3762_v56  ;;  %v6131_v56 = vld [vmem:[#allocation11 + $0xe8] sm:$0xff]  }
 0xe73   : > { %v3790_v36 = vmul.f32 %v6442_v32, %v8586_v58  ;;  %v3765_v35 = vadd.f32 1e-05, %v3749_v33 }
 0xe75   : > { %v3812_v15 = vmul.f32 %v8669_v37, %v3790_v36  ;;  %6453 = vrsqrt.f32 %v3765_v35  ;;  %v6132_v35 = vld [vmem:[#allocation11 + $0xa8] sm:$0xff]  }
 0xe76   : > { %v6444_v50 = vpop.eup %6443  ;;  %6455 = vrsqrt.f32 %v3764_v11 }
 0xe77   : > { %v3791_v43 = vmul.f32 %v6444_v50, %v8594_v42  ;;  %v6446_v57 = vpop.eup %6445  ;;  %v3834_v55 = vadd.f32 %v8676_v34, %v3812_v15  ;;  %v6133_v15 = vld [vmem:[#allocation11 + $0x60] sm:$0xff]  }
 0xe78   : > { %v3792_v62 = vmul.f32 %v6446_v57, %v8591_v27 }
 0xe79   : > { %v3813_v58 = vmul.f32 %v8669_v37, %v3791_v43  ;;  %v6135_v43 = vld [vmem:[#allocation11 + $0xe0] sm:$0xff]  }
 0xe7a   : > { %v6448_v6 = vpop.eup %6447  ;;  %v3814_v8 = vmul.f32 %v8669_v37, %v3792_v62 }
 0xe7b   : > { %v3835_v48 = vadd.f32 %v8676_v34, %v3813_v58  ;;  %v3793_v29 = vmul.f32 %v6448_v6, %v8601_v20 }
 0xe7c   : > { %v3836_v59 = vadd.f32 %v8676_v34, %v3814_v8 }
 0xe7d   : > { %v3850_v42 = vpack.c.bf16 %v3835_v48, %v3834_v55  ;;  %v3815_v22 = vmul.f32 %v8669_v37, %v3793_v29 }
 0xe7e   : > { %v6450_v10 = vpop.eup %6449 }
 0xe7f   : > { %4105 = vmatmul.mubr.bf16.vlgmr.msra.gmra.mxu0 %v3850_v42  ;;  %4218 = vmatmul.mubr.bf16.vlgmr.msra.gmra.mxu1 %v3850_v42  ;;  %v6452_v13 = vpop.eup %6451  ;;  %v3837_v27 = vadd.f32 %v8676_v34, %v3815_v22  ;;  %v3795_v20 = vmul.f32 %v6450_v10, %v8614_v1  ;;  %v6130_v1 = vld [vmem:[#allocation11 + $0x28] sm:$0xff]   ;;  %v6134_v42 = vld [vmem:[#allocation11 + $0x20] sm:$0xff]   ;;  %v6139_v10 = vld [vmem:[#allocation11 + $0xd8] sm:$0xff]  }
 0xe80   : > { %4114 = vmatprep.mubr.bf16.mxu0 %v9047_v28  ;;  %4227 = vmatprep.mubr.bf16.mxu1 %v9047_v28  ;;  %v3794_v32 = vmul.f32 %v6452_v13, %v8604_v9  ;;  %v6136_v22 = vld [vmem:[#allocation11 + $0xa0] sm:$0xff]  }
 0xe81   : > { %5395 = vmatpush3.bf16.msra.mxu0 %v6122_v39  ;;  %5459 = vmatpush3.bf16.msra.mxu1 %v6124_v2  ;;  %v3851_v49 = vpack.c.bf16 %v3837_v27, %v3836_v59  ;;  %v3817_v36 = vmul.f32 %v8669_v37, %v3795_v20  ;;  %v6137_v2 = vld [vmem:[#allocation11 + $0x58] sm:$0xff]   ;;  %v6143_v59 = vld [vmem:[#allocation11 + $0xd0] sm:$0xff]  }
 0xe82   : > { %5396 = vmatprep.subr.bf16.mxu0 %v6125_v17  ;;  %5460 = vmatprep.subr.bf16.mxu1 %v6127_v24  ;;  %v6454_v50 = vpop.eup %6453  ;;  %v3816_v9 = vmul.f32 %v8669_v37, %v3794_v32 }
 0xe83   : > { %v6456_v57 = vpop.eup %6455  ;;  %v3839_v62 = vadd.f32 %v8676_v34, %v3817_v36  ;;  %v3797_v29 = vmul.f32 %v6454_v50, %v8621_v19 }
 0xe84   : > { %v3727_v46 = vpop.xlane.xlu1 %3726  ;;  %v3838_v8 = vadd.f32 %v8676_v34, %v3816_v9  ;;  %v3796_v13 = vmul.f32 %v6456_v57, %v8611_v25 }
 0xe85   : > { %v3750_v33 = vmul.f32 0.0078125, %v3727_v46  ;;  %5397 = vmatpush3.bf16.msra.mxu0 %v6126_v54  ;;  %5461 = vmatpush3.bf16.msra.mxu1 %v6128_v0  ;;  %v3819_v19 = vmul.f32 %v8669_v37, %v3797_v29  ;;  %v6138_v0 = vld [vmem:[#allocation11 + $0x18] sm:$0xff]   ;;  %v6141_v46 = vld [vmem:[#allocation11 + $0x50] sm:$0xff]  }
 0xe86   : > { %5398 = vmatprep.subr.bf16.mxu0 %v6129_v38  ;;  %5462 = vmatprep.subr.bf16.mxu1 %v6131_v56  ;;  %v3852_v54 = vpack.c.bf16 %v3839_v62, %v3838_v8  ;;  %v6140_v38 = vld [vmem:[#allocation11 + $0x98] sm:$0xff]  }
 0xe87   : > { %v3766_v11 = vadd.f32 1e-05, %v3750_v33  ;;  %4115 = vmatmul.mubr.bf16.gmra.mxu0 %v3851_v49  ;;  %4228 = vmatmul.mubr.bf16.gmra.mxu1 %v3851_v49  ;;  %v3818_v33 = vmul.f32 %v8669_v37, %v3796_v13  ;;  %v3841_v36 = vadd.f32 %v8676_v34, %v3819_v19 }
 0xe88   : > { %v3731_v58 = vpop.xlane.xlu1 %3730  ;;  %v3729_v6 = vpop.xlane.xlu0 %3728  ;;  %4124 = vmatprep.mubr.bf16.mxu0 %v9047_v28  ;;  %4237 = vmatprep.mubr.bf16.mxu1 %v9047_v28 }
 0xe89   : > { %6457 = vrsqrt.f32 %v3766_v11  ;;  %v3752_v55 = vmul.f32 0.0078125, %v3731_v58  ;;  %v3751_v48 = vmul.f32 0.0078125, %v3729_v6  ;;  %5399 = vmatpush3.bf16.msra.mxu0 %v6130_v1  ;;  %5463 = vmatpush3.bf16.msra.mxu1 %v6132_v35  ;;  %v6142_v1 = vld [vmem:[#allocation11 + $0x10] sm:$0xff]   ;;  %v3840_v57 = vadd.f32 %v8676_v34, %v3818_v33 }
 0xe8a   : > { %5400 = vmatprep.subr.bf16.mxu0 %v6133_v15  ;;  %5464 = vmatprep.subr.bf16.mxu1 %v6135_v43  ;;  %v6144_v35 = vld [vmem:[#allocation11 + $0x90] sm:$0xff]  }
 0xe8b   : > { %v3767_v39 = vadd.f32 1e-05, %v3751_v48  ;;  %v3768_v17 = vadd.f32 1e-05, %v3752_v55  ;;  %v3853_v9 = vpack.c.bf16 %v3841_v36, %v3840_v57  ;;  %v6148_v57 = vld [vmem:[#allocation11 + $0x88] sm:$0xff]  }
 0xe8c   : > { %v3733_v24 = vpop.xlane.xlu0 %3732  ;;  %v3735_v27 = vpop.xlane.xlu1 %3734 }
 0xe8d   : > { %v3753_v20 = vmul.f32 0.0078125, %v3733_v24  ;;  %6459 = vrsqrt.f32 %v3767_v39  ;;  %5401 = vmatpush3.bf16.msra.mxu0 %v6134_v42  ;;  %5465 = vmatpush3.bf16.msra.mxu1 %v6136_v22  ;;  %v3754_v32 = vmul.f32 0.0078125, %v3735_v27 }
 0xe8e   : > { %5402 = vmatprep.subr.bf16.mxu0 %v6137_v2  ;;  %5466 = vmatprep.subr.bf16.mxu1 %v6139_v10  ;;  %6461 = vrsqrt.f32 %v3768_v17 }
 0xe8f   : > { %v3769_v56 = vadd.f32 1e-05, %v3753_v20  ;;  %4125 = vmatmul.mubr.bf16.gmra.mxu0 %v3852_v54  ;;  %4238 = vmatmul.mubr.bf16.gmra.mxu1 %v3852_v54  ;;  %v3770_v11 = vadd.f32 1e-05, %v3754_v32 }
 0xe90   : > { %v3737_v25 = vpop.xlane.xlu0 %3736  ;;  %4134 = vmatprep.mubr.bf16.mxu0 %v9047_v28  ;;  %4247 = vmatprep.mubr.bf16.mxu1 %v9047_v28  ;;  %v3739_v15 = vpop.xlane.xlu1 %3738 }
 0xe91   : > { %v3755_v49 = vmul.f32 0.0078125, %v3737_v25  ;;  %6463 = vrsqrt.f32 %v3769_v56  ;;  %5403 = vmatpush3.bf16.msra.mxu0 %v6138_v0  ;;  %5467 = vmatpush3.bf16.msra.mxu1 %v6140_v38  ;;  %v3756_v55 = vmul.f32 0.0078125, %v3739_v15  ;;  %v6145_v15 = vld [vmem:[#allocation11 + $0x48] sm:$0xff]  }
 0xe92   : > { %5404 = vmatprep.subr.bf16.mxu0 %v6141_v46  ;;  %5468 = vmatprep.subr.bf16.mxu1 %v6143_v59 }
 0xe93   : > { %v3771_v50 = vadd.f32 1e-05, %v3755_v49  ;;  %v3772_v42 = vadd.f32 1e-05, %v3756_v55 }
 0xe94   : > { %v3741_v43 = vpop.xlane.xlu0 %3740 }
 0xe95   : > { %6465 = vrsqrt.f32 %v3771_v50  ;;  %v3757_v6 = vmul.f32 0.0078125, %v3741_v43  ;;  %5405 = vmatpush3.bf16.msra.mxu0 %v6142_v1  ;;  %5469 = vmatpush3.bf16.msra.mxu1 %v6144_v35  ;;  %v6146_v43 = vld [vmem:[#allocation11 + $0x8] sm:$0xff]  }
 0xe96   : > { %v6458_v58 = vpop.eup %6457  ;;  %6467 = vrsqrt.f32 %v3770_v11  ;;  %5406 = vmatprep.subr.bf16.mxu0 %v6145_v15 }
 0xe97   : > { %4135 = vmatmul.mubr.bf16.gmra.mxu0 %v3853_v9  ;;  %4248 = vmatmul.mubr.bf16.gmra.mxu1 %v3853_v9  ;;  %v3798_v48 = vmul.f32 %v6458_v58, %v8626_v51  ;;  %v3773_v62 = vadd.f32 1e-05, %v3757_v6  ;;  %v6150_v58 = vld [vmem:[#allocation11 + $0xc0] sm:$0xff]  }
 0xe98   : > { %4144 = vmatprep.mubr.bf16.mxu0 %v9047_v28  ;;  %4257 = vmatprep.mubr.bf16.mxu1 %v9047_v28  ;;  %v6151_v6 = vld [vmem:[#allocation11] sm:$0xff]  }
 0xe99   : > { %v3820_v39 = vmul.f32 %v8669_v37, %v3798_v48  ;;  %6469 = vrsqrt.f32 %v3773_v62  ;;  %5407 = vmatpush3.bf16.msra.mxu0 %v6146_v43  ;;  %v6152_v9 = vld [vmem:[#allocation11 + $0x80] sm:$0xff]  }
 0xe9a   : > { %v6460_v29 = vpop.eup %6459  ;;  %6471 = vrsqrt.f32 %v3772_v42  ;;  %v3890_v42 = vld [vmem:[%s8929_s10] sm:$0xf] }
 0xe9b   : > { %v3799_v22 = vmul.f32 %v6460_v29, %v8634_v45  ;;  %v6462_v2 = vpop.eup %6461  ;;  %v3842_v24 = vadd.f32 %v8676_v34, %v3820_v39 }
 0xe9c   : > { %v3800_v8 = vmul.f32 %v6462_v2, %v8631_v16 }
 0xe9d   : > { %v3821_v10 = vmul.f32 %v8669_v37, %v3799_v22 }
 0xe9e   : > { %v6464_v17 = vpop.eup %6463  ;;  %v3822_v54 = vmul.f32 %v8669_v37, %v3800_v8 }
 0xe9f   : > { %v3843_v51 = vadd.f32 %v8676_v34, %v3821_v10  ;;  %v3801_v13 = vmul.f32 %v6464_v17, %v8641_v4 }
 0xea0   : > { %v3844_v16 = vadd.f32 %v8676_v34, %v3822_v54 }
 0xea1   : > { %v3854_v27 = vpack.c.bf16 %v3843_v51, %v3842_v24  ;;  %v3823_v20 = vmul.f32 %v8669_v37, %v3801_v13 }
 0xea2   : > { %v6466_v45 = vpop.eup %6465 }
 0xea3   : > { %4145 = vmatmul.mubr.bf16.gmra.mxu0 %v3854_v27  ;;  %4258 = vmatmul.mubr.bf16.gmra.mxu1 %v3854_v27  ;;  %v6468_v19 = vpop.eup %6467  ;;  %v3845_v0 = vadd.f32 %v8676_v34, %v3823_v20  ;;  %v3803_v38 = vmul.f32 %v6466_v45, %v8654_v61 }
 0xea4   : > { %4154 = vmatprep.mubr.bf16.mxu0 %v9047_v28  ;;  %4267 = vmatprep.mubr.bf16.mxu1 %v9047_v28  ;;  %v3802_v4 = vmul.f32 %v6468_v19, %v8644_v53 }
 0xea5   : > { %v3855_v56 = vpack.c.bf16 %v3845_v0, %v3844_v16  ;;  %v3825_v46 = vmul.f32 %v8669_v37, %v3803_v38 }
 0xea6   : > { %v6470_v59 = vpop.eup %6469  ;;  %v3824_v25 = vmul.f32 %v8669_v37, %v3802_v4 }
 0xea7   : > { %v6472_v32 = vpop.eup %6471  ;;  %v3847_v33 = vadd.f32 %v8676_v34, %v3825_v46  ;;  %v3805_v61 = vmul.f32 %v6470_v59, %v8661_v26 }
 0xea8   : > { %v3846_v49 = vadd.f32 %v8676_v34, %v3824_v25  ;;  %v3804_v53 = vmul.f32 %v6472_v32, %v8651_v60  ;;  %v6147_v60 = vld [vmem:[#allocation11 + $0xc8] sm:$0xff]  }
 0xea9   : > { %v3827_v1 = vmul.f32 %v8669_v37, %v3805_v61  ;;  %5470 = vmatprep.subr.bf16.mxu1 %v6147_v60 }
 0xeaa   : > { %v3856_v36 = vpack.c.bf16 %v3847_v33, %v3846_v49  ;;  %v3826_v35 = vmul.f32 %v8669_v37, %v3804_v53  ;;  %5471 = vmatpush3.bf16.msra.mxu1 %v6148_v57  ;;  %v6149_v37 = vld [vmem:[#allocation11 + $0x40] sm:$0xff]  }
 0xeab   : > { %4155 = vmatmul.mubr.bf16.gmra.mxu0 %v3855_v56  ;;  %4268 = vmatmul.mubr.bf16.gmra.mxu1 %v3855_v56  ;;  %v3849_v50 = vadd.f32 %v8676_v34, %v3827_v1 }
 0xeac   : > { %4164 = vmatprep.mubr.bf16.mxu0 %v9047_v28  ;;  %4277 = vmatprep.mubr.bf16.mxu1 %v9047_v28  ;;  %v3848_v11 = vadd.f32 %v8676_v34, %v3826_v35 }
 0xead   : > { %5408 = vmatprep.subr.bf16.mxu0 %v6149_v37  ;;  %5472 = vmatprep.subr.bf16.mxu1 %v6150_v58 }
 0xeae   : > { %v3857_v26 = vpack.c.bf16 %v3849_v50, %v3848_v11  ;;  %5409 = vmatpush3.bf16.msra.mxu0 %v6151_v6  ;;  %5473 = vmatpush3.bf16.msra.mxu1 %v6152_v9 }
 0xeb3   : > { %4165 = vmatmul.mubr.bf16.gmra.mxu0 %v3856_v36  ;;  %4278 = vmatmul.mubr.bf16.gmra.mxu1 %v3856_v36 }
 0xeb4   : > { %4174 = vmatprep.mubr.bf16.mxu0 %v9047_v28  ;;  %4287 = vmatprep.mubr.bf16.mxu1 %v9047_v28  ;;  %v3892_v28 = vlaneseq }
 0xeb6   : > { %v3893_v34 = vshrl.u32 %v3892_v28, 7 }
 0xeb8   : > { %v3898_v55 = vsub.s32 1, %v3893_v34  ;;  %v3906_v48 = vsub.s32 3, %v3893_v34  ;;  %v3894_v62 = vsub.s32 0, %v3893_v34  ;;  %v3902_v29 = vsub.s32 2, %v3893_v34 }
 0xeba   : > { %v8740_v2 = vrot.slane %v3890_v42, %v3898_v55  ;;  %v8742_v10 = vrot.slane %v3890_v42, %v3906_v48  ;;  %v8744_v17 = vrot.slane %v3890_v42, %v3894_v62  ;;  %v8746_v24 = vrot.slane %v3890_v42, %v3902_v29 }
 0xebb   : > { %4175 = vmatmul.mubr.bf16.gmra.mxu0 %v3857_v26  ;;  %4288 = vmatmul.mubr.bf16.gmra.mxu1 %v3857_v26 }
 0xf3f   : > { %v4106_v22 = vpop.f32.mrf.mxu0  ;;  %v4219_v39 = vpop.f32.mrf.mxu1 }
 0xf40   : > { %v4107_v0 = vadd.f32 %v4106_v22, %v8744_v17  ;;  %v4220_v38 = vadd.f32 %v4219_v39, %v8746_v24 }
 0xf41   : > { %v4108_v51 = vpop.f32.mrf.mxu0  ;;  %v4221_v8 = vpop.f32.mrf.mxu1 }
 0xf42   : > { %v4109_v20 = vadd.f32 %v4108_v51, %v8740_v2  ;;  %v4222_v45 = vadd.f32 %v4221_v8, %v8742_v10  ;;  %v4298_v1 = vmax.f32 %v4107_v0, 0.0  ;;  %v4300_v35 = vmax.f32 %v4220_v38, 0.0 }
 0xf43   : > { %v4110_v13 = vpop.f32.mrf.mxu0  ;;  %v4223_v27 = vpop.f32.mrf.mxu1 }
 0xf44   : > { %v4111_v54 = vadd.f32 %v4110_v13, %v8744_v17  ;;  %v4224_v19 = vadd.f32 %v4223_v27, %v8746_v24  ;;  %v4299_v61 = vmax.f32 %v4109_v20, 0.0  ;;  %v4301_v49 = vmax.f32 %v4222_v45, 0.0 }
 0xf45   : > { %v4112_v16 = vpop.f32.mrf.mxu0  ;;  %v4225_v4 = vpop.f32.mrf.mxu1 }
 0xf46   : > { %v4113_v56 = vadd.f32 %v4112_v16, %v8740_v2  ;;  %v4226_v46 = vadd.f32 %v4225_v4, %v8742_v10  ;;  %v4302_v59 = vmax.f32 %v4111_v54, 0.0  ;;  %v4304_v32 = vmax.f32 %v4224_v19, 0.0 }
 0xf47   : > { %v4116_v25 = vpop.f32.mrf.mxu0  ;;  %v4229_v33 = vpop.f32.mrf.mxu1 }
 0xf48   : > { %v4303_v53 = vmax.f32 %v4113_v56, 0.0  ;;  %v4305_v36 = vmax.f32 %v4226_v46, 0.0  ;;  %v4362_v60 = vpack.c.bf16 %v4302_v59, %v4298_v1  ;;  %v4364_v43 = vpack.c.bf16 %v4304_v32, %v4300_v35 }
 0xf49   : > { %v4118_v50 = vpop.f32.mrf.mxu0  ;;  %v4231_v11 = vpop.f32.mrf.mxu1  ;;  %v4117_v34 = vadd.f32 %v4116_v25, %v8744_v17  ;;  %v4230_v55 = vadd.f32 %v4229_v33, %v8746_v24 }
 0xf4a   : > { %v4363_v26 = vpack.c.bf16 %v4303_v53, %v4299_v61  ;;  %v4365_v15 = vpack.c.bf16 %v4305_v36, %v4301_v49  ;;  %v4119_v57 = vadd.f32 %v4118_v50, %v8740_v2  ;;  %v4232_v6 = vadd.f32 %v4231_v11, %v8742_v10 }
 0xf4b   : > { %v4120_v37 = vpop.f32.mrf.mxu0  ;;  %v4233_v58 = vpop.f32.mrf.mxu1  ;;  %v4306_v54 = vmax.f32 %v4117_v34, 0.0  ;;  %v4308_v19 = vmax.f32 %v4230_v55, 0.0 }
 0xf4c   : > { %v4121_v9 = vadd.f32 %v4120_v37, %v8744_v17  ;;  %v4234_v28 = vadd.f32 %v4233_v58, %v8746_v24  ;;  %4689 = vmatprep.mubr.bf16.mxu0 %v4363_v26  ;;  %4786 = vmatprep.mubr.bf16.mxu1 %v4365_v15  ;;  %v4307_v13 = vmax.f32 %v4119_v57, 0.0  ;;  %v4309_v27 = vmax.f32 %v4232_v6, 0.0 }
 0xf4d   : > { %v4122_v48 = vpop.f32.mrf.mxu0  ;;  %v4235_v62 = vpop.f32.mrf.mxu1  ;;  %4690 = vmatmul.mubr.bf16.vlgmr.msra.gmra.mxu0 %v4362_v60  ;;  %4787 = vmatmul.mubr.bf16.vlgmr.msra.gmra.mxu1 %v4364_v43 }
 0xf4e   : > { %v4123_v29 = vadd.f32 %v4122_v48, %v8740_v2  ;;  %v4236_v42 = vadd.f32 %v4235_v62, %v8742_v10  ;;  %v4310_v22 = vmax.f32 %v4121_v9, 0.0  ;;  %v4312_v39 = vmax.f32 %v4234_v28, 0.0 }
 0xf4f   : > { %v4126_v51 = vpop.f32.mrf.mxu0  ;;  %v4239_v8 = vpop.f32.mrf.mxu1 }
 0xf50   : > { %v4311_v20 = vmax.f32 %v4123_v29, 0.0  ;;  %v4313_v45 = vmax.f32 %v4236_v42, 0.0  ;;  %v4366_v56 = vpack.c.bf16 %v4310_v22, %v4306_v54  ;;  %v4368_v46 = vpack.c.bf16 %v4312_v39, %v4308_v19 }
 0xf51   : > { %v4128_v0 = vpop.f32.mrf.mxu0  ;;  %v4241_v38 = vpop.f32.mrf.mxu1  ;;  %v4127_v53 = vadd.f32 %v4126_v51, %v8744_v17  ;;  %v4240_v36 = vadd.f32 %v4239_v8, %v8746_v24 }
 0xf52   : > { %v4367_v16 = vpack.c.bf16 %v4311_v20, %v4307_v13  ;;  %v4369_v4 = vpack.c.bf16 %v4313_v45, %v4309_v27  ;;  %v4129_v59 = vadd.f32 %v4128_v0, %v8740_v2  ;;  %v4242_v33 = vadd.f32 %v4241_v38, %v8742_v10 }
 0xf53   : > { %v4130_v32 = vpop.f32.mrf.mxu0  ;;  %v4243_v25 = vpop.f32.mrf.mxu1  ;;  %v4314_v9 = vmax.f32 %v4127_v53, 0.0  ;;  %v4316_v28 = vmax.f32 %v4240_v36, 0.0 }
 0xf54   : > { %v4131_v61 = vadd.f32 %v4130_v32, %v8744_v17  ;;  %v4244_v49 = vadd.f32 %v4243_v25, %v8746_v24  ;;  %4697 = vmatprep.mubr.bf16.mxu0 %v4367_v16  ;;  %4794 = vmatprep.mubr.bf16.mxu1 %v4369_v4  ;;  %v4315_v57 = vmax.f32 %v4129_v59, 0.0  ;;  %v4317_v37 = vmax.f32 %v4242_v33, 0.0 }
 0xf55   : > { %v4132_v1 = vpop.f32.mrf.mxu0  ;;  %v4245_v35 = vpop.f32.mrf.mxu1  ;;  %4698 = vmatmul.mubr.bf16.gmra.mxu0 %v4366_v56  ;;  %4795 = vmatmul.mubr.bf16.gmra.mxu1 %v4368_v46 }
 0xf56   : > { %v4133_v50 = vadd.f32 %v4132_v1, %v8740_v2  ;;  %v4246_v11 = vadd.f32 %v4245_v35, %v8742_v10  ;;  %v4318_v26 = vmax.f32 %v4131_v61, 0.0  ;;  %v4320_v15 = vmax.f32 %v4244_v49, 0.0 }
 0xf57   : > { %v4136_v60 = vpop.f32.mrf.mxu0  ;;  %v4249_v43 = vpop.f32.mrf.mxu1 }
 0xf58   : > { %v4319_v58 = vmax.f32 %v4133_v50, 0.0  ;;  %v4321_v6 = vmax.f32 %v4246_v11, 0.0  ;;  %v4370_v29 = vpack.c.bf16 %v4318_v26, %v4314_v9  ;;  %v4372_v42 = vpack.c.bf16 %v4320_v15, %v4316_v28 }
 0xf59   : > { %v4138_v34 = vpop.f32.mrf.mxu0  ;;  %v4251_v55 = vpop.f32.mrf.mxu1  ;;  %v4137_v20 = vadd.f32 %v4136_v60, %v8744_v17  ;;  %v4250_v45 = vadd.f32 %v4249_v43, %v8746_v24 }
 0xf5a   : > { %v4371_v48 = vpack.c.bf16 %v4319_v58, %v4315_v57  ;;  %v4373_v62 = vpack.c.bf16 %v4321_v6, %v4317_v37  ;;  %v4139_v22 = vadd.f32 %v4138_v34, %v8740_v2  ;;  %v4252_v8 = vadd.f32 %v4251_v55, %v8742_v10 }
 0xf5b   : > { %v4140_v39 = vpop.f32.mrf.mxu0  ;;  %v4253_v51 = vpop.f32.mrf.mxu1  ;;  %v4322_v25 = vmax.f32 %v4137_v20, 0.0  ;;  %v4324_v33 = vmax.f32 %v4250_v45, 0.0 }
 0xf5c   : > { %v4141_v13 = vadd.f32 %v4140_v39, %v8744_v17  ;;  %v4254_v27 = vadd.f32 %v4253_v51, %v8746_v24  ;;  %4705 = vmatprep.mubr.bf16.mxu0 %v4371_v48  ;;  %4802 = vmatprep.mubr.bf16.mxu1 %v4373_v62  ;;  %v4323_v56 = vmax.f32 %v4139_v22, 0.0  ;;  %v4325_v46 = vmax.f32 %v4252_v8, 0.0 }
 0xf5d   : > { %v4142_v54 = vpop.f32.mrf.mxu0  ;;  %v4255_v19 = vpop.f32.mrf.mxu1  ;;  %4706 = vmatmul.mubr.bf16.gmra.mxu0 %v4370_v29  ;;  %4803 = vmatmul.mubr.bf16.gmra.mxu1 %v4372_v42 }
 0xf5e   : > { %v4143_v0 = vadd.f32 %v4142_v54, %v8740_v2  ;;  %v4256_v38 = vadd.f32 %v4255_v19, %v8742_v10  ;;  %v4326_v16 = vmax.f32 %v4141_v13, 0.0  ;;  %v4328_v4 = vmax.f32 %v4254_v27, 0.0 }
 0xf60   : > { %v4327_v59 = vmax.f32 %v4143_v0, 0.0  ;;  %v4329_v32 = vmax.f32 %v4256_v38, 0.0  ;;  %v4374_v53 = vpack.c.bf16 %v4326_v16, %v4322_v25  ;;  %v4376_v36 = vpack.c.bf16 %v4328_v4, %v4324_v33 }
 0xf62   : > { %v4375_v61 = vpack.c.bf16 %v4327_v59, %v4323_v56  ;;  %v4377_v49 = vpack.c.bf16 %v4329_v32, %v4325_v46 }
 0xf63   : > { %v4146_v1 = vpop.f32.mrf.mxu0  ;;  %v4259_v35 = vpop.f32.mrf.mxu1 }
 0xf64   : > { %4713 = vmatprep.mubr.bf16.mxu0 %v4375_v61  ;;  %4810 = vmatprep.mubr.bf16.mxu1 %v4377_v49  ;;  %v4147_v58 = vadd.f32 %v4146_v1, %v8744_v17  ;;  %v4260_v6 = vadd.f32 %v4259_v35, %v8746_v24 }
 0xf65   : > { %v4148_v50 = vpop.f32.mrf.mxu0  ;;  %v4261_v11 = vpop.f32.mrf.mxu1  ;;  %4714 = vmatmul.mubr.bf16.gmra.mxu0 %v4374_v53  ;;  %4811 = vmatmul.mubr.bf16.gmra.mxu1 %v4376_v36 }
 0xf66   : > { %v4149_v60 = vadd.f32 %v4148_v50, %v8740_v2  ;;  %v4262_v43 = vadd.f32 %v4261_v11, %v8742_v10  ;;  %v4330_v13 = vmax.f32 %v4147_v58, 0.0  ;;  %v4332_v27 = vmax.f32 %v4260_v6, 0.0 }
 0xf67   : > { %v4150_v26 = vpop.f32.mrf.mxu0  ;;  %v4263_v15 = vpop.f32.mrf.mxu1 }
 0xf68   : > { %v4151_v57 = vadd.f32 %v4150_v26, %v8744_v17  ;;  %v4264_v37 = vadd.f32 %v4263_v15, %v8746_v24  ;;  %v4331_v22 = vmax.f32 %v4149_v60, 0.0  ;;  %v4333_v39 = vmax.f32 %v4262_v43, 0.0 }
 0xf69   : > { %v4152_v9 = vpop.f32.mrf.mxu0  ;;  %v4265_v28 = vpop.f32.mrf.mxu1 }
 0xf6a   : > { %v4153_v34 = vadd.f32 %v4152_v9, %v8740_v2  ;;  %v4266_v55 = vadd.f32 %v4265_v28, %v8742_v10  ;;  %v4334_v48 = vmax.f32 %v4151_v57, 0.0  ;;  %v4336_v62 = vmax.f32 %v4264_v37, 0.0 }
 0xf6b   : > { %v4156_v29 = vpop.f32.mrf.mxu0  ;;  %v4269_v42 = vpop.f32.mrf.mxu1 }
 0xf6c   : > { %v4335_v51 = vmax.f32 %v4153_v34, 0.0  ;;  %v4337_v8 = vmax.f32 %v4266_v55, 0.0  ;;  %v4378_v0 = vpack.c.bf16 %v4334_v48, %v4330_v13  ;;  %v4380_v38 = vpack.c.bf16 %v4336_v62, %v4332_v27 }
 0xf6d   : > { %v4158_v20 = vpop.f32.mrf.mxu0  ;;  %v4271_v45 = vpop.f32.mrf.mxu1  ;;  %v4157_v25 = vadd.f32 %v4156_v29, %v8744_v17  ;;  %v4270_v33 = vadd.f32 %v4269_v42, %v8746_v24 }
 0xf6e   : > { %v4379_v54 = vpack.c.bf16 %v4335_v51, %v4331_v22  ;;  %v4381_v19 = vpack.c.bf16 %v4337_v8, %v4333_v39  ;;  %v4159_v16 = vadd.f32 %v4158_v20, %v8740_v2  ;;  %v4272_v46 = vadd.f32 %v4271_v45, %v8742_v10 }
 0xf6f   : > { %v4160_v4 = vpop.f32.mrf.mxu0  ;;  %v4273_v56 = vpop.f32.mrf.mxu1  ;;  %v4338_v57 = vmax.f32 %v4157_v25, 0.0  ;;  %v4340_v37 = vmax.f32 %v4270_v33, 0.0 }
 0xf70   : > { %v4161_v59 = vadd.f32 %v4160_v4, %v8744_v17  ;;  %v4274_v32 = vadd.f32 %v4273_v56, %v8746_v24  ;;  %4721 = vmatprep.mubr.bf16.mxu0 %v4379_v54  ;;  %4818 = vmatprep.mubr.bf16.mxu1 %v4381_v19  ;;  %v4339_v26 = vmax.f32 %v4159_v16, 0.0  ;;  %v4341_v15 = vmax.f32 %v4272_v46, 0.0 }
 0xf71   : > { %v4162_v61 = vpop.f32.mrf.mxu0  ;;  %v4275_v49 = vpop.f32.mrf.mxu1  ;;  %4722 = vmatmul.mubr.bf16.gmra.mxu0 %v4378_v0  ;;  %4819 = vmatmul.mubr.bf16.gmra.mxu1 %v4380_v38 }
 0xf72   : > { %v4163_v53 = vadd.f32 %v4162_v61, %v8740_v2  ;;  %v4276_v36 = vadd.f32 %v4275_v49, %v8742_v10  ;;  %v4342_v1 = vmax.f32 %v4161_v59, 0.0  ;;  %v4344_v35 = vmax.f32 %v4274_v32, 0.0 }
 0xf73   : > { %v4166_v50 = vpop.f32.mrf.mxu0  ;;  %v4279_v11 = vpop.f32.mrf.mxu1 }
 0xf74   : > { %v4343_v60 = vmax.f32 %v4163_v53, 0.0  ;;  %v4345_v43 = vmax.f32 %v4276_v36, 0.0  ;;  %v4382_v34 = vpack.c.bf16 %v4342_v1, %v4338_v57  ;;  %v4384_v55 = vpack.c.bf16 %v4344_v35, %v4340_v37 }
 0xf75   : > { %v4168_v58 = vpop.f32.mrf.mxu0  ;;  %v4281_v6 = vpop.f32.mrf.mxu1  ;;  %v4167_v51 = vadd.f32 %v4166_v50, %v8744_v17  ;;  %v4280_v8 = vadd.f32 %v4279_v11, %v8746_v24 }
 0xf76   : > { %v4383_v9 = vpack.c.bf16 %v4343_v60, %v4339_v26  ;;  %v4385_v28 = vpack.c.bf16 %v4345_v43, %v4341_v15  ;;  %v4169_v48 = vadd.f32 %v4168_v58, %v8740_v2  ;;  %v4282_v42 = vadd.f32 %v4281_v6, %v8742_v10 }
 0xf77   : > { %v4170_v62 = vpop.f32.mrf.mxu0  ;;  %v4283_v29 = vpop.f32.mrf.mxu1  ;;  %v4346_v59 = vmax.f32 %v4167_v51, 0.0  ;;  %v4348_v32 = vmax.f32 %v4280_v8, 0.0 }
 0xf78   : > { %v4171_v22 = vadd.f32 %v4170_v62, %v8744_v17  ;;  %v4284_v39 = vadd.f32 %v4283_v29, %v8746_v24  ;;  %4729 = vmatprep.mubr.bf16.mxu0 %v4383_v9  ;;  %4826 = vmatprep.mubr.bf16.mxu1 %v4385_v28  ;;  %v4347_v16 = vmax.f32 %v4169_v48, 0.0  ;;  %v4349_v4 = vmax.f32 %v4282_v42, 0.0 }
 0xf79   : > { %v4172_v13 = vpop.f32.mrf.mxu0  ;;  %v4285_v27 = vpop.f32.mrf.mxu1  ;;  %4730 = vmatmul.mubr.bf16.gmra.mxu0 %v4382_v34  ;;  %4827 = vmatmul.mubr.bf16.gmra.mxu1 %v4384_v55 }
 0xf7a   : > { %v4173_v20 = vadd.f32 %v4172_v13, %v8740_v2  ;;  %v4286_v45 = vadd.f32 %v4285_v27, %v8742_v10  ;;  %v4350_v54 = vmax.f32 %v4171_v22, 0.0  ;;  %v4352_v19 = vmax.f32 %v4284_v39, 0.0 }
 0xf7b   : > { %v4176_v0 = vpop.f32.mrf.mxu0  ;;  %v4289_v38 = vpop.f32.mrf.mxu1 }
 0xf7c   : > { %v4351_v56 = vmax.f32 %v4173_v20, 0.0  ;;  %v4353_v46 = vmax.f32 %v4286_v45, 0.0  ;;  %v4386_v53 = vpack.c.bf16 %v4350_v54, %v4346_v59  ;;  %v4388_v36 = vpack.c.bf16 %v4352_v19, %v4348_v32 }
 0xf7d   : > { %v4178_v25 = vpop.f32.mrf.mxu0  ;;  %v4291_v33 = vpop.f32.mrf.mxu1  ;;  %v4177_v60 = vadd.f32 %v4176_v0, %v8744_v17  ;;  %v4290_v43 = vadd.f32 %v4289_v38, %v8746_v24 }
 0xf7e   : > { %v4387_v61 = vpack.c.bf16 %v4351_v56, %v4347_v16  ;;  %v4389_v49 = vpack.c.bf16 %v4353_v46, %v4349_v4  ;;  %v4179_v1 = vadd.f32 %v4178_v25, %v8740_v2  ;;  %v4292_v11 = vadd.f32 %v4291_v33, %v8742_v10 }
 0xf7f   : > { %v4180_v35 = vpop.f32.mrf.mxu0  ;;  %v4293_v50 = vpop.f32.mrf.mxu1  ;;  %v4354_v29 = vmax.f32 %v4177_v60, 0.0  ;;  %v4356_v42 = vmax.f32 %v4290_v43, 0.0 }
 0xf80   : > { %v4181_v26 = vadd.f32 %v4180_v35, %v8744_v17  ;;  %v4294_v15 = vadd.f32 %v4293_v50, %v8746_v24  ;;  %4737 = vmatprep.mubr.bf16.mxu0 %v4387_v61  ;;  %4834 = vmatprep.mubr.bf16.mxu1 %v4389_v49  ;;  %v4355_v34 = vmax.f32 %v4179_v1, 0.0  ;;  %v4357_v55 = vmax.f32 %v4292_v11, 0.0 }
 0xf81   : > { %v4182_v57 = vpop.f32.mrf.mxu0  ;;  %v4295_v37 = vpop.f32.mrf.mxu1  ;;  %4738 = vmatmul.mubr.bf16.gmra.mxu0 %v4386_v53  ;;  %4835 = vmatmul.mubr.bf16.gmra.mxu1 %v4388_v36 }
 0xf82   : > { %v4183_v58 = vadd.f32 %v4182_v57, %v8740_v2  ;;  %v4296_v6 = vadd.f32 %v4295_v37, %v8742_v10  ;;  %v4358_v9 = vmax.f32 %v4181_v26, 0.0  ;;  %v4360_v28 = vmax.f32 %v4294_v15, 0.0  ;;  %v8815_v10 = vld [vmem:[%s8931_s12] ss:$0 sm:$0xff] }
 0xf84   : > { %v4359_v48 = vmax.f32 %v4183_v58, 0.0  ;;  %v4361_v62 = vmax.f32 %v4296_v6, 0.0  ;;  %v4390_v39 = vpack.c.bf16 %v4358_v9, %v4354_v29  ;;  %v4392_v24 = vpack.c.bf16 %v4360_v28, %v4356_v42 }
 0xf86   : > { %v4391_v22 = vpack.c.bf16 %v4359_v48, %v4355_v34  ;;  %v4393_v17 = vpack.c.bf16 %v4361_v62, %v4357_v55 }
 0xf88   : > { %4745 = vmatprep.mubr.bf16.mxu0 %v4391_v22  ;;  %4842 = vmatprep.mubr.bf16.mxu1 %v4393_v17 }
 0xf89   : > { %4746 = vmatmul.mubr.bf16.gmra.mxu0 %v4390_v39  ;;  %4843 = vmatmul.mubr.bf16.gmra.mxu1 %v4392_v24 }
0x100d   : > { %v5410_v51 = vpop.f32.mrf.mxu0  ;;  %v5474_v2 = vpop.f32.mrf.mxu1 }
0x100f   : > { %v5411_v8 = vpop.f32.mrf.mxu0  ;;  %v5475_v13 = vpop.f32.mrf.mxu1 }
0x1010   : > { %v5412_v27 = vadd.f32 %v5411_v8, %v5410_v51  ;;  %v5476_v19 = vadd.f32 %v5475_v13, %v5474_v2 }
0x1011   : > { %v5413_v20 = vpop.f32.mrf.mxu0  ;;  %v5477_v45 = vpop.f32.mrf.mxu1 }
0x1012   : > { %v4692_v54 = vadd.f32 %v5412_v27, %v8815_v10 }
0x1013   : > { %v5414_v0 = vpop.f32.mrf.mxu0  ;;  %v5478_v38 = vpop.f32.mrf.mxu1 }
0x1014   : > { %v4789_v16 = vadd.f32 %v5476_v19, %v4692_v54  ;;  %v5415_v4 = vadd.f32 %v5414_v0, %v5413_v20  ;;  %v5479_v25 = vadd.f32 %v5478_v38, %v5477_v45 }
0x1015   : > { %v5416_v56 = vpop.f32.mrf.mxu0  ;;  %v5480_v46 = vpop.f32.mrf.mxu1 }
0x1016   : > { %v4851_v59 = vadd.f32 %v4789_v16, %v8496_v44  ;;  %v4695_v32 = vadd.f32 %v5415_v4, %v8815_v10 }
0x1017   : > { %v5417_v33 = vpop.f32.mrf.mxu0  ;;  %v5481_v61 = vpop.f32.mrf.mxu1 }
0x1018   : > { %4867 = vst [vmem:[%s8822_s30] sm:$0xff] %v4851_v59  ;;  %v4792_v49 = vadd.f32 %v5479_v25, %v4695_v32  ;;  %v5418_v53 = vadd.f32 %v5417_v33, %v5416_v56  ;;  %v5482_v50 = vadd.f32 %v5481_v61, %v5480_v46 }
0x1019   : > { %v5419_v36 = vpop.f32.mrf.mxu0  ;;  %v5483_v1 = vpop.f32.mrf.mxu1 }
0x101a   : > { %v4852_v35 = vadd.f32 %v4792_v49, %v8507_v5  ;;  %v4700_v44 = vadd.f32 %v5418_v53, %v8815_v10 }
0x101b   : > { %v5420_v11 = vpop.f32.mrf.mxu0  ;;  %v5484_v26 = vpop.f32.mrf.mxu1 }
0x101c   : > { %4868 = vst [vmem:[%s8822_s30 + $0x8] sm:$0xff] %v4852_v35  ;;  %v4797_v15 = vadd.f32 %v5482_v50, %v4700_v44  ;;  %v5421_v60 = vadd.f32 %v5420_v11, %v5419_v36  ;;  %v5485_v6 = vadd.f32 %v5484_v26, %v5483_v1 }
0x101d   : > { %v5422_v43 = vpop.f32.mrf.mxu0  ;;  %v5486_v57 = vpop.f32.mrf.mxu1 }
0x101e   : > { %v4853_v37 = vadd.f32 %v4797_v15, %v8504_v18  ;;  %v4703_v58 = vadd.f32 %v5421_v60, %v8815_v10 }
0x101f   : > { %v5423_v9 = vpop.f32.mrf.mxu0  ;;  %v5487_v28 = vpop.f32.mrf.mxu1 }
0x1020   : > { %4869 = vst [vmem:[%s8822_s30 + $0x10] sm:$0xff] %v4853_v37  ;;  %v4800_v5 = vadd.f32 %v5485_v6, %v4703_v58  ;;  %v5424_v34 = vadd.f32 %v5423_v9, %v5422_v43  ;;  %v5488_v42 = vadd.f32 %v5487_v28, %v5486_v57 }
0x1021   : > { %v5425_v55 = vpop.f32.mrf.mxu0  ;;  %v5489_v48 = vpop.f32.mrf.mxu1 }
0x1022   : > { %v4854_v62 = vadd.f32 %v4800_v5, %v8513_v41  ;;  %v4708_v29 = vadd.f32 %v5424_v34, %v8815_v10 }
0x1023   : > { %v5426_v22 = vpop.f32.mrf.mxu0  ;;  %v5490_v17 = vpop.f32.mrf.mxu1 }
0x1024   : > { %4870 = vst [vmem:[%s8822_s30 + $0x18] sm:$0xff] %v4854_v62  ;;  %v4805_v18 = vadd.f32 %v5488_v42, %v4708_v29  ;;  %v5427_v39 = vadd.f32 %v5426_v22, %v5425_v55  ;;  %v5491_v13 = vadd.f32 %v5490_v17, %v5489_v48 }
0x1025   : > { %v5428_v24 = vpop.f32.mrf.mxu0  ;;  %v5492_v51 = vpop.f32.mrf.mxu1 }
0x1026   : > { %v4855_v2 = vadd.f32 %v4805_v18, %v8519_v7  ;;  %v4711_v8 = vadd.f32 %v5427_v39, %v8815_v10 }
0x1027   : > { %v5429_v27 = vpop.f32.mrf.mxu0  ;;  %v5493_v20 = vpop.f32.mrf.mxu1 }
0x1028   : > { %4871 = vst [vmem:[%s8822_s30 + $0x20] sm:$0xff] %v4855_v2  ;;  %v4808_v41 = vadd.f32 %v5491_v13, %v4711_v8  ;;  %v5430_v45 = vadd.f32 %v5429_v27, %v5428_v24  ;;  %v5494_v16 = vadd.f32 %v5493_v20, %v5492_v51 }
0x1029   : > { %v5431_v54 = vpop.f32.mrf.mxu0  ;;  %v5495_v19 = vpop.f32.mrf.mxu1 }
0x102a   : > { %v4856_v0 = vadd.f32 %v4808_v41, %v8529_v14  ;;  %v4716_v38 = vadd.f32 %v5430_v45, %v8815_v10 }
0x102b   : > { %v5432_v4 = vpop.f32.mrf.mxu0  ;;  %v5496_v56 = vpop.f32.mrf.mxu1 }
0x102c   : > { %4872 = vst [vmem:[%s8822_s30 + $0x28] sm:$0xff] %v4856_v0  ;;  %v4813_v7 = vadd.f32 %v5494_v16, %v4716_v38  ;;  %v5433_v46 = vadd.f32 %v5432_v4, %v5431_v54  ;;  %v5497_v25 = vadd.f32 %v5496_v56, %v5495_v19 }
0x102e   : > { %v4857_v59 = vadd.f32 %v4813_v7, %v8526_v23  ;;  %v4719_v32 = vadd.f32 %v5433_v46, %v8815_v10 }
0x1030   : > { %4873 = vst [vmem:[%s8822_s30 + $0x30] sm:$0xff] %v4857_v59  ;;  %v4816_v33 = vadd.f32 %v5497_v25, %v4719_v32 }
0x1031   : > { %v5434_v61 = vpop.f32.mrf.mxu0  ;;  %v5498_v49 = vpop.f32.mrf.mxu1 }
0x1032   : > { %v4858_v14 = vadd.f32 %v4816_v33, %v8534_v40 }
0x1033   : > { %v5435_v53 = vpop.f32.mrf.mxu0  ;;  %v5499_v36 = vpop.f32.mrf.mxu1 }
0x1034   : > { %4874 = vst [vmem:[%s8822_s30 + $0x38] sm:$0xff] %v4858_v14  ;;  %v5436_v1 = vadd.f32 %v5435_v53, %v5434_v61  ;;  %v5500_v11 = vadd.f32 %v5499_v36, %v5498_v49 }
0x1035   : > { %v5437_v35 = vpop.f32.mrf.mxu0  ;;  %v5501_v44 = vpop.f32.mrf.mxu1 }
0x1036   : > { %v4724_v50 = vadd.f32 %v5436_v1, %v8815_v10 }
0x1037   : > { %v5438_v23 = vpop.f32.mrf.mxu0  ;;  %v5502_v26 = vpop.f32.mrf.mxu1 }
0x1038   : > { %v4821_v15 = vadd.f32 %v5500_v11, %v4724_v50  ;;  %v5439_v60 = vadd.f32 %v5438_v23, %v5437_v35  ;;  %v5503_v58 = vadd.f32 %v5502_v26, %v5501_v44 }
0x1039   : > { %v5440_v43 = vpop.f32.mrf.mxu0  ;;  %v5504_v57 = vpop.f32.mrf.mxu1 }
0x103a   : > { %v4859_v37 = vadd.f32 %v4821_v15, %v8544_v52  ;;  %v4727_v40 = vadd.f32 %v5439_v60, %v8815_v10 }
0x103b   : > { %v5441_v6 = vpop.f32.mrf.mxu0  ;;  %v5505_v9 = vpop.f32.mrf.mxu1 }
0x103c   : > { %4875 = vst [vmem:[%s8822_s30 + $0x40] sm:$0xff] %v4859_v37  ;;  %v4824_v28 = vadd.f32 %v5503_v58, %v4727_v40  ;;  %v5442_v5 = vadd.f32 %v5441_v6, %v5440_v43  ;;  %v5506_v29 = vadd.f32 %v5505_v9, %v5504_v57 }
0x103d   : > { %v5443_v34 = vpop.f32.mrf.mxu0  ;;  %v5507_v55 = vpop.f32.mrf.mxu1 }
0x103e   : > { %v4860_v48 = vadd.f32 %v4824_v28, %v8555_v21  ;;  %v4732_v62 = vadd.f32 %v5442_v5, %v8815_v10 }
0x103f   : > { %v5444_v42 = vpop.f32.mrf.mxu0  ;;  %v5508_v22 = vpop.f32.mrf.mxu1 }
0x1040   : > { %4876 = vst [vmem:[%s8822_s30 + $0x48] sm:$0xff] %v4860_v48  ;;  %v4829_v52 = vadd.f32 %v5506_v29, %v4732_v62  ;;  %v5445_v17 = vadd.f32 %v5444_v42, %v5443_v34  ;;  %v5509_v2 = vadd.f32 %v5508_v22, %v5507_v55 }
0x1041   : > { %v5446_v18 = vpop.f32.mrf.mxu0  ;;  %v5510_v39 = vpop.f32.mrf.mxu1 }
0x1042   : > { %v4861_v24 = vadd.f32 %v4829_v52, %v8552_v47  ;;  %v4735_v51 = vadd.f32 %v5445_v17, %v8815_v10 }
0x1043   : > { %v5447_v8 = vpop.f32.mrf.mxu0  ;;  %v5511_v13 = vpop.f32.mrf.mxu1 }
0x1044   : > { %4877 = vst [vmem:[%s8822_s30 + $0x50] sm:$0xff] %v4861_v24  ;;  %v4832_v21 = vadd.f32 %v5509_v2, %v4735_v51  ;;  %v5448_v27 = vadd.f32 %v5447_v8, %v5446_v18  ;;  %v5512_v19 = vadd.f32 %v5511_v13, %v5510_v39 }
0x1045   : > { %v5449_v20 = vpop.f32.mrf.mxu0  ;;  %v5513_v41 = vpop.f32.mrf.mxu1 }
0x1046   : > { %v4862_v45 = vadd.f32 %v4832_v21, %v8561_v31  ;;  %v4740_v54 = vadd.f32 %v5448_v27, %v8815_v10 }
0x1047   : > { %v5450_v0 = vpop.f32.mrf.mxu0  ;;  %v5514_v38 = vpop.f32.mrf.mxu1 }
0x1048   : > { %4878 = vst [vmem:[%s8822_s30 + $0x58] sm:$0xff] %v4862_v45  ;;  %v4837_v47 = vadd.f32 %v5512_v19, %v4740_v54  ;;  %v5451_v16 = vadd.f32 %v5450_v0, %v5449_v20  ;;  %v5515_v59 = vadd.f32 %v5514_v38, %v5513_v41 }
0x1049   : > { %v5452_v4 = vpop.f32.mrf.mxu0  ;;  %v5516_v56 = vpop.f32.mrf.mxu1 }
0x104a   : > { %v4863_v7 = vadd.f32 %v4837_v47, %v8567_v3  ;;  %v4743_v46 = vadd.f32 %v5451_v16, %v8815_v10 }
0x104b   : > { %v5453_v32 = vpop.f32.mrf.mxu0  ;;  %v5517_v25 = vpop.f32.mrf.mxu1 }
0x104c   : > { %4879 = vst [vmem:[%s8822_s30 + $0x60] sm:$0xff] %v4863_v7  ;;  %v4840_v31 = vadd.f32 %v5515_v59, %v4743_v46  ;;  %v5454_v33 = vadd.f32 %v5453_v32, %v5452_v4  ;;  %v5518_v36 = vadd.f32 %v5517_v25, %v5516_v56 }
0x104d   : > { %v5455_v61 = vpop.f32.mrf.mxu0  ;;  %v5519_v49 = vpop.f32.mrf.mxu1 }
0x104e   : > { %v4864_v14 = vadd.f32 %v4840_v31, %v8577_v63  ;;  %v4748_v53 = vadd.f32 %v5454_v33, %v8815_v10 }
0x104f   : > { %v5456_v3 = vpop.f32.mrf.mxu0  ;;  %v5520_v1 = vpop.f32.mrf.mxu1 }
0x1050   : > { %4880 = vst [vmem:[%s8822_s30 + $0x68] sm:$0xff] %v4864_v14  ;;  %v4845_v35 = vadd.f32 %v5518_v36, %v4748_v53  ;;  %v5457_v44 = vadd.f32 %v5456_v3, %v5455_v61  ;;  %v5521_v23 = vadd.f32 %v5520_v1, %v5519_v49 }
0x1052   : > { %v4865_v50 = vadd.f32 %v4845_v35, %v8574_v12  ;;  %v4751_v11 = vadd.f32 %v5457_v44, %v8815_v10 }
0x1054   : > { %4881 = vst [vmem:[%s8822_s30 + $0x70] sm:$0xff] %v4865_v50  ;;  %v4848_v63 = vadd.f32 %v5521_v23, %v4751_v11 }
0x1056   : > { %v4866_v26 = vadd.f32 %v4848_v63, %v8582_v30 }
0x1058   : > { %4882 = vst [vmem:[%s8822_s30 + $0x78] sm:$0xff] %v4866_v26 }
0x1059   : > { %6676 = shalt.err (!%p6673_p3)
}
0x105a   : > { %s6677_s5 = scalar_lea.hbm %s8872_s9, 2048  ;;  %s6681_s30 = scalar_lea.hbm %s9048_s17, 4096 }
0x105b   : > { %p6678_p4 = scmp.ne.s32.totalorder %s8872_s9, %s6677_s5  ;;  %p6682_p2 = scmp.lt.s32.totalorder %s8872_s9, %s9048_s17 }
0x105c   : > { %p6683_p7 = scmp.lt.s32.totalorder %s6681_s30, %s6677_s5 }
0x105d   : > { %p6679_p12 = pnand %p6678_p4, %p9049_p11 }
0x105e   : > { %p6684_p8 = por %p6683_p7, %p6682_p2 }
0x105f   : > { %p6680_p6 = pneg %p6679_p12 }
0x1061   : > { %p6685_p10 = pnand %p6684_p8, %p6680_p6 }
0x1063   : > { %6688 = shalt.err (!%p6685_p10)
}
0x1064   : > { %s6760_s23 = smov 128   ;;  %s6761_s19 = smov 8  }
0x1065   : > { %5944 = dma.vmem_to_hbm [thread:$0]  (%p9049_p11), %s8874_s22, 2048, %s8872_s9, %s4884_s29, %s6760_s23, %s6760_s23, %s6761_s19  }
0x1066 PF: > { %s4912_s14 = sand.u32 1, %s6727_s25   ;;  %p9050_p13 = scmp.ne.s32.totalorder %s8984_s24, 0 }
0x1067   : > { %p9051_p0 = scmp.ge.s32.totalorder %s6739_s28, 2  ;;  %s4913_s18 = scalar_lea.sflag [#allocation4], %s4912_s14 }
0x1069   : > { %p5967_p5 = pnand %p9051_p0, %p9050_p13 }
0x106b   : > { %p5968_p9 = pneg %p5967_p5 }
0x106d   : > { %6722 = dma.done.wait (%p5968_p9), %s4913_s18, 2048  }
0x106e   : > { %6724 = vsyncadd (%p5968_p9), %s4913_s18, 4294965248  ;;  %s9052_s4 = sld [smem:[#allocation19_spill]]  ;;  %p29_p1 = scmp.ge.s32.totalorder %s6933_s21, 4  }
0x106f   : > { %s9053_s25 = smov %s6731_s26  ;;  %s9054_s26 = smov %s6735_s27 }
0x1070   : > { %s9056_s28 = smov %s6933_s21  ;;  %31 = sbr.rel (!%p29_p1) target bundleno = 15 (0xf), region = 137 }
0x1074   : > { %s9055_s27 = smov %s9052_s4 }
0x1075   :  { %4918 = vsyncpa [#allocation3], 1 }
0x1076   :  { %4920 = vsyncpa [#allocation3 + $0x1], 1 }
0x1077   :  { %4921 = vsyncpa [#allocation6], 1 }
0x1078   :  { %4922 = vsyncpa [#allocation9], 1 }
0x1079   :  { %4923 = vsyncpa [#allocation12], 1 }
0x107a   :  { %4924 = vsyncpa [#allocation4], 1 }
0x107b   :  { %4926 = vsyncpa [#allocation4 + $0x1], 1 }

</bundles_post_ra>
